<compile_context>
chip_gen: v7x
topology: tpu7x:2x2x1
jax: 0.10.0
libtpu: 0.0.40
codegen_flags: <defaults>
</compile_context>

<pallas_src>
import math

import jax
import jax.numpy as jnp
from jax import lax
from jax.experimental import pallas as pl
from jax.experimental.pallas import tpu as pltpu

# --- TransformerModel hyper-parameters (module defaults) ---
TASK = "maintask"
FEATURES = 9
LAYERS = 2
NODES = 16
NUM_HEADS = 4
HEAD_DIM = NODES // NUM_HEADS
FFN = 2048          # nn.TransformerEncoderLayer default dim_feedforward
EPS = 1e-5          # nn.LayerNorm default eps
N_CLASSES = 2       # task == 'maintask'

# --- small example sizes ---
B = 2
S = 8
R = B * S                     # flattened rows
BHS = B * NUM_HEADS * S       # stacked (batch, head, query) rows


def _layernorm(x, gamma, beta):
    mu = jnp.mean(x, axis=-1, keepdims=True)
    var = jnp.mean((x - mu) ** 2, axis=-1, keepdims=True)
    return (x - mu) * lax.rsqrt(var + EPS) * gamma + beta


def _softmax_rows(x):
    m = jnp.max(x, axis=-1, keepdims=True)
    e = jnp.exp(x - m)
    return e * pl.reciprocal(jnp.sum(e, axis=-1, keepdims=True), approx=True)


def transformer_kernel(x_ref,
                       w_emb_ref, b_emb_ref, g_emb_ref, be_emb_ref,
                       wqkv_ref, bqkv_ref,
                       wo_ref, bo_ref, g1_ref, be1_ref,
                       w1a_ref, w2_ref, b2_ref, g2_ref, be2_ref,
                       wc_ref, bc_ref,
                       ebd_ref, sel_ref, hmask_ref, negm_ref, pool_ref, aug_ref,
                       out_ref):
    f32 = jnp.float32
    bf16 = jnp.bfloat16

    # --- EmbeddingModule on flattened (B*S, FEATURES): Linear(9->16) + LayerNorm ---
    h = jnp.dot(x_ref[...], w_emb_ref[...],
                preferred_element_type=f32) + b_emb_ref[...]
    h = _layernorm(h, g_emb_ref[...], be_emb_ref[...])

    ebd = ebd_ref[...]        # (BHS, R)      0/1 row expansion (b,h,i) <- (b,i)
    sel = sel_ref[...]        # (R, BHS)      head-sum selection (= ebd.T)
    hmask = hmask_ref[...]    # (BHS, NODES)  per-head column mask
    negm = negm_ref[...]      # (BHS, R)      0 / -1e9 cross-batch mask
    aug = aug_ref[...]        # (R, NODES)    ones column (for the b1 fold)

    # --- FeatureModule: post-norm encoder layers (dropout=0, src mask unused) ---
    for l in range(LAYERS):
        # fused QKV projection (wq / bq pre-scaled by 1/sqrt(HEAD_DIM) host-side)
        qkv = jnp.dot(h.astype(bf16), wqkv_ref[l],
                      preferred_element_type=f32) + bqkv_ref[l]        # (R, 48)
        q = qkv[:, 0 * NODES:1 * NODES]
        k = qkv[:, 1 * NODES:2 * NODES]
        v = qkv[:, 2 * NODES:3 * NODES]

        # collapsed multi-head attention: 4 MXU ops + one stacked softmax (f32)
        q_bd = jnp.dot(ebd, q, preferred_element_type=f32) * hmask     # (BHS, NODES)
        s = lax.dot_general(q_bd, k, (((1,), (1,)), ((), ())),
                            preferred_element_type=f32) + negm         # (BHS, R)
        p = _softmax_rows(s)
        ctx = jnp.dot(p, v, preferred_element_type=f32) * hmask        # (BHS, NODES)
        attn = jnp.dot(sel, ctx, preferred_element_type=f32)           # (R, NODES)

        o = jnp.dot(attn.astype(bf16), wo_ref[l],
                    preferred_element_type=f32) + bo_ref[l]
        h = _layernorm(h + o, g1_ref[l], be1_ref[l])

        # FFN: b1 folded into w1 via augmented ones column; bf16 operands, f32 acc
        h_aug = jnp.concatenate([h, aug], axis=-1).astype(bf16)        # (R, 2*NODES)
        f = jnp.dot(h_aug, w1a_ref[l], preferred_element_type=f32)     # (R, FFN)
        f = jnp.maximum(f.astype(bf16), 0)                             # ReLU (bf16 VALU)
        f = jnp.dot(f, w2_ref[l], preferred_element_type=f32) + b2_ref[l]
        h = _layernorm(h + f, g2_ref[l], be2_ref[l])

    # --- ClassifierModule (maintask): seq-mean via constant pooling matmul, Linear(16->2)
    m = jnp.dot(pool_ref[...], h, preferred_element_type=f32)          # (B, NODES)
    out_ref[...] = jnp.dot(m.astype(bf16), wc_ref[...],
                           preferred_element_type=f32) + bc_ref[...]


def transformer_forward(params, x, mask=None):
    # TODO(synk): `mask` is accepted for interface parity but FeatureModule.forward
    # ignores it (calls self.encorders(x) without a mask), so it is not used.
    scale = 1.0 / math.sqrt(HEAD_DIM)   # = 0.5, exact in bf16 -> safe to pre-fold
    bf16 = jnp.bfloat16

    x2d = x.reshape(R, FEATURES).astype(bf16)

    # host-side plumbing: fused + pre-scaled QKV, bf16 MXU weights everywhere
    wqkv = jnp.concatenate([params["wq"] * scale, params["wk"], params["wv"]],
                           axis=-1).astype(bf16)                        # (L,16,48)
    bqkv = jnp.concatenate([params["bq"] * scale, params["bk"], params["bv"]],
                           axis=-1)                                     # (L,1,48) f32
    w_emb = params["w_emb"].astype(bf16)
    wo = params["wo"].astype(bf16)
    wc = params["wc"].astype(bf16)

    # b1 folded into w1 as an extra contraction row; zero-pad K to 2*NODES = 32
    w1_aug = jnp.concatenate(
        [params["w1"], params["b1"],
         jnp.zeros((LAYERS, NODES - 1, FFN), jnp.float32)],
        axis=1).astype(bf16)                                            # (L,32,FFN)
    w2 = params["w2"].astype(bf16)                                      # (L,FFN,16) natural K-by-N

    # constant index / mask matrices for the collapsed attention core + pooling
    rho = jnp.arange(BHS)
    b_of = rho // (NUM_HEADS * S)
    h_of = (rho // S) % NUM_HEADS
    i_of = rho % S
    r_ids = jnp.arange(R)
    c_ids = jnp.arange(NODES)
    ebd = (r_ids[None, :] == (b_of * S + i_of)[:, None]).astype(jnp.float32)     # (BHS,R)
    sel = ebd.T                                                                   # (R,BHS)
    hmask = ((c_ids[None, :] // HEAD_DIM) == h_of[:, None]).astype(jnp.float32)  # (BHS,NODES)
    negm = jnp.where((r_ids[None, :] // S) == b_of[:, None],
                     0.0, -1e9).astype(jnp.float32)                              # (BHS,R)
    pool = ((r_ids[None, :] // S) == jnp.arange(B)[:, None]
            ).astype(jnp.float32) / S                                            # (B,R)
    aug = jnp.zeros((R, NODES), jnp.float32).at[:, 0].set(1.0)                   # (R,NODES)

    args = [
        x2d,
        w_emb, params["b_emb"], params["g_emb"], params["be_emb"],
        wqkv, bqkv,
        wo, params["bo"], params["g1"], params["be1"],
        w1_aug, w2, params["b2"], params["g2"], params["be2"],
        wc, params["bc"],
        ebd, sel, hmask, negm, pool, aug,
    ]
    return pl.pallas_call(
        transformer_kernel,
        out_shape=jax.ShapeDtypeStruct((B, N_CLASSES), jnp.float32),
        in_specs=[pl.BlockSpec(memory_space=pltpu.MemorySpace.VMEM) for _ in args],
        out_specs=pl.BlockSpec(memory_space=pltpu.MemorySpace.VMEM),
        compiler_params=pltpu.CompilerParams(vmem_limit_bytes=16 * 1024 * 1024),
    )(*args)


def init_params(key):
    ks = jax.random.split(key, 16)

    def w(k, shape, fan_in):
        return jax.random.normal(k, shape, jnp.float32) / math.sqrt(fan_in)

    def bias(k, shape):
        return 0.05 * jax.random.normal(k, shape, jnp.float32)

    p = {}
    p["w_emb"] = w(ks[0], (FEATURES, NODES), FEATURES)
    p["b_emb"] = bias(ks[1], (1, NODES))
    p["g_emb"] = jnp.ones((1, NODES), jnp.float32)
    p["be_emb"] = jnp.zeros((1, NODES), jnp.float32)

    p["wq"] = w(ks[2], (LAYERS, NODES, NODES), NODES)
    p["wk"] = w(ks[3], (LAYERS, NODES, NODES), NODES)
    p["wv"] = w(ks[4], (LAYERS, NODES, NODES), NODES)
    p["bq"] = bias(ks[5], (LAYERS, 1, NODES))
    p["bk"] = bias(ks[6], (LAYERS, 1, NODES))
    p["bv"] = bias(ks[7], (LAYERS, 1, NODES))
    p["wo"] = w(ks[8], (LAYERS, NODES, NODES), NODES)
    p["bo"] = bias(ks[9], (LAYERS, 1, NODES))
    p["g1"] = jnp.ones((LAYERS, 1, NODES), jnp.float32)
    p["be1"] = jnp.zeros((LAYERS, 1, NODES), jnp.float32)

    p["w1"] = w(ks[10], (LAYERS, NODES, FFN), NODES)
    p["b1"] = bias(ks[11], (LAYERS, 1, FFN))
    p["w2"] = w(ks[12], (LAYERS, FFN, NODES), FFN)
    p["b2"] = bias(ks[13], (LAYERS, 1, NODES))
    p["g2"] = jnp.ones((LAYERS, 1, NODES), jnp.float32)
    p["be2"] = jnp.zeros((LAYERS, 1, NODES), jnp.float32)

    p["wc"] = w(ks[14], (NODES, N_CLASSES), NODES)
    p["bc"] = bias(ks[15], (1, N_CLASSES))
    return p


def reference_forward(params, x):
    """Pure-JAX reference of the same math (PyTorch post-norm encoder, dropout=0).
    Mirrors the kernel's intentional precision choices: bf16 operands / f32
    accumulation on every weight matmul; f32 attention score/softmax/ctx core."""
    f32 = jnp.float32
    bf16 = jnp.bfloat16

    def ln(t, g, b):
        mu = t.mean(-1, keepdims=True)
        var = ((t - mu) ** 2).mean(-1, keepdims=True)
        return (t - mu) / jnp.sqrt(var + EPS) * g + b

    def bdot(a, w):
        return jnp.dot(a.astype(bf16), w.astype(bf16), preferred_element_type=f32)

    h = bdot(x, params["w_emb"]) + params["b_emb"]
    h = ln(h, params["g_emb"], params["be_emb"])
    for l in range(LAYERS):
        q = bdot(h, params["wq"][l]) + params["bq"][l]
        k = bdot(h, params["wk"][l]) + params["bk"][l]
        v = bdot(h, params["wv"][l]) + params["bv"][l]
        qh = q.reshape(B, S, NUM_HEADS, HEAD_DIM).transpose(0, 2, 1, 3)
        kh = k.reshape(B, S, NUM_HEADS, HEAD_DIM).transpose(0, 2, 1, 3)
        vh = v.reshape(B, S, NUM_HEADS, HEAD_DIM).transpose(0, 2, 1, 3)
        sc = jnp.einsum("bhid,bhjd->bhij", qh, kh,
                        precision=lax.Precision.HIGHEST) / math.sqrt(HEAD_DIM)
        p = jax.nn.softmax(sc, axis=-1)
        ctx = jnp.einsum("bhij,bhjd->bhid", p, vh,
                         precision=lax.Precision.HIGHEST)
        ctx = ctx.transpose(0, 2, 1, 3).reshape(B, S, NODES)
        o = bdot(ctx, params["wo"][l]) + params["bo"][l]
        h = ln(h + o, params["g1"][l], params["be1"][l])
        f = jax.nn.relu(bdot(h, params["w1"][l]) + params["b1"][l])
        f = bdot(f, params["w2"][l]) + params["b2"][l]
        h = ln(h + f, params["g2"][l], params["be2"][l])
    m = h.mean(axis=1)
    return bdot(m, params["wc"]) + params["bc"]


if __name__ == "__main__":
    key = jax.random.PRNGKey(0)
    kx, kp = jax.random.split(key)
    x = jax.random.normal(kx, (B, S, FEATURES), jnp.float32)
    mask = jnp.zeros((B, S), jnp.bool_)   # part of the module's input tuple; unused by forward
    params = init_params(kp)

    out = transformer_forward(params, x, mask)
    out = jax.block_until_ready(out)

    ref = reference_forward(params, x)
    assert out.shape == (B, N_CLASSES)
    # bf16 MXU operands, the folded bf16 b1 row and the approximate softmax
    # reciprocal are intentional precision choices; tolerance reflects that.
    assert jnp.allclose(out, ref, atol=1e-2, rtol=1e-2), (out, ref)
    print("KERNEL_OK")
</pallas_src>

<mosaic_0001>
module attributes {stable_mosaic.version = 11 : i64} {
  func.func @transformer_kernel(%arg0: memref<16x9xbf16, #tpu.memory_space<vmem>>, %arg1: memref<9x16xbf16, #tpu.memory_space<vmem>>, %arg2: memref<1x16xf32, #tpu.memory_space<vmem>>, %arg3: memref<1x16xf32, #tpu.memory_space<vmem>>, %arg4: memref<1x16xf32, #tpu.memory_space<vmem>>, %arg5: memref<2x16x48xbf16, #tpu.memory_space<vmem>>, %arg6: memref<2x1x48xf32, #tpu.memory_space<vmem>>, %arg7: memref<2x16x16xbf16, #tpu.memory_space<vmem>>, %arg8: memref<2x1x16xf32, #tpu.memory_space<vmem>>, %arg9: memref<2x1x16xf32, #tpu.memory_space<vmem>>, %arg10: memref<2x1x16xf32, #tpu.memory_space<vmem>>, %arg11: memref<2x32x2048xbf16, #tpu.memory_space<vmem>>, %arg12: memref<2x2048x16xbf16, #tpu.memory_space<vmem>>, %arg13: memref<2x1x16xf32, #tpu.memory_space<vmem>>, %arg14: memref<2x1x16xf32, #tpu.memory_space<vmem>>, %arg15: memref<2x1x16xf32, #tpu.memory_space<vmem>>, %arg16: memref<16x2xbf16, #tpu.memory_space<vmem>>, %arg17: memref<1x2xf32, #tpu.memory_space<vmem>>, %arg18: memref<64x16xf32, #tpu.memory_space<vmem>>, %arg19: memref<16x64xf32, #tpu.memory_space<vmem>>, %arg20: memref<64x16xf32, #tpu.memory_space<vmem>>, %arg21: memref<64x16xf32, #tpu.memory_space<vmem>>, %arg22: memref<2x16xf32, #tpu.memory_space<vmem>>, %arg23: memref<16x16xf32, #tpu.memory_space<vmem>>, %arg24: memref<2x2xf32, #tpu.memory_space<vmem>>) attributes {dimension_semantics = [], scalar_prefetch = 0 : i64, scratch_operands = 0 : i64, tpu.core_type = #tpu.core_type<tc>} {
    %c0 = arith.constant 0 : index
    %c0_0 = arith.constant 0 : index
    %0 = vector.load %arg0[%c0, %c0_0] : memref<16x9xbf16, #tpu.memory_space<vmem>>, vector<16x9xbf16>
    %c0_1 = arith.constant 0 : index
    %c0_2 = arith.constant 0 : index
    %1 = vector.load %arg1[%c0_1, %c0_2] : memref<9x16xbf16, #tpu.memory_space<vmem>>, vector<9x16xbf16>
    %cst = arith.constant dense<0.000000e+00> : vector<16x16xf32>
    %2 = tpu.matmul %0, %1, %cst {dimension_numbers = #tpu.dot_dimension_numbers<[1], [0], [0], [1], [0, 0, 1, 1], [], []>} : vector<16x9xbf16>, vector<9x16xbf16>, vector<16x16xf32> -> vector<16x16xf32>
    %c0_3 = arith.constant 0 : index
    %c0_4 = arith.constant 0 : index
    %3 = vector.load %arg2[%c0_3, %c0_4] : memref<1x16xf32, #tpu.memory_space<vmem>>, vector<1x16xf32>
    %4 = vector.broadcast %3 : vector<1x16xf32> to vector<16x16xf32>
    %5 = arith.addf %2, %4 : vector<16x16xf32>
    %c0_5 = arith.constant 0 : index
    %c0_6 = arith.constant 0 : index
    %6 = vector.load %arg3[%c0_5, %c0_6] : memref<1x16xf32, #tpu.memory_space<vmem>>, vector<1x16xf32>
    %c0_7 = arith.constant 0 : index
    %c0_8 = arith.constant 0 : index
    %7 = vector.load %arg4[%c0_7, %c0_8] : memref<1x16xf32, #tpu.memory_space<vmem>>, vector<1x16xf32>
    %cst_9 = arith.constant dense<0.000000e+00> : vector<16xf32>
    %8 = vector.multi_reduction <add>, %5, %cst_9 [1] : vector<16x16xf32> to vector<16xf32>
    %9 = vector.shape_cast %8 : vector<16xf32> to vector<16x1xf32>
    %cst_10 = arith.constant 1.600000e+01 : f32
    %10 = vector.broadcast %cst_10 : f32 to vector<16x1xf32>
    %11 = arith.divf %9, %10 : vector<16x1xf32>
    %12 = vector.broadcast %11 : vector<16x1xf32> to vector<16x16xf32>
    %13 = arith.subf %5, %12 : vector<16x16xf32>
    %14 = arith.mulf %13, %13 : vector<16x16xf32>
    %cst_11 = arith.constant dense<0.000000e+00> : vector<16xf32>
    %15 = vector.multi_reduction <add>, %14, %cst_11 [1] : vector<16x16xf32> to vector<16xf32>
    %16 = vector.shape_cast %15 : vector<16xf32> to vector<16x1xf32>
    %cst_12 = arith.constant 1.600000e+01 : f32
    %17 = vector.broadcast %cst_12 : f32 to vector<16x1xf32>
    %18 = arith.divf %16, %17 : vector<16x1xf32>
    %19 = vector.broadcast %11 : vector<16x1xf32> to vector<16x16xf32>
    %20 = arith.subf %5, %19 : vector<16x16xf32>
    %cst_13 = arith.constant 9.99999974E-6 : f32
    %21 = vector.broadcast %cst_13 : f32 to vector<16x1xf32>
    %22 = arith.addf %18, %21 : vector<16x1xf32>
    %23 = math.rsqrt %22 : vector<16x1xf32>
    %24 = vector.broadcast %23 : vector<16x1xf32> to vector<16x16xf32>
    %25 = arith.mulf %20, %24 : vector<16x16xf32>
    %26 = vector.broadcast %6 : vector<1x16xf32> to vector<16x16xf32>
    %27 = arith.mulf %25, %26 : vector<16x16xf32>
    %28 = vector.broadcast %7 : vector<1x16xf32> to vector<16x16xf32>
    %29 = arith.addf %27, %28 : vector<16x16xf32>
    %c0_14 = arith.constant 0 : index
    %c0_15 = arith.constant 0 : index
    %30 = vector.load %arg18[%c0_14, %c0_15] : memref<64x16xf32, #tpu.memory_space<vmem>>, vector<64x16xf32>
    %c0_16 = arith.constant 0 : index
    %c0_17 = arith.constant 0 : index
    %31 = vector.load %arg19[%c0_16, %c0_17] : memref<16x64xf32, #tpu.memory_space<vmem>>, vector<16x64xf32>
    %c0_18 = arith.constant 0 : index
    %c0_19 = arith.constant 0 : index
    %32 = vector.load %arg20[%c0_18, %c0_19] : memref<64x16xf32, #tpu.memory_space<vmem>>, vector<64x16xf32>
    %c0_20 = arith.constant 0 : index
    %c0_21 = arith.constant 0 : index
    %33 = vector.load %arg21[%c0_20, %c0_21] : memref<64x16xf32, #tpu.memory_space<vmem>>, vector<64x16xf32>
    %c0_22 = arith.constant 0 : index
    %c0_23 = arith.constant 0 : index
    %34 = vector.load %arg23[%c0_22, %c0_23] : memref<16x16xf32, #tpu.memory_space<vmem>>, vector<16x16xf32>
    %35 = arith.truncf %29 : vector<16x16xf32> to vector<16x16xbf16>
    %c0_24 = arith.constant 0 : index
    %c0_25 = arith.constant 0 : index
    %c0_26 = arith.constant 0 : index
    %36 = vector.load %arg5[%c0_24, %c0_25, %c0_26] : memref<2x16x48xbf16, #tpu.memory_space<vmem>>, vector<1x16x48xbf16>
    %37 = vector.shape_cast %36 : vector<1x16x48xbf16> to vector<16x48xbf16>
    %cst_27 = arith.constant dense<0.000000e+00> : vector<16x48xf32>
    %38 = tpu.matmul %35, %37, %cst_27 {dimension_numbers = #tpu.dot_dimension_numbers<[1], [0], [0], [1], [0, 0, 1, 1], [], []>} : vector<16x16xbf16>, vector<16x48xbf16>, vector<16x48xf32> -> vector<16x48xf32>
    %c0_28 = arith.constant 0 : index
    %c0_29 = arith.constant 0 : index
    %c0_30 = arith.constant 0 : index
    %39 = vector.load %arg6[%c0_28, %c0_29, %c0_30] : memref<2x1x48xf32, #tpu.memory_space<vmem>>, vector<1x1x48xf32>
    %40 = vector.shape_cast %39 : vector<1x1x48xf32> to vector<1x48xf32>
    %41 = vector.broadcast %40 : vector<1x48xf32> to vector<16x48xf32>
    %42 = arith.addf %38, %41 : vector<16x48xf32>
    %43 = vector.extract_strided_slice %42 {offsets = [0, 0], sizes = [16, 16], strides = [1, 1]} : vector<16x48xf32> to vector<16x16xf32>
    %44 = vector.extract_strided_slice %42 {offsets = [0, 16], sizes = [16, 16], strides = [1, 1]} : vector<16x48xf32> to vector<16x16xf32>
    %45 = vector.extract_strided_slice %42 {offsets = [0, 32], sizes = [16, 16], strides = [1, 1]} : vector<16x48xf32> to vector<16x16xf32>
    %cst_31 = arith.constant dense<0.000000e+00> : vector<64x16xf32>
    %46 = tpu.matmul %30, %43, %cst_31 {dimension_numbers = #tpu.dot_dimension_numbers<[1], [0], [0], [1], [0, 0, 1, 1], [], []>} : vector<64x16xf32>, vector<16x16xf32>, vector<64x16xf32> -> vector<64x16xf32>
    %47 = arith.mulf %46, %32 : vector<64x16xf32>
    %cst_32 = arith.constant dense<0.000000e+00> : vector<64x16xf32>
    %48 = tpu.matmul %47, %44, %cst_32 {dimension_numbers = #tpu.dot_dimension_numbers<[1], [1], [0], [0], [0, 0, 1, 0], [], []>} : vector<64x16xf32>, vector<16x16xf32>, vector<64x16xf32> -> vector<64x16xf32>
    %49 = arith.addf %48, %33 : vector<64x16xf32>
    %cst_33 = arith.constant dense<0xFF800000> : vector<64xf32>
    %50 = vector.multi_reduction <maximumf>, %49, %cst_33 [1] : vector<64x16xf32> to vector<64xf32>
    %51 = vector.shape_cast %50 : vector<64xf32> to vector<64x1xf32>
    %52 = vector.broadcast %51 : vector<64x1xf32> to vector<64x16xf32>
    %53 = arith.subf %49, %52 : vector<64x16xf32>
    %54 = math.exp %53 : vector<64x16xf32>
    %cst_34 = arith.constant dense<0.000000e+00> : vector<64xf32>
    %55 = vector.multi_reduction <add>, %54, %cst_34 [1] : vector<64x16xf32> to vector<64xf32>
    %56 = vector.shape_cast %55 : vector<64xf32> to vector<64x1xf32>
    %57 = tpu.reciprocal %56 {approx = true} : vector<64x1xf32> -> vector<64x1xf32>
    %58 = vector.broadcast %57 : vector<64x1xf32> to vector<64x16xf32>
    %59 = arith.mulf %54, %58 : vector<64x16xf32>
    %cst_35 = arith.constant dense<0.000000e+00> : vector<64x16xf32>
    %60 = tpu.matmul %59, %45, %cst_35 {dimension_numbers = #tpu.dot_dimension_numbers<[1], [0], [0], [1], [0, 0, 1, 1], [], []>} : vector<64x16xf32>, vector<16x16xf32>, vector<64x16xf32> -> vector<64x16xf32>
    %61 = arith.mulf %60, %32 : vector<64x16xf32>
    %cst_36 = arith.constant dense<0.000000e+00> : vector<16x16xf32>
    %62 = tpu.matmul %31, %61, %cst_36 {dimension_numbers = #tpu.dot_dimension_numbers<[1], [0], [0], [1], [0, 0, 1, 1], [], []>} : vector<16x64xf32>, vector<64x16xf32>, vector<16x16xf32> -> vector<16x16xf32>
    %63 = arith.truncf %62 : vector<16x16xf32> to vector<16x16xbf16>
    %c0_37 = arith.constant 0 : index
    %c0_38 = arith.constant 0 : index
    %c0_39 = arith.constant 0 : index
    %64 = vector.load %arg7[%c0_37, %c0_38, %c0_39] : memref<2x16x16xbf16, #tpu.memory_space<vmem>>, vector<1x16x16xbf16>
    %65 = vector.shape_cast %64 : vector<1x16x16xbf16> to vector<16x16xbf16>
    %cst_40 = arith.constant dense<0.000000e+00> : vector<16x16xf32>
    %66 = tpu.matmul %63, %65, %cst_40 {dimension_numbers = #tpu.dot_dimension_numbers<[1], [0], [0], [1], [0, 0, 1, 1], [], []>} : vector<16x16xbf16>, vector<16x16xbf16>, vector<16x16xf32> -> vector<16x16xf32>
    %c0_41 = arith.constant 0 : index
    %c0_42 = arith.constant 0 : index
    %c0_43 = arith.constant 0 : index
    %67 = vector.load %arg8[%c0_41, %c0_42, %c0_43] : memref<2x1x16xf32, #tpu.memory_space<vmem>>, vector<1x1x16xf32>
    %68 = vector.shape_cast %67 : vector<1x1x16xf32> to vector<1x16xf32>
    %69 = vector.broadcast %68 : vector<1x16xf32> to vector<16x16xf32>
    %70 = arith.addf %66, %69 : vector<16x16xf32>
    %71 = arith.addf %29, %70 : vector<16x16xf32>
    %c0_44 = arith.constant 0 : index
    %c0_45 = arith.constant 0 : index
    %c0_46 = arith.constant 0 : index
    %72 = vector.load %arg9[%c0_44, %c0_45, %c0_46] : memref<2x1x16xf32, #tpu.memory_space<vmem>>, vector<1x1x16xf32>
    %73 = vector.shape_cast %72 : vector<1x1x16xf32> to vector<1x16xf32>
    %c0_47 = arith.constant 0 : index
    %c0_48 = arith.constant 0 : index
    %c0_49 = arith.constant 0 : index
    %74 = vector.load %arg10[%c0_47, %c0_48, %c0_49] : memref<2x1x16xf32, #tpu.memory_space<vmem>>, vector<1x1x16xf32>
    %75 = vector.shape_cast %74 : vector<1x1x16xf32> to vector<1x16xf32>
    %cst_50 = arith.constant dense<0.000000e+00> : vector<16xf32>
    %76 = vector.multi_reduction <add>, %71, %cst_50 [1] : vector<16x16xf32> to vector<16xf32>
    %77 = vector.shape_cast %76 : vector<16xf32> to vector<16x1xf32>
    %cst_51 = arith.constant 1.600000e+01 : f32
    %78 = vector.broadcast %cst_51 : f32 to vector<16x1xf32>
    %79 = arith.divf %77, %78 : vector<16x1xf32>
    %80 = vector.broadcast %79 : vector<16x1xf32> to vector<16x16xf32>
    %81 = arith.subf %71, %80 : vector<16x16xf32>
    %82 = arith.mulf %81, %81 : vector<16x16xf32>
    %cst_52 = arith.constant dense<0.000000e+00> : vector<16xf32>
    %83 = vector.multi_reduction <add>, %82, %cst_52 [1] : vector<16x16xf32> to vector<16xf32>
    %84 = vector.shape_cast %83 : vector<16xf32> to vector<16x1xf32>
    %cst_53 = arith.constant 1.600000e+01 : f32
    %85 = vector.broadcast %cst_53 : f32 to vector<16x1xf32>
    %86 = arith.divf %84, %85 : vector<16x1xf32>
    %87 = vector.broadcast %79 : vector<16x1xf32> to vector<16x16xf32>
    %88 = arith.subf %71, %87 : vector<16x16xf32>
    %cst_54 = arith.constant 9.99999974E-6 : f32
    %89 = vector.broadcast %cst_54 : f32 to vector<16x1xf32>
    %90 = arith.addf %86, %89 : vector<16x1xf32>
    %91 = math.rsqrt %90 : vector<16x1xf32>
    %92 = vector.broadcast %91 : vector<16x1xf32> to vector<16x16xf32>
    %93 = arith.mulf %88, %92 : vector<16x16xf32>
    %94 = vector.broadcast %73 : vector<1x16xf32> to vector<16x16xf32>
    %95 = arith.mulf %93, %94 : vector<16x16xf32>
    %96 = vector.broadcast %75 : vector<1x16xf32> to vector<16x16xf32>
    %97 = arith.addf %95, %96 : vector<16x16xf32>
    %98 = tpu.concatenate %97, %34 in 1 : vector<16x16xf32>, vector<16x16xf32> -> vector<16x32xf32>
    %99 = arith.truncf %98 : vector<16x32xf32> to vector<16x32xbf16>
    %c0_55 = arith.constant 0 : index
    %c0_56 = arith.constant 0 : index
    %c0_57 = arith.constant 0 : index
    %100 = vector.load %arg11[%c0_55, %c0_56, %c0_57] : memref<2x32x2048xbf16, #tpu.memory_space<vmem>>, vector<1x32x2048xbf16>
    %101 = vector.shape_cast %100 : vector<1x32x2048xbf16> to vector<32x2048xbf16>
    %cst_58 = arith.constant dense<0.000000e+00> : vector<16x2048xf32>
    %102 = tpu.matmul %99, %101, %cst_58 {dimension_numbers = #tpu.dot_dimension_numbers<[1], [0], [0], [1], [0, 0, 1, 1], [], []>} : vector<16x32xbf16>, vector<32x2048xbf16>, vector<16x2048xf32> -> vector<16x2048xf32>
    %103 = arith.truncf %102 : vector<16x2048xf32> to vector<16x2048xbf16>
    %cst_59 = arith.constant 0.000000e+00 : bf16
    %104 = vector.broadcast %cst_59 : bf16 to vector<16x2048xbf16>
    %105 = arith.maximumf %103, %104 : vector<16x2048xbf16>
    %c0_60 = arith.constant 0 : index
    %c0_61 = arith.constant 0 : index
    %c0_62 = arith.constant 0 : index
    %106 = vector.load %arg12[%c0_60, %c0_61, %c0_62] : memref<2x2048x16xbf16, #tpu.memory_space<vmem>>, vector<1x2048x16xbf16>
    %107 = vector.shape_cast %106 : vector<1x2048x16xbf16> to vector<2048x16xbf16>
    %cst_63 = arith.constant dense<0.000000e+00> : vector<16x16xf32>
    %108 = tpu.matmul %105, %107, %cst_63 {dimension_numbers = #tpu.dot_dimension_numbers<[1], [0], [0], [1], [0, 0, 1, 1], [], []>} : vector<16x2048xbf16>, vector<2048x16xbf16>, vector<16x16xf32> -> vector<16x16xf32>
    %c0_64 = arith.constant 0 : index
    %c0_65 = arith.constant 0 : index
    %c0_66 = arith.constant 0 : index
    %109 = vector.load %arg13[%c0_64, %c0_65, %c0_66] : memref<2x1x16xf32, #tpu.memory_space<vmem>>, vector<1x1x16xf32>
    %110 = vector.shape_cast %109 : vector<1x1x16xf32> to vector<1x16xf32>
    %111 = vector.broadcast %110 : vector<1x16xf32> to vector<16x16xf32>
    %112 = arith.addf %108, %111 : vector<16x16xf32>
    %113 = arith.addf %97, %112 : vector<16x16xf32>
    %c0_67 = arith.constant 0 : index
    %c0_68 = arith.constant 0 : index
    %c0_69 = arith.constant 0 : index
    %114 = vector.load %arg14[%c0_67, %c0_68, %c0_69] : memref<2x1x16xf32, #tpu.memory_space<vmem>>, vector<1x1x16xf32>
    %115 = vector.shape_cast %114 : vector<1x1x16xf32> to vector<1x16xf32>
    %c0_70 = arith.constant 0 : index
    %c0_71 = arith.constant 0 : index
    %c0_72 = arith.constant 0 : index
    %116 = vector.load %arg15[%c0_70, %c0_71, %c0_72] : memref<2x1x16xf32, #tpu.memory_space<vmem>>, vector<1x1x16xf32>
    %117 = vector.shape_cast %116 : vector<1x1x16xf32> to vector<1x16xf32>
    %cst_73 = arith.constant dense<0.000000e+00> : vector<16xf32>
    %118 = vector.multi_reduction <add>, %113, %cst_73 [1] : vector<16x16xf32> to vector<16xf32>
    %119 = vector.shape_cast %118 : vector<16xf32> to vector<16x1xf32>
    %cst_74 = arith.constant 1.600000e+01 : f32
    %120 = vector.broadcast %cst_74 : f32 to vector<16x1xf32>
    %121 = arith.divf %119, %120 : vector<16x1xf32>
    %122 = vector.broadcast %121 : vector<16x1xf32> to vector<16x16xf32>
    %123 = arith.subf %113, %122 : vector<16x16xf32>
    %124 = arith.mulf %123, %123 : vector<16x16xf32>
    %cst_75 = arith.constant dense<0.000000e+00> : vector<16xf32>
    %125 = vector.multi_reduction <add>, %124, %cst_75 [1] : vector<16x16xf32> to vector<16xf32>
    %126 = vector.shape_cast %125 : vector<16xf32> to vector<16x1xf32>
    %cst_76 = arith.constant 1.600000e+01 : f32
    %127 = vector.broadcast %cst_76 : f32 to vector<16x1xf32>
    %128 = arith.divf %126, %127 : vector<16x1xf32>
    %129 = vector.broadcast %121 : vector<16x1xf32> to vector<16x16xf32>
    %130 = arith.subf %113, %129 : vector<16x16xf32>
    %cst_77 = arith.constant 9.99999974E-6 : f32
    %131 = vector.broadcast %cst_77 : f32 to vector<16x1xf32>
    %132 = arith.addf %128, %131 : vector<16x1xf32>
    %133 = math.rsqrt %132 : vector<16x1xf32>
    %134 = vector.broadcast %133 : vector<16x1xf32> to vector<16x16xf32>
    %135 = arith.mulf %130, %134 : vector<16x16xf32>
    %136 = vector.broadcast %115 : vector<1x16xf32> to vector<16x16xf32>
    %137 = arith.mulf %135, %136 : vector<16x16xf32>
    %138 = vector.broadcast %117 : vector<1x16xf32> to vector<16x16xf32>
    %139 = arith.addf %137, %138 : vector<16x16xf32>
    %140 = arith.truncf %139 : vector<16x16xf32> to vector<16x16xbf16>
    %c1 = arith.constant 1 : index
    %c0_78 = arith.constant 0 : index
    %c0_79 = arith.constant 0 : index
    %141 = vector.load %arg5[%c1, %c0_78, %c0_79] : memref<2x16x48xbf16, #tpu.memory_space<vmem>>, vector<1x16x48xbf16>
    %142 = vector.shape_cast %141 : vector<1x16x48xbf16> to vector<16x48xbf16>
    %cst_80 = arith.constant dense<0.000000e+00> : vector<16x48xf32>
    %143 = tpu.matmul %140, %142, %cst_80 {dimension_numbers = #tpu.dot_dimension_numbers<[1], [0], [0], [1], [0, 0, 1, 1], [], []>} : vector<16x16xbf16>, vector<16x48xbf16>, vector<16x48xf32> -> vector<16x48xf32>
    %c1_81 = arith.constant 1 : index
    %c0_82 = arith.constant 0 : index
    %c0_83 = arith.constant 0 : index
    %144 = vector.load %arg6[%c1_81, %c0_82, %c0_83] : memref<2x1x48xf32, #tpu.memory_space<vmem>>, vector<1x1x48xf32>
    %145 = vector.shape_cast %144 : vector<1x1x48xf32> to vector<1x48xf32>
    %146 = vector.broadcast %145 : vector<1x48xf32> to vector<16x48xf32>
    %147 = arith.addf %143, %146 : vector<16x48xf32>
    %148 = vector.extract_strided_slice %147 {offsets = [0, 0], sizes = [16, 16], strides = [1, 1]} : vector<16x48xf32> to vector<16x16xf32>
    %149 = vector.extract_strided_slice %147 {offsets = [0, 16], sizes = [16, 16], strides = [1, 1]} : vector<16x48xf32> to vector<16x16xf32>
    %150 = vector.extract_strided_slice %147 {offsets = [0, 32], sizes = [16, 16], strides = [1, 1]} : vector<16x48xf32> to vector<16x16xf32>
    %cst_84 = arith.constant dense<0.000000e+00> : vector<64x16xf32>
    %151 = tpu.matmul %30, %148, %cst_84 {dimension_numbers = #tpu.dot_dimension_numbers<[1], [0], [0], [1], [0, 0, 1, 1], [], []>} : vector<64x16xf32>, vector<16x16xf32>, vector<64x16xf32> -> vector<64x16xf32>
    %152 = arith.mulf %151, %32 : vector<64x16xf32>
    %cst_85 = arith.constant dense<0.000000e+00> : vector<64x16xf32>
    %153 = tpu.matmul %152, %149, %cst_85 {dimension_numbers = #tpu.dot_dimension_numbers<[1], [1], [0], [0], [0, 0, 1, 0], [], []>} : vector<64x16xf32>, vector<16x16xf32>, vector<64x16xf32> -> vector<64x16xf32>
    %154 = arith.addf %153, %33 : vector<64x16xf32>
    %cst_86 = arith.constant dense<0xFF800000> : vector<64xf32>
    %155 = vector.multi_reduction <maximumf>, %154, %cst_86 [1] : vector<64x16xf32> to vector<64xf32>
    %156 = vector.shape_cast %155 : vector<64xf32> to vector<64x1xf32>
    %157 = vector.broadcast %156 : vector<64x1xf32> to vector<64x16xf32>
    %158 = arith.subf %154, %157 : vector<64x16xf32>
    %159 = math.exp %158 : vector<64x16xf32>
    %cst_87 = arith.constant dense<0.000000e+00> : vector<64xf32>
    %160 = vector.multi_reduction <add>, %159, %cst_87 [1] : vector<64x16xf32> to vector<64xf32>
    %161 = vector.shape_cast %160 : vector<64xf32> to vector<64x1xf32>
    %162 = tpu.reciprocal %161 {approx = true} : vector<64x1xf32> -> vector<64x1xf32>
    %163 = vector.broadcast %162 : vector<64x1xf32> to vector<64x16xf32>
    %164 = arith.mulf %159, %163 : vector<64x16xf32>
    %cst_88 = arith.constant dense<0.000000e+00> : vector<64x16xf32>
    %165 = tpu.matmul %164, %150, %cst_88 {dimension_numbers = #tpu.dot_dimension_numbers<[1], [0], [0], [1], [0, 0, 1, 1], [], []>} : vector<64x16xf32>, vector<16x16xf32>, vector<64x16xf32> -> vector<64x16xf32>
    %166 = arith.mulf %165, %32 : vector<64x16xf32>
    %cst_89 = arith.constant dense<0.000000e+00> : vector<16x16xf32>
    %167 = tpu.matmul %31, %166, %cst_89 {dimension_numbers = #tpu.dot_dimension_numbers<[1], [0], [0], [1], [0, 0, 1, 1], [], []>} : vector<16x64xf32>, vector<64x16xf32>, vector<16x16xf32> -> vector<16x16xf32>
    %168 = arith.truncf %167 : vector<16x16xf32> to vector<16x16xbf16>
    %c1_90 = arith.constant 1 : index
    %c0_91 = arith.constant 0 : index
    %c0_92 = arith.constant 0 : index
    %169 = vector.load %arg7[%c1_90, %c0_91, %c0_92] : memref<2x16x16xbf16, #tpu.memory_space<vmem>>, vector<1x16x16xbf16>
    %170 = vector.shape_cast %169 : vector<1x16x16xbf16> to vector<16x16xbf16>
    %cst_93 = arith.constant dense<0.000000e+00> : vector<16x16xf32>
    %171 = tpu.matmul %168, %170, %cst_93 {dimension_numbers = #tpu.dot_dimension_numbers<[1], [0], [0], [1], [0, 0, 1, 1], [], []>} : vector<16x16xbf16>, vector<16x16xbf16>, vector<16x16xf32> -> vector<16x16xf32>
    %c1_94 = arith.constant 1 : index
    %c0_95 = arith.constant 0 : index
    %c0_96 = arith.constant 0 : index
    %172 = vector.load %arg8[%c1_94, %c0_95, %c0_96] : memref<2x1x16xf32, #tpu.memory_space<vmem>>, vector<1x1x16xf32>
    %173 = vector.shape_cast %172 : vector<1x1x16xf32> to vector<1x16xf32>
    %174 = vector.broadcast %173 : vector<1x16xf32> to vector<16x16xf32>
    %175 = arith.addf %171, %174 : vector<16x16xf32>
    %176 = arith.addf %139, %175 : vector<16x16xf32>
    %c1_97 = arith.constant 1 : index
    %c0_98 = arith.constant 0 : index
    %c0_99 = arith.constant 0 : index
    %177 = vector.load %arg9[%c1_97, %c0_98, %c0_99] : memref<2x1x16xf32, #tpu.memory_space<vmem>>, vector<1x1x16xf32>
    %178 = vector.shape_cast %177 : vector<1x1x16xf32> to vector<1x16xf32>
    %c1_100 = arith.constant 1 : index
    %c0_101 = arith.constant 0 : index
    %c0_102 = arith.constant 0 : index
    %179 = vector.load %arg10[%c1_100, %c0_101, %c0_102] : memref<2x1x16xf32, #tpu.memory_space<vmem>>, vector<1x1x16xf32>
    %180 = vector.shape_cast %179 : vector<1x1x16xf32> to vector<1x16xf32>
    %cst_103 = arith.constant dense<0.000000e+00> : vector<16xf32>
    %181 = vector.multi_reduction <add>, %176, %cst_103 [1] : vector<16x16xf32> to vector<16xf32>
    %182 = vector.shape_cast %181 : vector<16xf32> to vector<16x1xf32>
    %cst_104 = arith.constant 1.600000e+01 : f32
    %183 = vector.broadcast %cst_104 : f32 to vector<16x1xf32>
    %184 = arith.divf %182, %183 : vector<16x1xf32>
    %185 = vector.broadcast %184 : vector<16x1xf32> to vector<16x16xf32>
    %186 = arith.subf %176, %185 : vector<16x16xf32>
    %187 = arith.mulf %186, %186 : vector<16x16xf32>
    %cst_105 = arith.constant dense<0.000000e+00> : vector<16xf32>
    %188 = vector.multi_reduction <add>, %187, %cst_105 [1] : vector<16x16xf32> to vector<16xf32>
    %189 = vector.shape_cast %188 : vector<16xf32> to vector<16x1xf32>
    %cst_106 = arith.constant 1.600000e+01 : f32
    %190 = vector.broadcast %cst_106 : f32 to vector<16x1xf32>
    %191 = arith.divf %189, %190 : vector<16x1xf32>
    %192 = vector.broadcast %184 : vector<16x1xf32> to vector<16x16xf32>
    %193 = arith.subf %176, %192 : vector<16x16xf32>
    %cst_107 = arith.constant 9.99999974E-6 : f32
    %194 = vector.broadcast %cst_107 : f32 to vector<16x1xf32>
    %195 = arith.addf %191, %194 : vector<16x1xf32>
    %196 = math.rsqrt %195 : vector<16x1xf32>
    %197 = vector.broadcast %196 : vector<16x1xf32> to vector<16x16xf32>
    %198 = arith.mulf %193, %197 : vector<16x16xf32>
    %199 = vector.broadcast %178 : vector<1x16xf32> to vector<16x16xf32>
    %200 = arith.mulf %198, %199 : vector<16x16xf32>
    %201 = vector.broadcast %180 : vector<1x16xf32> to vector<16x16xf32>
    %202 = arith.addf %200, %201 : vector<16x16xf32>
    %203 = tpu.concatenate %202, %34 in 1 : vector<16x16xf32>, vector<16x16xf32> -> vector<16x32xf32>
    %204 = arith.truncf %203 : vector<16x32xf32> to vector<16x32xbf16>
    %c1_108 = arith.constant 1 : index
    %c0_109 = arith.constant 0 : index
    %c0_110 = arith.constant 0 : index
    %205 = vector.load %arg11[%c1_108, %c0_109, %c0_110] : memref<2x32x2048xbf16, #tpu.memory_space<vmem>>, vector<1x32x2048xbf16>
    %206 = vector.shape_cast %205 : vector<1x32x2048xbf16> to vector<32x2048xbf16>
    %cst_111 = arith.constant dense<0.000000e+00> : vector<16x2048xf32>
    %207 = tpu.matmul %204, %206, %cst_111 {dimension_numbers = #tpu.dot_dimension_numbers<[1], [0], [0], [1], [0, 0, 1, 1], [], []>} : vector<16x32xbf16>, vector<32x2048xbf16>, vector<16x2048xf32> -> vector<16x2048xf32>
    %208 = arith.truncf %207 : vector<16x2048xf32> to vector<16x2048xbf16>
    %cst_112 = arith.constant 0.000000e+00 : bf16
    %209 = vector.broadcast %cst_112 : bf16 to vector<16x2048xbf16>
    %210 = arith.maximumf %208, %209 : vector<16x2048xbf16>
    %c1_113 = arith.constant 1 : index
    %c0_114 = arith.constant 0 : index
    %c0_115 = arith.constant 0 : index
    %211 = vector.load %arg12[%c1_113, %c0_114, %c0_115] : memref<2x2048x16xbf16, #tpu.memory_space<vmem>>, vector<1x2048x16xbf16>
    %212 = vector.shape_cast %211 : vector<1x2048x16xbf16> to vector<2048x16xbf16>
    %cst_116 = arith.constant dense<0.000000e+00> : vector<16x16xf32>
    %213 = tpu.matmul %210, %212, %cst_116 {dimension_numbers = #tpu.dot_dimension_numbers<[1], [0], [0], [1], [0, 0, 1, 1], [], []>} : vector<16x2048xbf16>, vector<2048x16xbf16>, vector<16x16xf32> -> vector<16x16xf32>
    %c1_117 = arith.constant 1 : index
    %c0_118 = arith.constant 0 : index
    %c0_119 = arith.constant 0 : index
    %214 = vector.load %arg13[%c1_117, %c0_118, %c0_119] : memref<2x1x16xf32, #tpu.memory_space<vmem>>, vector<1x1x16xf32>
    %215 = vector.shape_cast %214 : vector<1x1x16xf32> to vector<1x16xf32>
    %216 = vector.broadcast %215 : vector<1x16xf32> to vector<16x16xf32>
    %217 = arith.addf %213, %216 : vector<16x16xf32>
    %218 = arith.addf %202, %217 : vector<16x16xf32>
    %c1_120 = arith.constant 1 : index
    %c0_121 = arith.constant 0 : index
    %c0_122 = arith.constant 0 : index
    %219 = vector.load %arg14[%c1_120, %c0_121, %c0_122] : memref<2x1x16xf32, #tpu.memory_space<vmem>>, vector<1x1x16xf32>
    %220 = vector.shape_cast %219 : vector<1x1x16xf32> to vector<1x16xf32>
    %c1_123 = arith.constant 1 : index
    %c0_124 = arith.constant 0 : index
    %c0_125 = arith.constant 0 : index
    %221 = vector.load %arg15[%c1_123, %c0_124, %c0_125] : memref<2x1x16xf32, #tpu.memory_space<vmem>>, vector<1x1x16xf32>
    %222 = vector.shape_cast %221 : vector<1x1x16xf32> to vector<1x16xf32>
    %cst_126 = arith.constant dense<0.000000e+00> : vector<16xf32>
    %223 = vector.multi_reduction <add>, %218, %cst_126 [1] : vector<16x16xf32> to vector<16xf32>
    %224 = vector.shape_cast %223 : vector<16xf32> to vector<16x1xf32>
    %cst_127 = arith.constant 1.600000e+01 : f32
    %225 = vector.broadcast %cst_127 : f32 to vector<16x1xf32>
    %226 = arith.divf %224, %225 : vector<16x1xf32>
    %227 = vector.broadcast %226 : vector<16x1xf32> to vector<16x16xf32>
    %228 = arith.subf %218, %227 : vector<16x16xf32>
    %229 = arith.mulf %228, %228 : vector<16x16xf32>
    %cst_128 = arith.constant dense<0.000000e+00> : vector<16xf32>
    %230 = vector.multi_reduction <add>, %229, %cst_128 [1] : vector<16x16xf32> to vector<16xf32>
    %231 = vector.shape_cast %230 : vector<16xf32> to vector<16x1xf32>
    %cst_129 = arith.constant 1.600000e+01 : f32
    %232 = vector.broadcast %cst_129 : f32 to vector<16x1xf32>
    %233 = arith.divf %231, %232 : vector<16x1xf32>
    %234 = vector.broadcast %226 : vector<16x1xf32> to vector<16x16xf32>
    %235 = arith.subf %218, %234 : vector<16x16xf32>
    %cst_130 = arith.constant 9.99999974E-6 : f32
    %236 = vector.broadcast %cst_130 : f32 to vector<16x1xf32>
    %237 = arith.addf %233, %236 : vector<16x1xf32>
    %238 = math.rsqrt %237 : vector<16x1xf32>
    %239 = vector.broadcast %238 : vector<16x1xf32> to vector<16x16xf32>
    %240 = arith.mulf %235, %239 : vector<16x16xf32>
    %241 = vector.broadcast %220 : vector<1x16xf32> to vector<16x16xf32>
    %242 = arith.mulf %240, %241 : vector<16x16xf32>
    %243 = vector.broadcast %222 : vector<1x16xf32> to vector<16x16xf32>
    %244 = arith.addf %242, %243 : vector<16x16xf32>
    %c0_131 = arith.constant 0 : index
    %c0_132 = arith.constant 0 : index
    %245 = vector.load %arg22[%c0_131, %c0_132] : memref<2x16xf32, #tpu.memory_space<vmem>>, vector<2x16xf32>
    %cst_133 = arith.constant dense<0.000000e+00> : vector<2x16xf32>
    %246 = tpu.matmul %245, %244, %cst_133 {dimension_numbers = #tpu.dot_dimension_numbers<[1], [0], [0], [1], [0, 0, 1, 1], [], []>} : vector<2x16xf32>, vector<16x16xf32>, vector<2x16xf32> -> vector<2x16xf32>
    %247 = arith.truncf %246 : vector<2x16xf32> to vector<2x16xbf16>
    %c0_134 = arith.constant 0 : index
    %c0_135 = arith.constant 0 : index
    %248 = vector.load %arg16[%c0_134, %c0_135] : memref<16x2xbf16, #tpu.memory_space<vmem>>, vector<16x2xbf16>
    %cst_136 = arith.constant dense<0.000000e+00> : vector<2x2xf32>
    %249 = tpu.matmul %247, %248, %cst_136 {dimension_numbers = #tpu.dot_dimension_numbers<[1], [0], [0], [1], [0, 0, 1, 1], [], []>} : vector<2x16xbf16>, vector<16x2xbf16>, vector<2x2xf32> -> vector<2x2xf32>
    %c0_137 = arith.constant 0 : index
    %c0_138 = arith.constant 0 : index
    %250 = vector.load %arg17[%c0_137, %c0_138] : memref<1x2xf32, #tpu.memory_space<vmem>>, vector<1x2xf32>
    %251 = vector.broadcast %250 : vector<1x2xf32> to vector<2x2xf32>
    %252 = arith.addf %249, %251 : vector<2x2xf32>
    %c0_139 = arith.constant 0 : index
    %c0_140 = arith.constant 0 : index
    %253 = vector.load %arg24[%c0_139, %c0_140] : memref<2x2xf32, #tpu.memory_space<vmem>>, vector<2x2xf32>
    tpu.vector_store %arg24[%c0_139, %c0_140], %252 {strides = array<i32>} : memref<2x2xf32, #tpu.memory_space<vmem>>, vector<2x2xf32>,
    return
  }
}

</mosaic_0001>

<bundles_post_ra>
// kernel: tpu_custom_call.1
= control target key start
LH: loop header
LB: loop body
LE: loop exit
PB: predicated region body
PF: predicated region fallthrough
CT: control target
= control target key end

     0   :  { %s9550_s0 = inlined_call_operand.vmem [shape: bf16[16,9], index: 0, kind: input, shape index: {}]   ;;  %s9551_s1 = inlined_call_operand.vmem [shape: bf16[9,16], index: 1, kind: input, shape index: {}]   ;;  %s9552_s2 = inlined_call_operand.vmem [shape: f32[1,16], index: 2, kind: input, shape index: {}]   ;;  %s9553_s3 = inlined_call_operand.vmem [shape: f32[1,16], index: 3, kind: input, shape index: {}]   ;;  %s9554_s4 = inlined_call_operand.vmem [shape: f32[1,16], index: 4, kind: input, shape index: {}]   ;;  %s9555_s5 = inlined_call_operand.vmem [shape: bf16[2,16,48], index: 5, kind: input, shape index: {}]   ;;  %s9556_s6 = inlined_call_operand.vmem [shape: f32[2,1,48], index: 6, kind: input, shape index: {}]   ;;  %s9557_s7 = inlined_call_operand.vmem [shape: bf16[2,16,16], index: 7, kind: input, shape index: {}]   ;;  %s9558_s8 = inlined_call_operand.vmem [shape: f32[2,1,16], index: 8, kind: input, shape index: {}]   ;;  %s9559_s9 = inlined_call_operand.vmem [shape: f32[2,1,16], index: 9, kind: input, shape index: {}]   ;;  %s9560_s10 = inlined_call_operand.vmem [shape: f32[2,1,16], index: 10, kind: input, shape index: {}]   ;;  %s9561_s11 = inlined_call_operand.vmem [shape: bf16[2,32,2048], index: 11, kind: input, shape index: {}]   ;;  %s9562_s12 = inlined_call_operand.vmem [shape: bf16[2,2048,16], index: 12, kind: input, shape index: {}]   ;;  %s9563_s13 = inlined_call_operand.vmem [shape: f32[2,1,16], index: 13, kind: input, shape index: {}]   ;;  %s9564_s14 = inlined_call_operand.vmem [shape: f32[2,1,16], index: 14, kind: input, shape index: {}]   ;;  %s9565_s15 = inlined_call_operand.vmem [shape: f32[2,1,16], index: 15, kind: input, shape index: {}]   ;;  %s9566_s16 = inlined_call_operand.vmem [shape: bf16[16,2], index: 16, kind: input, shape index: {}]   ;;  %s9567_s17 = inlined_call_operand.vmem [shape: f32[1,2], index: 17, kind: input, shape index: {}]   ;;  %s9568_s18 = inlined_call_operand.vmem [shape: f32[64,16], index: 18, kind: input, shape index: {}]   ;;  %s9569_s19 = inlined_call_operand.vmem [shape: f32[16,64], index: 19, kind: input, shape index: {}]   ;;  %s9570_s20 = inlined_call_operand.vmem [shape: f32[64,16], index: 20, kind: input, shape index: {}]   ;;  %s9571_s21 = inlined_call_operand.vmem [shape: f32[64,16], index: 21, kind: input, shape index: {}]   ;;  %s9572_s22 = inlined_call_operand.vmem [shape: f32[2,16], index: 22, kind: input, shape index: {}]   ;;  %s9573_s23 = inlined_call_operand.vmem [shape: f32[16,16], index: 23, kind: input, shape index: {}]   ;;  %s9574_s24 = inlined_call_operand.hbm [shape: f32[2,2], index: 24, kind: output, shape index: {}]  }
   0x1   :  { %9581 = sst [smem:[#allocation5_spill]] %s9550_s0 }
   0x2   :  { %9582 = sst [smem:[#allocation6_spill]] %s9551_s1 }
   0x3   :  { %9583 = sst [smem:[#allocation7_spill]] %s9552_s2 }
   0x4   :  { %9584 = sst [smem:[#allocation8_spill]] %s9553_s3 }
   0x5   :  { %9585 = sst [smem:[#allocation9_spill]] %s9554_s4 }
   0x6   :  { %9586 = sst [smem:[#allocation10_spill]] %s9555_s5 }
   0x7   :  { %9587 = sst [smem:[#allocation11_spill]] %s9556_s6 }
   0x8   :  { %9588 = sst [smem:[#allocation12_spill]] %s9557_s7 }
   0x9   :  { %9589 = sst [smem:[#allocation13_spill]] %s9558_s8 }
   0xa   :  { %vm104_vm0 = vcmask 1043456   ;;  %v7673_v0 = vmov 0.0   ;;  %s9590_s27 = sld [smem:[#allocation6_spill]]  ;;  %vm105_vm1 = vcmask 1044480   ;;  %v7674_v2 = vmov 65535   ;;  %s9591_s2 = sld [smem:[#allocation5_spill]] }
   0xb   :  { %7002 = vmatprep.subr.bf16.mxu0 %v7673_v0  ;;  %7008 = vmatprep.subr.bf16.mxu1 %v7673_v0  ;;  %v106_v3 = vsel %vm104_vm0, 4294967295, %v7674_v2  ;;  %vm7675_vm2 = vmmov 0   ;;  %vm100_vm3 = vcmask 72704  }
   0xc   :  { %7004 = vmatprep.mubr.msk.bf16.mxu0 %vm7675_vm2, %v7673_v0  ;;  %7010 = vmatprep.mubr.msk.bf16.mxu1 %vm7675_vm2, %v7673_v0  ;;  %v107_v4 = vsel %vm105_vm1, %v106_v3, 0 }
  0x10   :  { %v7276_v1 = vld [vmem:[%s9590_s27] sm:$0x1f]  }
  0x11   :  { %v7277_v5 = vld [vmem:[%s9591_s2] sm:$0xff]   ;;  %v109_v6 = vand.u32 %v7276_v1, %v107_v4 }
  0x13   :  { %7003 = vmatpush3.bf16.msra.mxu0 %v109_v6 }
  0x16   :  { %7005 = vmatmul.mubr.msk.bf16.vlgmr.msra.gmra.mrb[0].mxu0 %vm100_vm3, %v7277_v5 }
  0x17   :  { %29 = vsyncpa [#allocation3], 0  ;;  %s9592_s7 = sld [smem:[#allocation7_spill]]  ;;  %vm154_vm4 = vcmask 130048   ;;  %s9593_s25 = sld [smem:[#allocation10_spill]]  ;;  %v198_v44 = vld [vmem:[%s9568_s18] sm:$0xff] }
  0x18   :  { %s9594_s1 = sld [smem:[#allocation8_spill]]  ;;  %s9595_s27 = sld [smem:[#allocation9_spill]]  ;;  %7018 = vmatprep.mubr.msk.f32.mxu0 %vm154_vm4, %v198_v44  ;;  %v199_v54 = vld [vmem:[%s9568_s18 + $0x8] sm:$0xff]  ;;  %v200_v55 = vld [vmem:[%s9568_s18 + $0x10] sm:$0xff]  ;;  %v201_v56 = vld [vmem:[%s9568_s18 + $0x18] sm:$0xff]  ;;  %vm793_vm6 = vcmask 523264  }
  0x19   :  { %s9596_s0 = sld [smem:[#allocation11_spill]]  ;;  %v202_v57 = vld [vmem:[%s9568_s18 + $0x20] sm:$0xff]  ;;  %v203_v58 = vld [vmem:[%s9568_s18 + $0x28] sm:$0xff]  ;;  %v204_v59 = vld [vmem:[%s9568_s18 + $0x30] sm:$0xff]  ;;  %s9579_s2 = smov 96   ;;  %vm1184_vm7 = vcmask 261120  }
  0x1a   :  { %v205_v60 = vld [vmem:[%s9568_s18 + $0x38] sm:$0xff]  ;;  %vm7883_vm5 = vmpackc.low %vm154_vm4, %vm154_vm4  ;;  %v7894_v3 = vld [vmem:[%s9570_s20] sm:$0xff]  ;;  %s9599_s5 = sld [smem:[#allocation12_spill]]  ;;  %s9600_s28 = sld [smem:[#allocation13_spill]]  ;;  %vm5816_vm8 = vcmask 9216  }
  0x1b   :  { %v7899_v4 = vld [vmem:[%s9570_s20 + $0x8] sm:$0xff]  ;;  %s7678_s8 = smov 16   ;;  %v8760_v1 = vld [vmem:[%s9570_s20 + $0x18] sm:$0xff] }
  0x1d   :  { %v5832_v7 = vld [vmem:[%s9592_s7] ss:$0 sm:$0xff]  ;;  %s9580_s7 = smov 112  }
  0x1e   :  { %v7278_v26 = vld [vmem:[%s9593_s25] sm:$0xff]  }
  0x1f   :  { %7009 = vmatpush3.bf16.msra.mxu1 %v7278_v26  ;;  %v5836_v35 = vld [vmem:[%s9594_s1] ss:$0 sm:$0xff] }
  0x20   :  { %v5837_v39 = vld [vmem:[%s9595_s27] ss:$0 sm:$0xff] }
  0x21   :  { %v5838_v45 = vld [vmem:[%s9596_s0] ss:$0 sm:$0xff] }
  0xe9   :  { %v145_v8 = vpop.f32.mrb[0].mxu0 }
  0xea   :  { %v146_v9 = vadd.f32 %v5832_v7, %v145_v8  ;;  %v7006_v10 = vpop.f32.mrb[1].mxu0  ;;  %v7905_v8 = vld [vmem:[%s9570_s20 + $0x18] sm:$0xff] }
  0xeb   :  { %v148_v11 = vpop.f32.mrb[2].mxu0  ;;  %v7911_v10 = vld [vmem:[%s9570_s20 + $0x10] sm:$0xff] }
  0xec   :  { %v149_v12 = vadd.f32 %v5832_v7, %v148_v11  ;;  %v7007_v13 = vpop.f32.mrb[3].mxu0  ;;  %v155_v14 = vsel %vm154_vm4, %v146_v9, 0.0 }
  0xed   :  { %156 = vadd.xlane.f32.xlu0 %v155_v14 }
  0xee   :  { %v158_v15 = vsel %vm154_vm4, %v149_v12, 0.0 }
  0xf1   :  { %159 = vadd.xlane.f32.xlu0 %v158_v15  ;;  %v7920_v15 = vld [vmem:[%s9570_s20 + $0x28] sm:$0xff] }
 0x17a   :  { %v157_v16 = vpop.xlane.xlu0 %156 }
 0x17b   :  { %v162_v17 = vmul.f32 0.0625, %v157_v16  ;;  %v7925_v16 = vld [vmem:[%s9570_s20 + $0x20] sm:$0xff] }
 0x17d   :  { %v164_v18 = vsub.f32 %v146_v9, %v162_v17 }
 0x17e   :  { %v160_v19 = vpop.xlane.xlu0 %159 }
 0x17f   :  { %v163_v20 = vmul.f32 0.0625, %v160_v19  ;;  %v166_v21 = vmul.f32 %v164_v18, %v164_v18 }
 0x181   :  { %v165_v22 = vsub.f32 %v149_v12, %v163_v20  ;;  %v168_v23 = vsel %vm154_vm4, %v166_v21, 0.0  ;;  %v7934_v21 = vld [vmem:[%s9570_s20 + $0x38] sm:$0xff] }
 0x182   :  { %169 = vadd.xlane.f32.xlu1 %v168_v23 }
 0x183   :  { %v167_v24 = vmul.f32 %v165_v22, %v165_v22 }
 0x185   :  { %v171_v25 = vsel %vm154_vm4, %v167_v24, 0.0 }
 0x186   :  { %172 = vadd.xlane.f32.xlu1 %v171_v25 }
 0x20f   :  { %v170_v27 = vpop.xlane.xlu1 %169 }
 0x210   :  { %v174_v28 = vmul.f32 0.0625, %v170_v27  ;;  %v217_v27 = vld [vmem:[%s9571_s21 + $0x8] sm:$0xff] }
 0x212   :  { %v176_v29 = vadd.f32 1e-05, %v174_v28 }
 0x213   :  { %v173_v30 = vpop.xlane.xlu1 %172 }
 0x214   :  { %7539 = vrsqrt.f32 %v176_v29  ;;  %v175_v31 = vmul.f32 0.0625, %v173_v30  ;;  %v216_v29 = vld [vmem:[%s9571_s21] sm:$0xff] }
 0x216   :  { %v177_v32 = vadd.f32 1e-05, %v175_v31 }
 0x218   :  { %7541 = vrsqrt.f32 %v177_v32 }
 0x21e   :  { %v7540_v33 = vpop.eup %7539 }
 0x21f   :  { %v180_v34 = vmul.f32 %v7540_v33, %v164_v18 }
 0x221   :  { %v188_v38 = vmul.f32 %v5836_v35, %v180_v34  ;;  %v219_v34 = vld [vmem:[%s9571_s21 + $0x18] sm:$0xff] }
 0x222   :  { %v7542_v36 = vpop.eup %7541 }
 0x223   :  { %v181_v37 = vmul.f32 %v7542_v36, %v165_v22  ;;  %v7835_v41 = vadd.f32 %v5837_v39, %v188_v38  ;;  %v7939_v22 = vld [vmem:[%s9570_s20 + $0x30] sm:$0xff] }
 0x225   :  { %v189_v40 = vmul.f32 %v5836_v35, %v181_v37 }
 0x227   :  { %v7837_v42 = vadd.f32 %v5837_v39, %v189_v40  ;;  %v218_v39 = vld [vmem:[%s9571_s21 + $0x10] sm:$0xff] }
 0x229   :  { %v226_v43 = vpack.c.bf16 %v7837_v42, %v7835_v41 }
 0x22b   :  { %7011 = vmatmul.mubr.msk.bf16.vlgmr.msra.gmra.mrb[0].mxu1 %vm154_vm4, %v226_v43 }
 0x2fe   :  { %v279_v46 = vpop.f32.mrb[0].mxu1 }
 0x2ff   :  { %v7012_v47 = vpop.f32.mrb[1].mxu1  ;;  %v280_v49 = vadd.f32 %v5838_v45, %v279_v46  ;;  %v222_v46 = vld [vmem:[%s9571_s21 + $0x30] sm:$0xff] }
 0x300   :  { %v282_v48 = vpop.f32.mrb[2].mxu1  ;;  %v220_v47 = vld [vmem:[%s9571_s21 + $0x20] sm:$0xff] }
 0x301   :  { %v283_v50 = vadd.f32 %v5838_v45, %v282_v48  ;;  %v7013_v51 = vpop.f32.mrb[3].mxu1 }
 0x303   :  { %v7849_v52 = vpack.i.bf16 %v283_v50, %v280_v49  ;;  %v7179_v53 = vpack.c.bf16 %v283_v50, %v280_v49 }
 0x305   :  { %7252 = vrot.lane.b32.xlu0 %v7849_v52, %s9580_s7  ;;  %7180 = vmatprep.subr.bf16.mxu0 %v7179_v53 }
 0x306   :  { %7182 = vmatpush3.bf16.msra.mxu0 %v7179_v53 }
 0x309   :  { %7019 = vmatmul.mubr.msk.f32.vlgmr.msra.gmra.mrb[4].mxu0 %vm154_vm4, %v199_v54  ;;  %v221_v54 = vld [vmem:[%s9571_s21 + $0x28] sm:$0xff] }
 0x30a   :  { %7021 = vmatprep.mubr.msk.f32.mxu0 %vm154_vm4, %v200_v55 }
 0x30d   :  { %7022 = vmatmul.mubr.msk.f32.gmra.mrb[6].mxu0 %vm154_vm4, %v201_v56  ;;  %v223_v56 = vld [vmem:[%s9571_s21 + $0x38] sm:$0xff] }
 0x30e   :  { %7024 = vmatprep.mubr.msk.f32.mxu0 %vm154_vm4, %v202_v57 }
 0x311   :  { %7025 = vmatmul.mubr.msk.f32.gmra.mrb[8].mxu0 %vm154_vm4, %v203_v58 }
 0x312   :  { %7027 = vmatprep.mubr.msk.f32.mxu0 %vm154_vm4, %v204_v59 }
 0x315   :  { %7028 = vmatmul.mubr.msk.f32.gmra.mrb[10].mxu0 %vm154_vm4, %v205_v60 }
 0x377   :  { %v7253_v61 = vpop.permute.xlu0 %7252 }
 0x378   :  { %v7255_v62 = vunpack.i.h.bf16 %v7253_v61  ;;  %v7254_v63 = vunpack.i.l.bf16 %v7253_v61 }
 0x37a   :  { %v7183_v2 = vpack.c.bf16 %v7255_v62, %v7254_v63 }
 0x37c   :  { %7185 = vmatprep.subr.msk.bf16.mxu1 %vm7883_vm5, %v7183_v2 }
 0x37d   :  { %7188 = vmatpush3.bf16.xpose.msk.msra.mxu1 %vm7883_vm5, %v7183_v2 }
 0x3dc   :  { %v7020_v5 = vpop.f32.mrb[4].mxu0 }
 0x3dd   :  { %v376_v6 = vpop.f32.mrb[5].mxu0  ;;  %v416_v9 = vmul.f32 %v7020_v5, %v7899_v4 }
 0x3de   :  { %v415_v7 = vmul.f32 %v376_v6, %v7894_v3 }
 0x3e0   :  { %v7023_v11 = vpop.f32.mrb[6].mxu0  ;;  %7034 = vmatprep.mubr.msk.f32.mxu1 %vm154_vm4, %v415_v7 }
 0x3e1   :  { %v418_v12 = vmul.f32 %v7023_v11, %v7905_v8  ;;  %v386_v13 = vpop.f32.mrb[7].mxu0  ;;  %7035 = vmatmul.mubr.msk.f32.vlgmr.msra.gmra.mrb[4].mxu1 %vm154_vm4, %v416_v9 }
 0x3e2   :  { %v417_v14 = vmul.f32 %v386_v13, %v7911_v10 }
 0x3e4   :  { %v7026_v17 = vpop.f32.mrb[8].mxu0  ;;  %7037 = vmatprep.mubr.msk.f32.mxu1 %vm154_vm4, %v417_v14 }
 0x3e5   :  { %v420_v18 = vmul.f32 %v7026_v17, %v7920_v15  ;;  %v396_v19 = vpop.f32.mrb[9].mxu0  ;;  %7038 = vmatmul.mubr.msk.f32.gmra.mrb[6].mxu1 %vm154_vm4, %v418_v12 }
 0x3e6   :  { %v419_v20 = vmul.f32 %v396_v19, %v7925_v16 }
 0x3e8   :  { %v7029_v23 = vpop.f32.mrb[10].mxu0  ;;  %7040 = vmatprep.mubr.msk.f32.mxu1 %vm154_vm4, %v419_v20 }
 0x3e9   :  { %v422_v24 = vmul.f32 %v7029_v23, %v7934_v21  ;;  %v406_v25 = vpop.f32.mrb[11].mxu0  ;;  %7041 = vmatmul.mubr.msk.f32.gmra.mrb[8].mxu1 %vm154_vm4, %v420_v18 }
 0x3ea   :  { %v421_v26 = vmul.f32 %v406_v25, %v7939_v22 }
 0x3ec   :  { %7043 = vmatprep.mubr.msk.f32.mxu1 %vm154_vm4, %v421_v26 }
 0x3ed   :  { %7044 = vmatmul.mubr.msk.f32.gmra.mrb[10].mxu1 %vm154_vm4, %v422_v24 }
 0x4b4   :  { %v7036_v28 = vpop.f32.mrb[4].mxu1 }
 0x4b5   :  { %v529_v30 = vadd.f32 %v7036_v28, %v217_v27  ;;  %v523_v31 = vpop.f32.mrb[5].mxu1 }
 0x4b6   :  { %v524_v32 = vadd.f32 %v523_v31, %v216_v29 }
 0x4b7   :  { %v565_v33 = vsel %vm154_vm4, %v529_v30, -inf }
 0x4b8   :  { %566 = vmax.xlane.f32.xlu1 %v565_v33  ;;  %v7039_v35 = vpop.f32.mrb[6].mxu1  ;;  %v562_v38 = vsel %vm154_vm4, %v524_v32, -inf }
 0x4b9   :  { %v533_v36 = vpop.f32.mrb[7].mxu1  ;;  %v539_v37 = vadd.f32 %v7039_v35, %v219_v34 }
 0x4ba   :  { %v534_v44 = vadd.f32 %v533_v36, %v218_v39 }
 0x4bb   :  { %v571_v45 = vsel %vm154_vm4, %v539_v37, -inf }
 0x4bc   :  { %563 = vmax.xlane.f32.xlu1 %v562_v38  ;;  %v7042_v40 = vpop.f32.mrb[8].mxu1  ;;  %v568_v53 = vsel %vm154_vm4, %v534_v44, -inf }
 0x4bd   :  { %v543_v43 = vpop.f32.mrb[9].mxu1  ;;  %v549_v57 = vadd.f32 %v7042_v40, %v221_v54 }
 0x4be   :  { %v544_v51 = vadd.f32 %v543_v43, %v220_v47 }
 0x4bf   :  { %v577_v60 = vsel %vm154_vm4, %v549_v57, -inf }
 0x4c0   :  { %572 = vmax.xlane.f32.xlu1 %v571_v45  ;;  %v7045_v48 = vpop.f32.mrb[10].mxu1  ;;  %v574_v58 = vsel %vm154_vm4, %v544_v51, -inf }
 0x4c1   :  { %v553_v49 = vpop.f32.mrb[11].mxu1  ;;  %v559_v59 = vadd.f32 %v7045_v48, %v223_v56 }
 0x4c2   :  { %v554_v50 = vadd.f32 %v553_v49, %v222_v46 }
 0x4c3   :  { %v583_v61 = vsel %vm154_vm4, %v559_v59, -inf }
 0x4c4   :  { %569 = vmax.xlane.f32.xlu1 %v568_v53  ;;  %v580_v55 = vsel %vm154_vm4, %v554_v50, -inf }
 0x4c5   :  { %581 = vmax.xlane.f32.xlu0 %v580_v55 }
 0x4c8   :  { %575 = vmax.xlane.f32.xlu1 %v574_v58 }
 0x4cc   :  { %578 = vmax.xlane.f32.xlu1 %v577_v60 }
 0x4d0   :  { %584 = vmax.xlane.f32.xlu1 %v583_v61 }
 0x545   :  { %v567_v62 = vpop.xlane.xlu1 %566 }
 0x546   :  { %v587_v63 = vsub.f32 %v529_v30, %v567_v62 }
 0x548   :  { %v596_v2 = vmul.f32 1.442695, %v587_v63 }
 0x549   :  { %v564_v5 = vpop.xlane.xlu1 %563 }
 0x54a   :  { %7543 = vpow2.f32 %v596_v2  ;;  %v586_v6 = vsub.f32 %v524_v32, %v564_v5 }
 0x54c   :  { %v594_v7 = vmul.f32 1.442695, %v586_v6 }
 0x54d   :  { %v573_v9 = vpop.xlane.xlu1 %572 }
 0x54e   :  { %7545 = vpow2.f32 %v594_v7  ;;  %v589_v11 = vsub.f32 %v539_v37, %v573_v9 }
 0x550   :  { %v600_v12 = vmul.f32 1.442695, %v589_v11 }
 0x551   :  { %v570_v13 = vpop.xlane.xlu1 %569 }
 0x552   :  { %7547 = vpow2.f32 %v600_v12  ;;  %v588_v14 = vsub.f32 %v534_v44, %v570_v13  ;;  %v582_v25 = vpop.xlane.xlu0 %581 }
 0x553   :  { %v592_v30 = vsub.f32 %v554_v50, %v582_v25 }
 0x554   :  { %v7979_v17 = vpop.eup %7543  ;;  %v598_v18 = vmul.f32 1.442695, %v588_v14 }
 0x555   :  { %v576_v19 = vpop.xlane.xlu1 %575  ;;  %v613_v20 = vsel %vm154_vm4, %v7979_v17, 0.0  ;;  %v606_v37 = vmul.f32 1.442695, %v592_v30 }
 0x556   :  { %7549 = vpow2.f32 %v598_v18  ;;  %614 = vadd.xlane.f32.xlu1 %v613_v20  ;;  %v590_v24 = vsub.f32 %v544_v51, %v576_v19 }
 0x558   :  { %v7546_v23 = vpop.eup %7545  ;;  %v602_v31 = vmul.f32 1.442695, %v590_v24  ;;  %v206_v24 = vld [vmem:[%s9569_s19] sm:$0xff] }
 0x559   :  { %v579_v26 = vpop.xlane.xlu1 %578  ;;  %v610_v27 = vsel %vm154_vm4, %v7546_v23, 0.0  ;;  %7078 = vmatprep.mubr.msk.f32.mxu1 %vm793_vm6, %v206_v24  ;;  %v1017_v24 = vld [vmem:[%s9561_s11 + $0xc8] sm:$0xff] }
 0x55a   :  { %v591_v28 = vsub.f32 %v549_v57, %v579_v26  ;;  %611 = vadd.xlane.f32.xlu1 %v610_v27 }
 0x55c   :  { %v7984_v29 = vpop.eup %7547  ;;  %v604_v32 = vmul.f32 1.442695, %v591_v28 }
 0x55d   :  { %v585_v33 = vpop.xlane.xlu1 %584  ;;  %v619_v34 = vsel %vm154_vm4, %v7984_v29, 0.0 }
 0x55e   :  { %7551 = vpow2.f32 %v604_v32  ;;  %v593_v35 = vsub.f32 %v559_v59, %v585_v33  ;;  %620 = vadd.xlane.f32.xlu1 %v619_v34 }
 0x55f   :  { %7553 = vpow2.f32 %v602_v31 }
 0x560   :  { %v7550_v36 = vpop.eup %7549  ;;  %v608_v38 = vmul.f32 1.442695, %v593_v35 }
 0x561   :  { %v616_v39 = vsel %vm154_vm4, %v7550_v36, 0.0 }
 0x562   :  { %7555 = vpow2.f32 %v608_v38  ;;  %617 = vadd.xlane.f32.xlu1 %v616_v39 }
 0x563   :  { %7557 = vpow2.f32 %v606_v37 }
 0x568   :  { %v7552_v40 = vpop.eup %7551 }
 0x569   :  { %v625_v43 = vsel %vm154_vm4, %v7552_v40, 0.0  ;;  %v7554_v44 = vpop.eup %7553 }
 0x56a   :  { %626 = vadd.xlane.f32.xlu1 %v625_v43  ;;  %v622_v46 = vsel %vm154_vm4, %v7554_v44, 0.0 }
 0x56c   :  { %v7556_v45 = vpop.eup %7555 }
 0x56d   :  { %v631_v47 = vsel %vm154_vm4, %v7556_v45, 0.0  ;;  %v7558_v48 = vpop.eup %7557 }
 0x56e   :  { %623 = vadd.xlane.f32.xlu1 %v622_v46  ;;  %632 = vadd.xlane.f32.xlu0 %v631_v47  ;;  %v628_v49 = vsel %vm154_vm4, %v7558_v48, 0.0 }
 0x572   :  { %629 = vadd.xlane.f32.xlu1 %v628_v49 }
 0x583   :  { %7257 = vrot.lane.b32.xlu1 %v7849_v52, %s9579_s2 }
 0x5e3   :  { %v615_v50 = vpop.xlane.xlu1 %614 }
 0x5e7   :  { %v612_v51 = vpop.xlane.xlu1 %611 }
 0x5e8   :  { %7559 = vrcp.f32 %v612_v51 }
 0x5e9   :  { %7561 = vrcp.f32 %v615_v50 }
 0x5eb   :  { %v621_v53 = vpop.xlane.xlu1 %620 }
 0x5ef   :  { %v618_v55 = vpop.xlane.xlu1 %617 }
 0x5f0   :  { %7563 = vrcp.f32 %v618_v55 }
 0x5f1   :  { %7565 = vrcp.f32 %v621_v53 }
 0x5f2   :  { %v7560_v54 = vpop.eup %7559 }
 0x5f3   :  { %v642_v56 = vmul.f32 %v7560_v54, %v7546_v23  ;;  %v7562_v2 = vpop.eup %7561 }
 0x5f4   :  { %v643_v6 = vmul.f32 %v7562_v2, %v7979_v17  ;;  %v225_v2 = vld [vmem:[%s9573_s23 + $0x8] sm:$0xff] }
 0x5f5   :  { %7050 = vmatprep.mubr.msk.f32.mxu0 %vm154_vm4, %v642_v56 }
 0x5f7   :  { %v627_v57 = vpop.xlane.xlu1 %626 }
 0x5fa   :  { %v7564_v5 = vpop.eup %7563 }
 0x5fb   :  { %v624_v58 = vpop.xlane.xlu1 %623  ;;  %v633_v52 = vpop.xlane.xlu0 %632  ;;  %v644_v9 = vmul.f32 %v7564_v5, %v7550_v36 }
 0x5fc   :  { %7567 = vrcp.f32 %v624_v58  ;;  %v7566_v7 = vpop.eup %7565 }
 0x5fd   :  { %7569 = vrcp.f32 %v627_v57  ;;  %v645_v12 = vmul.f32 %v7566_v7, %v7984_v29  ;;  %v1000_v7 = vld [vmem:[%s9561_s11 + $0x40] sm:$0xff] }
 0x5ff   :  { %v630_v59 = vpop.xlane.xlu1 %629 }
 0x600   :  { %7571 = vrcp.f32 %v630_v59 }
 0x601   :  { %7573 = vrcp.f32 %v633_v52 }
 0x603   :  { %v7258_v60 = vpop.permute.xlu1 %7257 }
 0x604   :  { %v7260_v61 = vunpack.i.h.bf16 %v7258_v60  ;;  %v7259_v62 = vunpack.i.l.bf16 %v7258_v60 }
 0x606   :  { %v7189_v63 = vpack.c.bf16 %v7260_v61, %v7259_v62  ;;  %v7568_v11 = vpop.eup %7567 }
 0x607   :  { %v7570_v13 = vpop.eup %7569  ;;  %v646_v14 = vmul.f32 %v7568_v11, %v7554_v44  ;;  %v5869_v44 = vld [vmem:[%s9600_s28] ss:$0 sm:$0xff] }
 0x608   :  { %7190 = vmatprep.subr.bf16.mxu0 %v7189_v63  ;;  %v647_v19 = vmul.f32 %v7570_v13, %v7552_v40 }
 0x609   :  { %7192 = vmatpush3.bf16.msra.mxu0 %v7189_v63  ;;  %v224_v63 = vld [vmem:[%s9573_s23] sm:$0xff] }
 0x60a   :  { %v7572_v18 = vpop.eup %7571  ;;  %v7261_v5 = vpack.i.bf16 %v225_v2, %v224_v63 }
 0x60b   :  { %v7574_v20 = vpop.eup %7573  ;;  %v648_v23 = vmul.f32 %v7572_v18, %v7558_v48 }
 0x60c   :  { %7051 = vmatmul.mubr.msk.f32.vlgmr.msra.gmra.mrb[12].mxu0 %vm154_vm4, %v643_v6  ;;  %v649_v17 = vmul.f32 %v7574_v20, %v7556_v45  ;;  %v992_v6 = vld [vmem:[%s9561_s11] sm:$0xff] }
 0x60d   :  { %7053 = vmatprep.mubr.msk.f32.mxu0 %vm154_vm4, %v644_v9  ;;  %v993_v9 = vld [vmem:[%s9561_s11 + $0x8] sm:$0xff]  ;;  %v5875_v11 = vcombine.high %v992_v6, %v1000_v7  ;;  %v5874_v13 = vcombine.low %v992_v6, %v1000_v7  ;;  %v1016_v20 = vld [vmem:[%s9561_s11 + $0xc0] sm:$0xff] }
 0x60e   :  { %v1020_v6 = vld [vmem:[%s9561_s11 + $0xe0] sm:$0xff]  ;;  %v1013_v7 = vld [vmem:[%s9561_s11 + $0xa8] sm:$0xff] }
 0x610   :  { %7054 = vmatmul.mubr.msk.f32.gmra.mrb[14].mxu0 %vm154_vm4, %v645_v12  ;;  %v1001_v12 = vld [vmem:[%s9561_s11 + $0x48] sm:$0xff] }
 0x611   :  { %7056 = vmatprep.mubr.msk.f32.mxu0 %vm154_vm4, %v646_v14  ;;  %v5876_v14 = vcombine.low %v993_v9, %v1001_v12  ;;  %v5877_v18 = vcombine.high %v993_v9, %v1001_v12  ;;  %v1021_v9 = vld [vmem:[%s9561_s11 + $0xe8] sm:$0xff] }
 0x613   :  { %1231 = vmatprep.subr.bf16.mxu0 %v5877_v18  ;;  %v998_v18 = vld [vmem:[%s9561_s11 + $0x30] sm:$0xff] }
 0x614   :  { %7057 = vmatmul.mubr.msk.f32.gmra.mrb[16].mxu0 %vm154_vm4, %v647_v19  ;;  %v1008_v19 = vld [vmem:[%s9561_s11 + $0x80] sm:$0xff] }
 0x615   :  { %7059 = vmatprep.mubr.msk.f32.mxu0 %vm154_vm4, %v648_v23  ;;  %v1009_v23 = vld [vmem:[%s9561_s11 + $0x88] sm:$0xff]  ;;  %1232 = vmatpush1.bf16.msra.mxu0 %v5876_v14  ;;  %v5901_v14 = vcombine.high %v1013_v7, %v1021_v9 }
 0x618   :  { %7060 = vmatmul.mubr.msk.f32.gmra.mrb[18].mxu0 %vm154_vm4, %v649_v17  ;;  %v5891_v17 = vcombine.high %v1008_v19, %v1016_v20 }
 0x6df   :  { %v7052_v25 = vpop.f32.mrb[12].mxu0 }
 0x6e0   :  { %v786_v26 = vmul.f32 %v7052_v25, %v7899_v4  ;;  %v746_v27 = vpop.f32.mrb[13].mxu0  ;;  %v5890_v25 = vcombine.low %v1008_v19, %v1016_v20  ;;  %v1006_v19 = vld [vmem:[%s9561_s11 + $0x70] sm:$0xff]  ;;  %v999_v20 = vld [vmem:[%s9561_s11 + $0x38] sm:$0xff] }
 0x6e1   :  { %v785_v28 = vmul.f32 %v746_v27, %v7894_v3  ;;  %v5893_v27 = vcombine.high %v1009_v23, %v1017_v24 }
 0x6e3   :  { %v7193_v29 = vpack.c.bf16 %v786_v26, %v785_v28  ;;  %v7055_v30 = vpop.f32.mrb[14].mxu0  ;;  %v5892_v26 = vcombine.low %v1009_v23, %v1017_v24  ;;  %1233 = vmatprep.subr.bf16.mxu0 %v5893_v27  ;;  %v994_v28 = vld [vmem:[%s9561_s11 + $0x10] sm:$0xff]  ;;  %v1007_v23 = vld [vmem:[%s9561_s11 + $0x78] sm:$0xff]  ;;  %v5900_v24 = vcombine.low %v1013_v7, %v1021_v9  ;;  %v7312_v7 = vld [vmem:[%s9562_s12 + $0x140] sm:$0xff]  }
 0x6e4   :  { %v788_v31 = vmul.f32 %v7055_v30, %v7905_v8  ;;  %v756_v32 = vpop.f32.mrb[15].mxu0  ;;  %v995_v30 = vld [vmem:[%s9561_s11 + $0x18] sm:$0xff]  ;;  %v1014_v27 = vld [vmem:[%s9561_s11 + $0xb0] sm:$0xff]  ;;  %v7313_v9 = vld [vmem:[%s9562_s12 + $0x1c0] sm:$0xff]  }
 0x6e5   :  { %v787_v33 = vmul.f32 %v756_v32, %v7911_v10  ;;  %7194 = vmatprep.subr.bf16.mxu1 %v7193_v29  ;;  %1234 = vmatpush1.bf16.msra.mxu0 %v5892_v26  ;;  %v5889_v26 = vcombine.high %v999_v20, %v1007_v23 }
 0x6e6   :  { %7196 = vmatpush3.bf16.msra.mxu1 %v7193_v29  ;;  %v1002_v29 = vld [vmem:[%s9561_s11 + $0x50] sm:$0xff] }
 0x6e7   :  { %v7197_v34 = vpack.c.bf16 %v788_v31, %v787_v33  ;;  %v7058_v35 = vpop.f32.mrb[16].mxu0  ;;  %v7679_v31 = vmov 0   ;;  %v5879_v32 = vcombine.high %v994_v28, %v1002_v29  ;;  %v1003_v33 = vld [vmem:[%s9561_s11 + $0x58] sm:$0xff] }
 0x6e8   :  { %v790_v36 = vmul.f32 %v7058_v35, %v7920_v15  ;;  %v766_v37 = vpop.f32.mrb[17].mxu0  ;;  %v207_v15 = vld [vmem:[%s9569_s19 + $0x8] sm:$0xff]  ;;  %1263 = vmatprep.mubr.bf16.mxu0 %v7679_v31  ;;  %v5880_v35 = vcombine.low %v995_v30, %v1003_v33 }
 0x6e9   :  { %v789_v38 = vmul.f32 %v766_v37, %v7925_v16  ;;  %7198 = vmatprep.subr.bf16.mxu1 %v7197_v34  ;;  %v7279_v16 = vld [vmem:[%s9599_s5] sm:$0xff]  }
 0x6ea   :  { %7200 = vmatpush3.bf16.msra.mxu1 %v7197_v34  ;;  %v5878_v34 = vcombine.low %v994_v28, %v1002_v29  ;;  %v1022_v28 = vld [vmem:[%s9561_s11 + $0xf0] sm:$0xff]  ;;  %v1015_v29 = vld [vmem:[%s9561_s11 + $0xb8] sm:$0xff] }
 0x6eb   :  { %v7201_v4 = vpack.c.bf16 %v790_v36, %v789_v38  ;;  %v7061_v3 = vpop.f32.mrb[18].mxu0  ;;  %v5881_v36 = vcombine.high %v995_v30, %v1003_v33  ;;  %v1023_v30 = vld [vmem:[%s9561_s11 + $0xf8] sm:$0xff]  ;;  %v5888_v33 = vcombine.low %v999_v20, %v1007_v23 }
 0x6ec   :  { %v792_v39 = vmul.f32 %v7061_v3, %v7934_v21  ;;  %v776_v40 = vpop.f32.mrb[19].mxu0 }
 0x6ed   :  { %v791_v8 = vmul.f32 %v776_v40, %v7939_v22  ;;  %7202 = vmatprep.subr.bf16.mxu1 %v7201_v4  ;;  %1317 = vmatprep.subr.bf16.mxu0 %v5881_v36  ;;  %v5902_v36 = vcombine.low %v1014_v27, %v1022_v28 }
 0x6ee   :  { %7204 = vmatpush3.bf16.msra.mxu1 %v7201_v4 }
 0x6ef   :  { %v7205_v10 = vpack.c.bf16 %v792_v39, %v791_v8 }
 0x6f1   :  { %7206 = vmatprep.subr.bf16.mxu1 %v7205_v10 }
 0x6f2   :  { %7208 = vmatpush3.bf16.msra.mxu1 %v7205_v10  ;;  %v5872_v10 = vld [vmem:[%s9559_s9] ss:$0 sm:$0xff] }
 0x6f3   :  { %7081 = vmatprep.subr.bf16.mxu1 %v7673_v0 }
 0x6f5   :  { %7079 = vmatmul.mubr.msk.f32.vlgmr.msra.gmra.mrb[12].mxu1 %vm793_vm6, %v207_v15 }
 0x6f6   :  { %7083 = vmatprep.mubr.msk.bf16.mxu1 %vm7675_vm2, %v7673_v0  ;;  %7082 = vmatpush3.bf16.msra.mxu1 %v7279_v16 }
 0x6f7   :  { %1188 = vmatprep.subr.bf16.mxu1 %v5875_v11 }
 0x7c8   :  { %v7080_v21 = vpop.f32.mrb[12].mxu1 }
 0x7c9   :  { %v866_v22 = vpop.f32.mrb[13].mxu1 }
 0x7ca   :  { %v875_v43 = vpack.c.bf16 %v7080_v21, %v866_v22  ;;  %v5873_v22 = vld [vmem:[%s9560_s10] ss:$0 sm:$0xff] }
 0x7cc   :  { %7084 = vmatmul.mubr.msk.bf16.vlgmr.msra.gmra.mrb[16].mxu1 %vm154_vm4, %v875_v43 }
 0x7cd   :  { %1189 = vmatpush1.bf16.msra.mxu1 %v5874_v13  ;;  %1220 = vmatprep.mubr.bf16.mxu1 %v7679_v31 }
 0x7ce   :  { %1190 = vmatprep.subr.bf16.mxu1 %v5891_v17 }
 0x7d1   :  { %1191 = vmatpush1.bf16.msra.mxu1 %v5890_v25  ;;  %v5887_v25 = vcombine.high %v998_v18, %v1006_v19 }
 0x7d2   :  { %1274 = vmatprep.subr.bf16.mxu1 %v5879_v32  ;;  %v5886_v32 = vcombine.low %v998_v18, %v1006_v19 }
 0x89f   :  { %v928_v45 = vpop.f32.mrb[16].mxu1 }
 0x8a0   :  { %v929_v46 = vadd.f32 %v5869_v44, %v928_v45  ;;  %v7085_v47 = vpop.f32.mrb[17].mxu1 }
 0x8a1   :  { %v931_v48 = vpop.f32.mrb[18].mxu1 }
 0x8a2   :  { %v932_v49 = vadd.f32 %v5869_v44, %v931_v48  ;;  %v7086_v50 = vpop.f32.mrb[19].mxu1  ;;  %v935_v51 = vadd.f32 %v929_v46, %v7835_v41 }
 0x8a4   :  { %v939_v53 = vsel %vm154_vm4, %v935_v51, 0.0  ;;  %v936_v54 = vadd.f32 %v932_v49, %v7837_v42  ;;  %v1010_v49 = vld [vmem:[%s9561_s11 + $0x90] sm:$0xff] }
 0x8a5   :  { %940 = vadd.xlane.f32.xlu0 %v939_v53  ;;  %v1011_v53 = vld [vmem:[%s9561_s11 + $0x98] sm:$0xff] }
 0x8a6   :  { %v942_v55 = vsel %vm154_vm4, %v936_v54, 0.0 }
 0x8a9   :  { %943 = vadd.xlane.f32.xlu0 %v942_v55 }
 0x932   :  { %v941_v56 = vpop.xlane.xlu0 %940 }
 0x933   :  { %v945_v57 = vmul.f32 0.0625, %v941_v56 }
 0x935   :  { %v947_v58 = vsub.f32 %v935_v51, %v945_v57  ;;  %v1018_v51 = vld [vmem:[%s9561_s11 + $0xd0] sm:$0xff] }
 0x936   :  { %v944_v59 = vpop.xlane.xlu0 %943 }
 0x937   :  { %v946_v60 = vmul.f32 0.0625, %v944_v59  ;;  %v949_v61 = vmul.f32 %v947_v58, %v947_v58 }
 0x939   :  { %v8035_v62 = vsub.f32 %v936_v54, %v946_v60  ;;  %v951_v52 = vsel %vm154_vm4, %v949_v61, 0.0  ;;  %v1019_v54 = vld [vmem:[%s9561_s11 + $0xd8] sm:$0xff]  ;;  %v996_v60 = vld [vmem:[%s9561_s11 + $0x20] sm:$0xff] }
 0x93a   :  { %952 = vadd.xlane.f32.xlu0 %v951_v52  ;;  %v5897_v59 = vcombine.high %v1011_v53, %v1019_v54  ;;  %v1004_v61 = vld [vmem:[%s9561_s11 + $0x60] sm:$0xff]  ;;  %v1005_v52 = vld [vmem:[%s9561_s11 + $0x68] sm:$0xff] }
 0x93b   :  { %v950_v41 = vmul.f32 %v8035_v62, %v8035_v62  ;;  %v5883_v63 = vcombine.high %v996_v60, %v1004_v61  ;;  %v5882_v11 = vcombine.low %v996_v60, %v1004_v61  ;;  %v7302_v60 = vld [vmem:[%s9562_s12 + $0x28] sm:$0xff]  }
 0x93c   :  { %v7303_v61 = vld [vmem:[%s9562_s12 + $0xa8] sm:$0xff]  }
 0x93d   :  { %v954_v42 = vsel %vm154_vm4, %v950_v41, 0.0  ;;  %v5894_v41 = vcombine.low %v1010_v49, %v1018_v51 }
 0x93e   :  { %955 = vadd.xlane.f32.xlu0 %v954_v42  ;;  %v5896_v42 = vcombine.low %v1011_v53, %v1019_v54  ;;  %v7295_v53 = vld [vmem:[%s9562_s12 + $0x98] sm:$0xff]   ;;  %v7296_v54 = vld [vmem:[%s9562_s12 + $0x60] sm:$0xff]  }
 0x954   :  { %7262 = vrot.lane.b32.xlu0 %v7261_v5, %s7678_s8  ;;  %v1012_v5 = vld [vmem:[%s9561_s11 + $0xa0] sm:$0xff]  ;;  %s9601_s8 = smov 112  }
 0x955   :  { %v5899_v13 = vcombine.high %v1012_v5, %v1020_v6  ;;  %v5898_v17 = vcombine.low %v1012_v5, %v1020_v6  ;;  %v7310_v5 = vld [vmem:[%s9562_s12 + $0x38] sm:$0xff]  }
 0x956   :  { %v7311_v6 = vld [vmem:[%s9562_s12 + $0xb8] sm:$0xff]  }
 0x9c7   :  { %v953_v37 = vpop.xlane.xlu0 %952 }
 0x9c8   :  { %v957_v38 = vmul.f32 0.0625, %v953_v37  ;;  %v5904_v37 = vcombine.low %v1015_v29, %v1023_v30 }
 0x9ca   :  { %v959_v4 = vadd.f32 1e-05, %v957_v38  ;;  %v7280_v38 = vld [vmem:[%s9562_s12 + $0x40] sm:$0xff]  }
 0x9cb   :  { %v956_v3 = vpop.xlane.xlu0 %955 }
 0x9cc   :  { %7575 = vrsqrt.f32 %v959_v4  ;;  %v958_v39 = vmul.f32 0.0625, %v956_v3  ;;  %v7281_v4 = vld [vmem:[%s9562_s12 + $0xc0] sm:$0xff]  }
 0x9cd   :  { %v7282_v3 = vld [vmem:[%s9562_s12] sm:$0xff]  }
 0x9ce   :  { %v960_v40 = vadd.f32 1e-05, %v958_v39  ;;  %v7283_v39 = vld [vmem:[%s9562_s12 + $0x80] sm:$0xff]  }
 0x9cf   :  { %v8091_v43 = vpop.permute.xlu0 %7262 }
 0x9d0   :  { %7577 = vrsqrt.f32 %v960_v40  ;;  %v7265_v47 = vunpack.i.h.bf16 %v8091_v43  ;;  %v7264_v48 = vunpack.i.l.bf16 %v8091_v43  ;;  %v7284_v40 = vld [vmem:[%s9562_s12 + $0x48] sm:$0xff]  }
 0x9d1   :  { %v6102_v43 = vld [vmem:[%s9561_s11 + $0x168] sm:$0xff] }
 0x9d6   :  { %v7576_v8 = vpop.eup %7575 }
 0x9d7   :  { %v963_v15 = vmul.f32 %v7576_v8, %v947_v58  ;;  %v5895_v58 = vcombine.high %v1010_v49, %v1018_v51  ;;  %v7285_v8 = vld [vmem:[%s9562_s12 + $0xc8] sm:$0xff]   ;;  %v7293_v49 = vld [vmem:[%s9562_s12 + $0xd8] sm:$0xff]  }
 0x9d8   :  { %v7294_v51 = vld [vmem:[%s9562_s12 + $0x18] sm:$0xff]  }
 0x9d9   :  { %v971_v16 = vmul.f32 %v5872_v10, %v963_v15  ;;  %v7287_v15 = vld [vmem:[%s9562_s12 + $0x88] sm:$0xff]  }
 0x9da   :  { %v7578_v21 = vpop.eup %7577 }
 0x9db   :  { %v964_v44 = vmul.f32 %v7578_v21, %v8035_v62  ;;  %v8094_v46 = vadd.f32 %v5873_v22, %v971_v16  ;;  %v997_v62 = vld [vmem:[%s9561_s11 + $0x28] sm:$0xff]  ;;  %v7288_v16 = vld [vmem:[%s9562_s12 + $0x50] sm:$0xff]  }
 0x9dc   :  { %v5885_v2 = vcombine.high %v997_v62, %v1005_v52  ;;  %v5884_v12 = vcombine.low %v997_v62, %v1005_v52  ;;  %v7289_v21 = vld [vmem:[%s9562_s12 + $0xd0] sm:$0xff]  }
 0x9dd   :  { %v972_v45 = vmul.f32 %v5872_v10, %v964_v44  ;;  %v989_v56 = vsel %vm154_vm4, %v8094_v46, %v7264_v48  ;;  %v7286_v10 = vld [vmem:[%s9562_s12 + $0x8] sm:$0xff]   ;;  %v7291_v44 = vld [vmem:[%s9562_s12 + $0x90] sm:$0xff]  }
 0x9de   :  { %v7304_v62 = vld [vmem:[%s9562_s12 + $0x70] sm:$0xff]  }
 0x9df   :  { %v8101_v50 = vadd.f32 %v5873_v22, %v972_v45  ;;  %v7290_v22 = vld [vmem:[%s9562_s12 + $0x10] sm:$0xff]   ;;  %v7292_v45 = vld [vmem:[%s9562_s12 + $0x58] sm:$0xff]  }
 0x9e0   :  { %v7305_v52 = vld [vmem:[%s9562_s12 + $0xf0] sm:$0xff]  }
 0x9e1   :  { %v990_v55 = vsel %vm154_vm4, %v8101_v50, %v7265_v47 }
 0x9e2   :  { %v8120_v57 = vpack.c.bf16 %v990_v55, %v989_v56  ;;  %v7297_v55 = vld [vmem:[%s9562_s12 + $0xe0] sm:$0xff]  }
 0x9e3   :  { %v7298_v56 = vld [vmem:[%s9562_s12 + $0x20] sm:$0xff]  }
 0x9e4   :  { %5906 = vmatmul.mubr.msk.bf16.vlgmr.msra.gmra.mrb[20].mxu1 %vm1184_vm7, %v8120_v57  ;;  %5907 = vmatmul.mubr.msk.bf16.vlgmr.msra.gmra.mrb[20].mxu0 %vm1184_vm7, %v8120_v57 }
 0x9e5   :  { %1275 = vmatpush1.bf16.msra.mxu1 %v5878_v34  ;;  %1318 = vmatpush1.bf16.msra.mxu0 %v5880_v35  ;;  %v5903_v34 = vcombine.high %v1014_v27, %v1022_v28  ;;  %v5905_v35 = vcombine.high %v1015_v29, %v1023_v30  ;;  %v7314_v29 = vld [vmem:[%s9562_s12 + $0x100] sm:$0xff]  }
 0x9e6   :  { %1276 = vmatprep.subr.bf16.mxu1 %v5895_v58  ;;  %1319 = vmatprep.subr.bf16.mxu0 %v5897_v59  ;;  %v7300_v58 = vld [vmem:[%s9562_s12 + $0x68] sm:$0xff]   ;;  %v7315_v30 = vld [vmem:[%s9562_s12 + $0x180] sm:$0xff]  }
 0x9e7   :  { %1306 = vmatprep.mubr.bf16.mxu1 %v7679_v31  ;;  %1349 = vmatprep.mubr.bf16.mxu0 %v7679_v31  ;;  %v7301_v59 = vld [vmem:[%s9562_s12 + $0xe8] sm:$0xff]  }
 0x9e9   :  { %1277 = vmatpush1.bf16.msra.mxu1 %v5894_v41  ;;  %1320 = vmatpush1.bf16.msra.mxu0 %v5896_v42  ;;  %v7306_v41 = vld [vmem:[%s9562_s12 + $0x30] sm:$0xff]  }
 0x9ea   :  { %1360 = vmatprep.subr.bf16.mxu1 %v5883_v63  ;;  %1403 = vmatprep.subr.bf16.mxu0 %v5885_v2  ;;  %v7307_v42 = vld [vmem:[%s9562_s12 + $0xb0] sm:$0xff]   ;;  %v7308_v63 = vld [vmem:[%s9562_s12 + $0x78] sm:$0xff]  }
 0x9eb   :  { %v7309_v2 = vld [vmem:[%s9562_s12 + $0xf8] sm:$0xff]  }
 0x9ec   :  { %5908 = vmatmul.mubr.msk.bf16.vlgmr.msra.gmra.mrb[24].mxu1 %vm1184_vm7, %v8120_v57  ;;  %5909 = vmatmul.mubr.msk.bf16.vlgmr.msra.gmra.mrb[24].mxu0 %vm1184_vm7, %v8120_v57 }
 0x9ed   :  { %1361 = vmatpush1.bf16.msra.mxu1 %v5882_v11  ;;  %1404 = vmatpush1.bf16.msra.mxu0 %v5884_v12 }
 0x9ee   :  { %1362 = vmatprep.subr.bf16.mxu1 %v5899_v13  ;;  %1405 = vmatprep.subr.bf16.mxu0 %v5901_v14 }
 0x9ef   :  { %1392 = vmatprep.mubr.bf16.mxu1 %v7679_v31  ;;  %1435 = vmatprep.mubr.bf16.mxu0 %v7679_v31 }
 0x9f1   :  { %1363 = vmatpush1.bf16.msra.mxu1 %v5898_v17  ;;  %1406 = vmatpush1.bf16.msra.mxu0 %v5900_v24 }
 0x9f2   :  { %1446 = vmatprep.subr.bf16.mxu1 %v5887_v25  ;;  %1489 = vmatprep.subr.bf16.mxu0 %v5889_v26 }
 0x9f4   :  { %5910 = vmatmul.mubr.msk.bf16.vlgmr.msra.gmra.mrb[28].mxu1 %vm1184_vm7, %v8120_v57  ;;  %5911 = vmatmul.mubr.msk.bf16.vlgmr.msra.gmra.mrb[28].mxu0 %vm1184_vm7, %v8120_v57 }
 0x9f5   :  { %1447 = vmatpush1.bf16.msra.mxu1 %v5886_v32  ;;  %1490 = vmatpush1.bf16.msra.mxu0 %v5888_v33 }
 0x9f6   :  { %1448 = vmatprep.subr.bf16.mxu1 %v5903_v34  ;;  %1491 = vmatprep.subr.bf16.mxu0 %v5905_v35  ;;  %v7316_v34 = vld [vmem:[%s9562_s12 + $0x148] sm:$0xff]  }
 0x9f7   :  { %1478 = vmatprep.mubr.bf16.mxu1 %v7679_v31  ;;  %1521 = vmatprep.mubr.bf16.mxu0 %v7679_v31  ;;  %v7317_v35 = vld [vmem:[%s9562_s12 + $0x1c8] sm:$0xff]  }
 0x9f9   :  { %1449 = vmatpush1.bf16.msra.mxu1 %v5902_v36  ;;  %1492 = vmatpush1.bf16.msra.mxu0 %v5904_v37 }
 0x9fa   :  { %6601 = vmatprep.subr.bf16.mxu1 %v7280_v38  ;;  %6623 = vmatprep.subr.bf16.mxu0 %v7281_v4 }
 0x9fc   :  { %5912 = vmatmul.mubr.msk.bf16.vlgmr.msra.gmra.mrb[32].mxu1 %vm1184_vm7, %v8120_v57  ;;  %5913 = vmatmul.mubr.msk.bf16.vlgmr.msra.gmra.mrb[32].mxu0 %vm1184_vm7, %v8120_v57  ;;  %v7299_v57 = vld [vmem:[%s9562_s12 + $0xa0] sm:$0xff]  }
 0x9fd   :  { %6602 = vmatpush3.bf16.msra.mxu1 %v7282_v3  ;;  %6624 = vmatpush3.bf16.msra.mxu0 %v7283_v39 }
 0x9fe   :  { %6603 = vmatprep.subr.bf16.mxu1 %v7284_v40  ;;  %6625 = vmatprep.subr.bf16.mxu0 %v7285_v8  ;;  %v7318_v40 = vld [vmem:[%s9562_s12 + $0x108] sm:$0xff]  }
 0x9ff   :  { %v7319_v8 = vld [vmem:[%s9562_s12 + $0x188] sm:$0xff]  }
 0xa01   :  { %6604 = vmatpush3.bf16.msra.mxu1 %v7286_v10  ;;  %6626 = vmatpush3.bf16.msra.mxu0 %v7287_v15 }
 0xa02   :  { %6605 = vmatprep.subr.bf16.mxu1 %v7288_v16  ;;  %6627 = vmatprep.subr.bf16.mxu0 %v7289_v21 }
 0xa05   :  { %6606 = vmatpush3.bf16.msra.mxu1 %v7290_v22  ;;  %6628 = vmatpush3.bf16.msra.mxu0 %v7291_v44  ;;  %v7320_v22 = vld [vmem:[%s9562_s12 + $0x150] sm:$0xff]  }
 0xa06   :  { %6607 = vmatprep.subr.bf16.mxu1 %v7292_v45  ;;  %6629 = vmatprep.subr.bf16.mxu0 %v7293_v49  ;;  %v7321_v44 = vld [vmem:[%s9562_s12 + $0x1d0] sm:$0xff]  }
 0xa09   :  { %6608 = vmatpush3.bf16.msra.mxu1 %v7294_v51  ;;  %6630 = vmatpush3.bf16.msra.mxu0 %v7295_v53 }
 0xa0a   :  { %6609 = vmatprep.subr.bf16.mxu1 %v7296_v54  ;;  %6631 = vmatprep.subr.bf16.mxu0 %v7297_v55  ;;  %v7322_v54 = vld [vmem:[%s9562_s12 + $0x110] sm:$0xff]  }
 0xa0b   :  { %v7323_v55 = vld [vmem:[%s9562_s12 + $0x190] sm:$0xff]  }
 0xa0d   :  { %6610 = vmatpush3.bf16.msra.mxu1 %v7298_v56  ;;  %6632 = vmatpush3.bf16.msra.mxu0 %v7299_v57  ;;  %v7324_v56 = vld [vmem:[%s9562_s12 + $0x158] sm:$0xff]  }
 0xa0e   :  { %6611 = vmatprep.subr.bf16.mxu1 %v7300_v58  ;;  %6633 = vmatprep.subr.bf16.mxu0 %v7301_v59  ;;  %v7325_v57 = vld [vmem:[%s9562_s12 + $0x1d8] sm:$0xff]  }
 0xa11   :  { %6612 = vmatpush3.bf16.msra.mxu1 %v7302_v60  ;;  %6634 = vmatpush3.bf16.msra.mxu0 %v7303_v61 }
 0xa12   :  { %6613 = vmatprep.subr.bf16.mxu1 %v7304_v62  ;;  %6635 = vmatprep.subr.bf16.mxu0 %v7305_v52 }
 0xa15   :  { %6614 = vmatpush3.bf16.msra.mxu1 %v7306_v41  ;;  %6636 = vmatpush3.bf16.msra.mxu0 %v7307_v42  ;;  %v7326_v41 = vld [vmem:[%s9562_s12 + $0x118] sm:$0xff]  }
 0xa16   :  { %6615 = vmatprep.subr.bf16.mxu1 %v7308_v63  ;;  %6637 = vmatprep.subr.bf16.mxu0 %v7309_v2  ;;  %v7327_v42 = vld [vmem:[%s9562_s12 + $0x198] sm:$0xff]  }
 0xa19   :  { %6616 = vmatpush3.bf16.msra.mxu1 %v7310_v5  ;;  %6638 = vmatpush3.bf16.msra.mxu0 %v7311_v6 }
 0xa1a   :  { %6645 = vmatprep.subr.bf16.mxu1 %v7312_v7  ;;  %6667 = vmatprep.subr.bf16.mxu0 %v7313_v9  ;;  %v7328_v7 = vld [vmem:[%s9562_s12 + $0x160] sm:$0xff]  }
 0xa1b   :  { %v7329_v9 = vld [vmem:[%s9562_s12 + $0x1e0] sm:$0xff]  }
 0xab7   :  { %v1222_v11 = vpop.f32.mrb[20].mxu1  ;;  %v1265_v12 = vpop.f32.mrb[20].mxu0 }
 0xab8   :  { %v1224_v13 = vpop.f32.mrb[21].mxu1  ;;  %v1267_v14 = vpop.f32.mrb[21].mxu0 }
 0xab9   :  { %v1226_v18 = vpop.f32.mrb[22].mxu1  ;;  %v1269_v19 = vpop.f32.mrb[22].mxu0 }
 0xaba   :  { %v1532_v20 = vpack.c.bf16 %v1226_v18, %v1222_v11  ;;  %v1534_v23 = vpack.c.bf16 %v1269_v19, %v1265_v12  ;;  %v1228_v17 = vpop.f32.mrb[23].mxu1  ;;  %v1271_v24 = vpop.f32.mrb[23].mxu0  ;;  %v7332_v18 = vld [vmem:[%s9562_s12 + $0x168] sm:$0xff]  }
 0xabb   :  { %v1533_v25 = vpack.c.bf16 %v1228_v17, %v1224_v13  ;;  %v1535_v26 = vpack.c.bf16 %v1271_v24, %v1267_v14  ;;  %v7330_v13 = vld [vmem:[%s9562_s12 + $0x120] sm:$0xff]   ;;  %v7333_v19 = vld [vmem:[%s9562_s12 + $0x1e8] sm:$0xff]  }
 0xabc   :  { %v1548_v32 = vmax.bf16 %v7679_v31, %v1532_v20  ;;  %v1550_v33 = vmax.bf16 %v7679_v31, %v1534_v23  ;;  %v7331_v14 = vld [vmem:[%s9562_s12 + $0x1a0] sm:$0xff]  }
 0xabd   :  { %v1549_v27 = vmax.bf16 %v7679_v31, %v1533_v25  ;;  %v1551_v28 = vmax.bf16 %v7679_v31, %v1535_v26 }
 0xabf   :  { %v8310_v36 = vpop.f32.mrb[24].mxu1  ;;  %v8312_v37 = vpop.f32.mrb[24].mxu0  ;;  %2627 = vmatprep.mubr.bf16.mxu1 %v1549_v27  ;;  %2668 = vmatprep.mubr.bf16.mxu0 %v1551_v28  ;;  %v7334_v27 = vld [vmem:[%s9562_s12 + $0x128] sm:$0xff]  }
 0xac0   :  { %v1310_v38 = vpop.f32.mrb[25].mxu1  ;;  %v1353_v4 = vpop.f32.mrb[25].mxu0  ;;  %2628 = vmatmul.mubr.bf16.vlgmr.msra.gmra.mrb[36].mxu1 %v1548_v32  ;;  %2669 = vmatmul.mubr.bf16.vlgmr.msra.gmra.mrb[36].mxu0 %v1550_v33  ;;  %v7335_v28 = vld [vmem:[%s9562_s12 + $0x1a8] sm:$0xff]  }
 0xac1   :  { %6646 = vmatpush3.bf16.msra.mxu1 %v7314_v29  ;;  %6668 = vmatpush3.bf16.msra.mxu0 %v7315_v30  ;;  %v8314_v3 = vpop.f32.mrb[26].mxu1  ;;  %v8316_v39 = vpop.f32.mrb[26].mxu0 }
 0xac2   :  { %v1536_v10 = vpack.c.bf16 %v8314_v3, %v8310_v36  ;;  %v1538_v15 = vpack.c.bf16 %v8316_v39, %v8312_v37  ;;  %v1314_v16 = vpop.f32.mrb[27].mxu1  ;;  %v1357_v21 = vpop.f32.mrb[27].mxu0  ;;  %6647 = vmatprep.subr.bf16.mxu1 %v7316_v34  ;;  %6669 = vmatprep.subr.bf16.mxu0 %v7317_v35  ;;  %v7336_v34 = vld [vmem:[%s9562_s12 + $0x170] sm:$0xff]   ;;  %v7349_v36 = vld [vmem:[%s9562_s12 + $0x2c8] sm:$0xff]  }
 0xac3   :  { %v1537_v45 = vpack.c.bf16 %v1314_v16, %v1310_v38  ;;  %v1539_v49 = vpack.c.bf16 %v1357_v21, %v1353_v4  ;;  %v7337_v35 = vld [vmem:[%s9562_s12 + $0x1f0] sm:$0xff]   ;;  %v7340_v16 = vld [vmem:[%s9562_s12 + $0x178] sm:$0xff]   ;;  %v7350_v3 = vld [vmem:[%s9562_s12 + $0x208] sm:$0xff]  }
 0xac4   :  { %v7341_v21 = vld [vmem:[%s9562_s12 + $0x1f8] sm:$0xff]   ;;  %v7351_v39 = vld [vmem:[%s9562_s12 + $0x288] sm:$0xff]  }
 0xac5   :  { %v1553_v51 = vmax.bf16 %v7679_v31, %v1537_v45  ;;  %v1555_v53 = vmax.bf16 %v7679_v31, %v1539_v49  ;;  %6648 = vmatpush3.bf16.msra.mxu1 %v7318_v40  ;;  %6670 = vmatpush3.bf16.msra.mxu0 %v7319_v8  ;;  %v7338_v40 = vld [vmem:[%s9562_s12 + $0x130] sm:$0xff]   ;;  %v7344_v45 = vld [vmem:[%s9562_s12 + $0x240] sm:$0xff]  }
 0xac6   :  { %6649 = vmatprep.subr.bf16.mxu1 %v7320_v22  ;;  %6671 = vmatprep.subr.bf16.mxu0 %v7321_v44  ;;  %v7339_v8 = vld [vmem:[%s9562_s12 + $0x1b0] sm:$0xff]   ;;  %v7342_v22 = vld [vmem:[%s9562_s12 + $0x138] sm:$0xff]   ;;  %v7345_v49 = vld [vmem:[%s9562_s12 + $0x2c0] sm:$0xff]  }
 0xac7   :  { %v8348_v58 = vpop.f32.mrb[28].mxu1  ;;  %v8350_v59 = vpop.f32.mrb[28].mxu0  ;;  %2709 = vmatprep.mubr.bf16.mxu1 %v1553_v51  ;;  %2750 = vmatprep.mubr.bf16.mxu0 %v1555_v53  ;;  %v7343_v44 = vld [vmem:[%s9562_s12 + $0x1b8] sm:$0xff]   ;;  %v7346_v51 = vld [vmem:[%s9562_s12 + $0x200] sm:$0xff]   ;;  %v1552_v53 = vmax.bf16 %v7679_v31, %v1536_v10  ;;  %v7352_v10 = vld [vmem:[%s9562_s12 + $0x250] sm:$0xff]  }
 0xac8   :  { %v8352_v60 = vpop.f32.mrb[29].mxu1  ;;  %v8354_v61 = vpop.f32.mrb[29].mxu0 }
 0xac9   :  { %6650 = vmatpush3.bf16.msra.mxu1 %v7322_v54  ;;  %6672 = vmatpush3.bf16.msra.mxu0 %v7323_v55  ;;  %v8356_v62 = vpop.f32.mrb[30].mxu1  ;;  %v8358_v52 = vpop.f32.mrb[30].mxu0  ;;  %v1554_v54 = vmax.bf16 %v7679_v31, %v1538_v15  ;;  %v7347_v55 = vld [vmem:[%s9562_s12 + $0x280] sm:$0xff]   ;;  %v7353_v15 = vld [vmem:[%s9562_s12 + $0x2d0] sm:$0xff]  }
 0xaca   :  { %v1540_v63 = vpack.c.bf16 %v8356_v62, %v8348_v58  ;;  %v1542_v2 = vpack.c.bf16 %v8358_v52, %v8350_v59  ;;  %v1400_v5 = vpop.f32.mrb[31].mxu1  ;;  %v8370_v6 = vpop.f32.mrb[31].mxu0  ;;  %6651 = vmatprep.subr.bf16.mxu1 %v7324_v56  ;;  %6673 = vmatprep.subr.bf16.mxu0 %v7325_v57  ;;  %v7348_v57 = vld [vmem:[%s9562_s12 + $0x248] sm:$0xff]  }
 0xacb   :  { %v1541_v11 = vpack.c.bf16 %v1400_v5, %v8352_v60  ;;  %v1543_v12 = vpack.c.bf16 %v8370_v6, %v8354_v61  ;;  %v7354_v60 = vld [vmem:[%s9562_s12 + $0x210] sm:$0xff]   ;;  %v7358_v5 = vld [vmem:[%s9562_s12 + $0x218] sm:$0xff]   ;;  %v7381_v62 = vld [vmem:[%s9562_s12 + $0x3c8] sm:$0xff]  }
 0xacc   :  { %v7355_v61 = vld [vmem:[%s9562_s12 + $0x290] sm:$0xff]   ;;  %v7359_v6 = vld [vmem:[%s9562_s12 + $0x298] sm:$0xff]   ;;  %v7382_v52 = vld [vmem:[%s9562_s12 + $0x308] sm:$0xff]  }
 0xacd   :  { %6652 = vmatpush3.bf16.msra.mxu1 %v7326_v41  ;;  %6674 = vmatpush3.bf16.msra.mxu0 %v7327_v42  ;;  %v1557_v56 = vmax.bf16 %v7679_v31, %v1541_v11  ;;  %v1559_v37 = vmax.bf16 %v7679_v31, %v1543_v12  ;;  %v7356_v41 = vld [vmem:[%s9562_s12 + $0x258] sm:$0xff]   ;;  %v7362_v11 = vld [vmem:[%s9562_s12 + $0x220] sm:$0xff]  }
 0xace   :  { %6653 = vmatprep.subr.bf16.mxu1 %v7328_v7  ;;  %6675 = vmatprep.subr.bf16.mxu0 %v7329_v9  ;;  %v7357_v42 = vld [vmem:[%s9562_s12 + $0x2d8] sm:$0xff]   ;;  %v7360_v7 = vld [vmem:[%s9562_s12 + $0x260] sm:$0xff]  }
 0xacf   :  { %v8393_v20 = vpop.f32.mrb[32].mxu1  ;;  %v8395_v23 = vpop.f32.mrb[32].mxu0  ;;  %v7361_v9 = vld [vmem:[%s9562_s12 + $0x2e0] sm:$0xff]  }
 0xad0   :  { %v8397_v17 = vpop.f32.mrb[33].mxu1  ;;  %v8399_v24 = vpop.f32.mrb[33].mxu0  ;;  %v7363_v12 = vld [vmem:[%s9562_s12 + $0x2a0] sm:$0xff]  }
 0xad1   :  { %6654 = vmatpush3.bf16.msra.mxu1 %v7330_v13  ;;  %6676 = vmatpush3.bf16.msra.mxu0 %v7331_v14  ;;  %v8401_v25 = vpop.f32.mrb[34].mxu1  ;;  %v8403_v26 = vpop.f32.mrb[34].mxu0  ;;  %v7364_v13 = vld [vmem:[%s9562_s12 + $0x268] sm:$0xff]  }
 0xad2   :  { %v1544_v29 = vpack.c.bf16 %v8401_v25, %v8393_v20  ;;  %v1546_v30 = vpack.c.bf16 %v8403_v26, %v8395_v23  ;;  %v8415_v32 = vpop.f32.mrb[35].mxu1  ;;  %v8417_v33 = vpop.f32.mrb[35].mxu0  ;;  %6655 = vmatprep.subr.bf16.mxu1 %v7332_v18  ;;  %6677 = vmatprep.subr.bf16.mxu0 %v7333_v19  ;;  %v7365_v14 = vld [vmem:[%s9562_s12 + $0x2e8] sm:$0xff]  }
 0xad3   :  { %v1545_v38 = vpack.c.bf16 %v8415_v32, %v8397_v17  ;;  %v1547_v4 = vpack.c.bf16 %v8417_v33, %v8399_v24  ;;  %v7366_v18 = vld [vmem:[%s9562_s12 + $0x228] sm:$0xff]   ;;  %v7385_v17 = vld [vmem:[%s9562_s12 + $0x3d0] sm:$0xff]   ;;  %v7388_v33 = vld [vmem:[%s9562_s12 + $0x358] sm:$0xff]  }
 0xad4   :  { %v7367_v19 = vld [vmem:[%s9562_s12 + $0x2a8] sm:$0xff]   ;;  %v7386_v24 = vld [vmem:[%s9562_s12 + $0x310] sm:$0xff]  }
 0xad5   :  { %6656 = vmatpush3.bf16.msra.mxu1 %v7334_v27  ;;  %6678 = vmatpush3.bf16.msra.mxu0 %v7335_v28  ;;  %v7368_v27 = vld [vmem:[%s9562_s12 + $0x270] sm:$0xff]   ;;  %v1561_v58 = vmax.bf16 %v7679_v31, %v1545_v38  ;;  %v1563_v59 = vmax.bf16 %v7679_v31, %v1547_v4  ;;  %v7389_v38 = vld [vmem:[%s9562_s12 + $0x3d8] sm:$0xff]  }
 0xad6   :  { %6657 = vmatprep.subr.bf16.mxu1 %v7336_v34  ;;  %6679 = vmatprep.subr.bf16.mxu0 %v7337_v35  ;;  %v7369_v28 = vld [vmem:[%s9562_s12 + $0x2f0] sm:$0xff]   ;;  %v7390_v4 = vld [vmem:[%s9562_s12 + $0x318] sm:$0xff]  }
 0xad7   :  { %v7370_v34 = vld [vmem:[%s9562_s12 + $0x230] sm:$0xff]  }
 0xad8   :  { %v7371_v35 = vld [vmem:[%s9562_s12 + $0x2b0] sm:$0xff]  }
 0xad9   :  { %6658 = vmatpush3.bf16.msra.mxu1 %v7338_v40  ;;  %6680 = vmatpush3.bf16.msra.mxu0 %v7339_v8  ;;  %v7372_v40 = vld [vmem:[%s9562_s12 + $0x278] sm:$0xff]   ;;  %v7387_v32 = vld [vmem:[%s9562_s12 + $0x390] sm:$0xff]  }
 0xada   :  { %6659 = vmatprep.subr.bf16.mxu1 %v7340_v16  ;;  %6681 = vmatprep.subr.bf16.mxu0 %v7341_v21  ;;  %v7373_v8 = vld [vmem:[%s9562_s12 + $0x2f8] sm:$0xff]  }
 0xadb   :  { %v7374_v16 = vld [vmem:[%s9562_s12 + $0x238] sm:$0xff]  }
 0xadc   :  { %v7375_v21 = vld [vmem:[%s9562_s12 + $0x2b8] sm:$0xff]  }
 0xadd   :  { %6660 = vmatpush3.bf16.msra.mxu1 %v7342_v22  ;;  %6682 = vmatpush3.bf16.msra.mxu0 %v7343_v44  ;;  %v7376_v22 = vld [vmem:[%s9562_s12 + $0x340] sm:$0xff]  }
 0xade   :  { %6689 = vmatprep.subr.bf16.mxu1 %v7344_v45  ;;  %6711 = vmatprep.subr.bf16.mxu0 %v7345_v49  ;;  %v7377_v44 = vld [vmem:[%s9562_s12 + $0x3c0] sm:$0xff]   ;;  %v1556_v49 = vmax.bf16 %v7679_v31, %v1540_v63  ;;  %v7383_v63 = vld [vmem:[%s9562_s12 + $0x388] sm:$0xff]  }
 0xadf   :  { %v7378_v45 = vld [vmem:[%s9562_s12 + $0x300] sm:$0xff]  }
 0xae0   :  { %2710 = vmatmul.mubr.bf16.vlgmr.msra.gmra.mrb[40].mxu1 %v1552_v53  ;;  %2751 = vmatmul.mubr.bf16.vlgmr.msra.gmra.mrb[40].mxu0 %v1554_v54  ;;  %v1558_v53 = vmax.bf16 %v7679_v31, %v1542_v2  ;;  %v7380_v54 = vld [vmem:[%s9562_s12 + $0x348] sm:$0xff]   ;;  %v7384_v2 = vld [vmem:[%s9562_s12 + $0x350] sm:$0xff]  }
 0xae1   :  { %6690 = vmatpush3.bf16.msra.mxu1 %v7346_v51  ;;  %2791 = vmatprep.mubr.bf16.mxu1 %v1557_v56  ;;  %v7379_v51 = vld [vmem:[%s9562_s12 + $0x380] sm:$0xff]  }
 0xae2   :  { %6712 = vmatpush3.bf16.msra.mxu0 %v7347_v55  ;;  %2832 = vmatprep.mubr.bf16.mxu0 %v1559_v37  ;;  %v7391_v55 = vld [vmem:[%s9562_s12 + $0x398] sm:$0xff]   ;;  %v7392_v56 = vld [vmem:[%s9562_s12 + $0x360] sm:$0xff]  }
 0xae3   :  { %6691 = vmatprep.subr.bf16.mxu1 %v7348_v57  ;;  %6713 = vmatprep.subr.bf16.mxu0 %v7349_v36  ;;  %v7393_v57 = vld [vmem:[%s9562_s12 + $0x3e0] sm:$0xff]  }
 0xae4   :  { %v7394_v36 = vld [vmem:[%s9562_s12 + $0x320] sm:$0xff]  }
 0xae5   :  { %6692 = vmatpush3.bf16.msra.mxu1 %v7350_v3  ;;  %v7395_v37 = vld [vmem:[%s9562_s12 + $0x3a0] sm:$0xff]   ;;  %v7396_v3 = vld [vmem:[%s9562_s12 + $0x368] sm:$0xff]  }
 0xae6   :  { %6714 = vmatpush3.bf16.msra.mxu0 %v7351_v39  ;;  %6693 = vmatprep.subr.bf16.mxu1 %v7352_v10  ;;  %v7397_v39 = vld [vmem:[%s9562_s12 + $0x3e8] sm:$0xff]  }
 0xae7   :  { %6715 = vmatprep.subr.bf16.mxu0 %v7353_v15  ;;  %v7398_v10 = vld [vmem:[%s9562_s12 + $0x328] sm:$0xff]  }
 0xae8   :  { %v7399_v15 = vld [vmem:[%s9562_s12 + $0x3a8] sm:$0xff]  }
 0xae9   :  { %6694 = vmatpush3.bf16.msra.mxu1 %v7354_v60  ;;  %v7400_v60 = vld [vmem:[%s9562_s12 + $0x370] sm:$0xff]  }
 0xaea   :  { %6716 = vmatpush3.bf16.msra.mxu0 %v7355_v61  ;;  %6695 = vmatprep.subr.bf16.mxu1 %v7356_v41  ;;  %v7401_v61 = vld [vmem:[%s9562_s12 + $0x3f0] sm:$0xff]  }
 0xaeb   :  { %6717 = vmatprep.subr.bf16.mxu0 %v7357_v42  ;;  %v7402_v41 = vld [vmem:[%s9562_s12 + $0x330] sm:$0xff]  }
 0xaec   :  { %v7403_v42 = vld [vmem:[%s9562_s12 + $0x3b0] sm:$0xff]  }
 0xaed   :  { %6696 = vmatpush3.bf16.msra.mxu1 %v7358_v5  ;;  %v7404_v5 = vld [vmem:[%s9562_s12 + $0x378] sm:$0xff]  }
 0xaee   :  { %6718 = vmatpush3.bf16.msra.mxu0 %v7359_v6  ;;  %6697 = vmatprep.subr.bf16.mxu1 %v7360_v7  ;;  %v7405_v6 = vld [vmem:[%s9562_s12 + $0x3f8] sm:$0xff]  }
 0xaef   :  { %6719 = vmatprep.subr.bf16.mxu0 %v7361_v9  ;;  %v7406_v7 = vld [vmem:[%s9562_s12 + $0x338] sm:$0xff]  }
 0xaf0   :  { %v7407_v9 = vld [vmem:[%s9562_s12 + $0x3b8] sm:$0xff]  }
 0xaf1   :  { %6698 = vmatpush3.bf16.msra.mxu1 %v7362_v11  ;;  %v1560_v11 = vmax.bf16 %v7679_v31, %v1544_v29  ;;  %v5914_v29 = vld [vmem:[%s9563_s13] ss:$0 sm:$0xff] }
 0xaf2   :  { %6720 = vmatpush3.bf16.msra.mxu0 %v7363_v12  ;;  %6699 = vmatprep.subr.bf16.mxu1 %v7364_v13  ;;  %v1562_v12 = vmax.bf16 %v7679_v31, %v1546_v30  ;;  %v7623_v13 = vld [vmem:[%s9568_s18] sm:$0xff] }
 0xaf3   :  { %6721 = vmatprep.subr.bf16.mxu0 %v7365_v14 }
 0xaf5   :  { %6700 = vmatpush3.bf16.msra.mxu1 %v7366_v18 }
 0xaf6   :  { %6722 = vmatpush3.bf16.msra.mxu0 %v7367_v19  ;;  %6701 = vmatprep.subr.bf16.mxu1 %v7368_v27 }
 0xaf7   :  { %6723 = vmatprep.subr.bf16.mxu0 %v7369_v28 }
 0xaf9   :  { %6702 = vmatpush3.bf16.msra.mxu1 %v7370_v34 }
 0xafa   :  { %6724 = vmatpush3.bf16.msra.mxu0 %v7371_v35  ;;  %6703 = vmatprep.subr.bf16.mxu1 %v7372_v40 }
 0xafb   :  { %6725 = vmatprep.subr.bf16.mxu0 %v7373_v8 }
 0xafd   :  { %6704 = vmatpush3.bf16.msra.mxu1 %v7374_v16 }
 0xafe   :  { %6726 = vmatpush3.bf16.msra.mxu0 %v7375_v21  ;;  %6733 = vmatprep.subr.bf16.mxu1 %v7376_v22 }
 0xaff   :  { %6755 = vmatprep.subr.bf16.mxu0 %v7377_v44 }
 0xb00   :  { %2792 = vmatmul.mubr.bf16.vlgmr.msra.gmra.mrb[44].mxu1 %v1556_v49 }
 0xb01   :  { %2833 = vmatmul.mubr.bf16.vlgmr.msra.gmra.mrb[44].mxu0 %v1558_v53  ;;  %6734 = vmatpush3.bf16.msra.mxu1 %v7378_v45 }
 0xb02   :  { %2873 = vmatprep.mubr.bf16.mxu1 %v1561_v58  ;;  %6756 = vmatpush3.bf16.msra.mxu0 %v7379_v51 }
 0xb03   :  { %2914 = vmatprep.mubr.bf16.mxu0 %v1563_v59  ;;  %6735 = vmatprep.subr.bf16.mxu1 %v7380_v54 }
 0xb04   :  { %6757 = vmatprep.subr.bf16.mxu0 %v7381_v62 }
 0xb05   :  { %6736 = vmatpush3.bf16.msra.mxu1 %v7382_v52 }
 0xb06   :  { %6758 = vmatpush3.bf16.msra.mxu0 %v7383_v63  ;;  %6737 = vmatprep.subr.bf16.mxu1 %v7384_v2 }
 0xb07   :  { %6759 = vmatprep.subr.bf16.mxu0 %v7385_v17 }
 0xb09   :  { %6738 = vmatpush3.bf16.msra.mxu1 %v7386_v24 }
 0xb0a   :  { %6760 = vmatpush3.bf16.msra.mxu0 %v7387_v32  ;;  %6739 = vmatprep.subr.bf16.mxu1 %v7388_v33 }
 0xb0b   :  { %6761 = vmatprep.subr.bf16.mxu0 %v7389_v38 }
 0xb0d   :  { %6740 = vmatpush3.bf16.msra.mxu1 %v7390_v4 }
 0xb0e   :  { %6762 = vmatpush3.bf16.msra.mxu0 %v7391_v55  ;;  %6741 = vmatprep.subr.bf16.mxu1 %v7392_v56 }
 0xb0f   :  { %6763 = vmatprep.subr.bf16.mxu0 %v7393_v57 }
 0xb11   :  { %6742 = vmatpush3.bf16.msra.mxu1 %v7394_v36 }
 0xb12   :  { %6764 = vmatpush3.bf16.msra.mxu0 %v7395_v37  ;;  %6743 = vmatprep.subr.bf16.mxu1 %v7396_v3 }
 0xb13   :  { %6765 = vmatprep.subr.bf16.mxu0 %v7397_v39 }
 0xb15   :  { %6744 = vmatpush3.bf16.msra.mxu1 %v7398_v10 }
 0xb16   :  { %6766 = vmatpush3.bf16.msra.mxu0 %v7399_v15  ;;  %6745 = vmatprep.subr.bf16.mxu1 %v7400_v60 }
 0xb17   :  { %6767 = vmatprep.subr.bf16.mxu0 %v7401_v61 }
 0xb19   :  { %6746 = vmatpush3.bf16.msra.mxu1 %v7402_v41 }
 0xb1a   :  { %6768 = vmatpush3.bf16.msra.mxu0 %v7403_v42  ;;  %6747 = vmatprep.subr.bf16.mxu1 %v7404_v5 }
 0xb1b   :  { %6769 = vmatprep.subr.bf16.mxu0 %v7405_v6 }
 0xb1d   :  { %6748 = vmatpush3.bf16.msra.mxu1 %v7406_v7 }
 0xb1e   :  { %6770 = vmatpush3.bf16.msra.mxu0 %v7407_v9  ;;  %7087 = vmatprep.subr.bf16.mxu1 %v7673_v0 }
 0xb20   :  { %2874 = vmatmul.mubr.bf16.vlgmr.msra.gmra.mrb[48].mxu1 %v1560_v11 }
 0xb21   :  { %2915 = vmatmul.mubr.bf16.vlgmr.msra.gmra.mrb[48].mxu0 %v1562_v12  ;;  %7089 = vmatprep.mubr.msk.bf16.mxu1 %vm7675_vm2, %v7673_v0 }
 0xb22   :  { %7097 = vmatprep.mubr.msk.f32.mxu0 %vm154_vm4, %v7623_v13 }
 0xb93   :  { %v6617_v20 = vpop.f32.mrb[36].mxu1  ;;  %v6639_v25 = vpop.f32.mrb[36].mxu0 }
 0xb94   :  { %v6618_v23 = vpop.f32.mrb[37].mxu1  ;;  %v6640_v26 = vpop.f32.mrb[37].mxu0 }
 0xb95   :  { %v6619_v30 = vadd.f32 %v6618_v23, %v6617_v20  ;;  %v6641_v14 = vadd.f32 %v6640_v26, %v6639_v25  ;;  %v6620_v18 = vpop.f32.mrb[38].mxu1  ;;  %v6642_v19 = vpop.f32.mrb[38].mxu0 }
 0xb96   :  { %v6621_v27 = vpop.f32.mrb[39].mxu1  ;;  %v6643_v28 = vpop.f32.mrb[39].mxu0 }
 0xb97   :  { %v2630_v34 = vadd.f32 %v6619_v30, %v5914_v29  ;;  %v6622_v35 = vadd.f32 %v6621_v27, %v6620_v18  ;;  %v6644_v40 = vadd.f32 %v6643_v28, %v6642_v19 }
 0xb99   :  { %v2671_v8 = vadd.f32 %v6641_v14, %v2630_v34  ;;  %v2633_v16 = vadd.f32 %v6622_v35, %v5914_v29 }
 0xb9b   :  { %v2674_v21 = vadd.f32 %v6644_v40, %v2633_v16 }
 0xbb3   :  { %v6661_v22 = vpop.f32.mrb[40].mxu1  ;;  %v6683_v44 = vpop.f32.mrb[40].mxu0 }
 0xbb4   :  { %v6662_v45 = vpop.f32.mrb[41].mxu1  ;;  %v6684_v49 = vpop.f32.mrb[41].mxu0 }
 0xbb5   :  { %v6663_v51 = vadd.f32 %v6662_v45, %v6661_v22  ;;  %v6685_v53 = vadd.f32 %v6684_v49, %v6683_v44  ;;  %v6664_v54 = vpop.f32.mrb[42].mxu1  ;;  %v6686_v58 = vpop.f32.mrb[42].mxu0 }
 0xbb6   :  { %v6665_v62 = vpop.f32.mrb[43].mxu1  ;;  %v6687_v59 = vpop.f32.mrb[43].mxu0 }
 0xbb7   :  { %v2712_v52 = vadd.f32 %v6663_v51, %v2671_v8  ;;  %v6666_v63 = vadd.f32 %v6665_v62, %v6664_v54  ;;  %v6688_v2 = vadd.f32 %v6687_v59, %v6686_v58 }
 0xbb9   :  { %v2753_v17 = vadd.f32 %v6685_v53, %v2712_v52  ;;  %v2715_v24 = vadd.f32 %v6666_v63, %v2674_v21 }
 0xbbb   :  { %v2756_v32 = vadd.f32 %v6688_v2, %v2715_v24 }
 0xbd3   :  { %v6705_v33 = vpop.f32.mrb[44].mxu1 }
 0xbd4   :  { %v6727_v38 = vpop.f32.mrb[44].mxu0  ;;  %v6706_v4 = vpop.f32.mrb[45].mxu1 }
 0xbd5   :  { %v6707_v55 = vadd.f32 %v6706_v4, %v6705_v33  ;;  %v6728_v56 = vpop.f32.mrb[45].mxu0  ;;  %v6708_v57 = vpop.f32.mrb[46].mxu1 }
 0xbd6   :  { %v6729_v36 = vadd.f32 %v6728_v56, %v6727_v38  ;;  %v6730_v37 = vpop.f32.mrb[46].mxu0  ;;  %v6709_v3 = vpop.f32.mrb[47].mxu1  ;;  %v6044_v38 = vld [vmem:[%s9565_s15] ss:$0 sm:$0xff] }
 0xbd7   :  { %v2794_v39 = vadd.f32 %v6707_v55, %v2753_v17  ;;  %v6710_v10 = vadd.f32 %v6709_v3, %v6708_v57  ;;  %v6731_v15 = vpop.f32.mrb[47].mxu0  ;;  %v6043_v17 = vld [vmem:[%s9564_s14] ss:$0 sm:$0xff] }
 0xbd8   :  { %v6732_v60 = vadd.f32 %v6731_v15, %v6730_v37 }
 0xbd9   :  { %v2835_v61 = vadd.f32 %v6729_v36, %v2794_v39  ;;  %v2797_v41 = vadd.f32 %v6710_v10, %v2756_v32  ;;  %v6048_v36 = vld [vmem:[%s9596_s0 + $0x1] ss:$0 sm:$0xff] }
 0xbdb   :  { %v2838_v42 = vadd.f32 %v6732_v60, %v2797_v41 }
 0xbf3   :  { %v6749_v5 = vpop.f32.mrb[48].mxu1 }
 0xbf4   :  { %v6771_v6 = vpop.f32.mrb[48].mxu0  ;;  %v6750_v7 = vpop.f32.mrb[49].mxu1 }
 0xbf5   :  { %v6751_v9 = vadd.f32 %v6750_v7, %v6749_v5  ;;  %v6772_v11 = vpop.f32.mrb[49].mxu0  ;;  %v6752_v12 = vpop.f32.mrb[50].mxu1  ;;  %v7625_v5 = vld [vmem:[%s9568_s18 + $0x10] sm:$0xff]  ;;  %v7627_v7 = vld [vmem:[%s9568_s18 + $0x20] sm:$0xff] }
 0xbf6   :  { %v6773_v13 = vadd.f32 %v6772_v11, %v6771_v6  ;;  %v6774_v20 = vpop.f32.mrb[50].mxu0  ;;  %v6753_v25 = vpop.f32.mrb[51].mxu1  ;;  %v7626_v6 = vld [vmem:[%s9568_s18 + $0x18] sm:$0xff]  ;;  %v7629_v11 = vld [vmem:[%s9568_s18 + $0x30] sm:$0xff] }
 0xbf7   :  { %v2876_v29 = vadd.f32 %v6751_v9, %v2835_v61  ;;  %v6754_v23 = vadd.f32 %v6753_v25, %v6752_v12  ;;  %v6775_v26 = vpop.f32.mrb[51].mxu0  ;;  %v7628_v9 = vld [vmem:[%s9568_s18 + $0x28] sm:$0xff]  ;;  %v7630_v12 = vld [vmem:[%s9568_s18 + $0x38] sm:$0xff] }
 0xbf8   :  { %v6776_v30 = vadd.f32 %v6775_v26, %v6774_v20 }
 0xbf9   :  { %v2917_v14 = vadd.f32 %v6773_v13, %v2876_v29  ;;  %v2879_v18 = vadd.f32 %v6754_v23, %v2838_v42  ;;  %v7624_v42 = vld [vmem:[%s9568_s18 + $0x8] sm:$0xff] }
 0xbfb   :  { %v2920_v19 = vadd.f32 %v6776_v30, %v2879_v18  ;;  %v2923_v27 = vadd.f32 %v2917_v14, %v8094_v46  ;;  %v8747_v30 = vld [vmem:[%s9570_s20] sm:$0xff]  ;;  %v8753_v18 = vld [vmem:[%s9570_s20 + $0x8] sm:$0xff] }
 0xbfd   :  { %v2927_v28 = vsel %vm154_vm4, %v2923_v27, 0.0  ;;  %v2924_v34 = vadd.f32 %v2920_v19, %v8101_v50  ;;  %v7408_v50 = vld [vmem:[%s9593_s25 + $0x8] sm:$0xff]  }
 0xbfe   :  { %2928 = vadd.xlane.f32.xlu1 %v2927_v28  ;;  %7088 = vmatpush3.bf16.msra.mxu1 %v7408_v50 }
 0xbff   :  { %v2930_v35 = vsel %vm154_vm4, %v2924_v34, 0.0 }
 0xc00   :  { %2931 = vadd.xlane.f32.xlu0 %v2930_v35  ;;  %v8767_v35 = vld [vmem:[%s9570_s20 + $0x10] sm:$0xff] }
 0xc8b   :  { %v2929_v40 = vpop.xlane.xlu1 %2928 }
 0xc8c   :  { %v2933_v8 = vmul.f32 0.0625, %v2929_v40 }
 0xc8d   :  { %v2932_v16 = vpop.xlane.xlu0 %2931 }
 0xc8e   :  { %v2935_v21 = vsub.f32 %v2923_v27, %v2933_v8  ;;  %v2934_v22 = vmul.f32 0.0625, %v2932_v16  ;;  %v8774_v16 = vld [vmem:[%s9570_s20 + $0x28] sm:$0xff] }
 0xc90   :  { %v2936_v44 = vsub.f32 %v2924_v34, %v2934_v22  ;;  %v2937_v45 = vmul.f32 %v2935_v21, %v2935_v21 }
 0xc92   :  { %v2939_v49 = vsel %vm154_vm4, %v2937_v45, 0.0  ;;  %v2938_v51 = vmul.f32 %v2936_v44, %v2936_v44 }
 0xc93   :  { %2940 = vadd.xlane.f32.xlu1 %v2939_v49 }
 0xc94   :  { %v2942_v46 = vsel %vm154_vm4, %v2938_v51, 0.0  ;;  %v8789_v51 = vld [vmem:[%s9570_s20 + $0x38] sm:$0xff] }
 0xc97   :  { %2943 = vadd.xlane.f32.xlu1 %v2942_v46 }
 0xd20   :  { %v2941_v53 = vpop.xlane.xlu1 %2940 }
 0xd21   :  { %v2945_v54 = vmul.f32 0.0625, %v2941_v53  ;;  %v8795_v53 = vld [vmem:[%s9570_s20 + $0x30] sm:$0xff] }
 0xd23   :  { %v2947_v58 = vadd.f32 1e-05, %v2945_v54 }
 0xd24   :  { %v2944_v62 = vpop.xlane.xlu1 %2943 }
 0xd25   :  { %7579 = vrsqrt.f32 %v2947_v58  ;;  %v2946_v59 = vmul.f32 0.0625, %v2944_v62  ;;  %v7639_v58 = vld [vmem:[%s9569_s19] sm:$0xff] }
 0xd27   :  { %v2948_v52 = vadd.f32 1e-05, %v2946_v59  ;;  %v7640_v59 = vld [vmem:[%s9571_s21 + $0x8] sm:$0xff] }
 0xd29   :  { %7581 = vrsqrt.f32 %v2948_v52 }
 0xd2f   :  { %v7580_v63 = vpop.eup %7579 }
 0xd30   :  { %v2951_v2 = vmul.f32 %v7580_v63, %v2935_v21 }
 0xd32   :  { %v2959_v32 = vmul.f32 %v6043_v17, %v2951_v2  ;;  %v7641_v2 = vld [vmem:[%s9571_s21] sm:$0xff] }
 0xd33   :  { %v7582_v24 = vpop.eup %7581 }
 0xd34   :  { %v2952_v33 = vmul.f32 %v7582_v24, %v2936_v44  ;;  %v8698_v55 = vadd.f32 %v6044_v38, %v2959_v32  ;;  %v8781_v44 = vld [vmem:[%s9570_s20 + $0x20] sm:$0xff] }
 0xd36   :  { %v2960_v4 = vmul.f32 %v6043_v17, %v2952_v33  ;;  %v7642_v33 = vld [vmem:[%s9571_s21 + $0x18] sm:$0xff] }
 0xd38   :  { %v8700_v56 = vadd.f32 %v6044_v38, %v2960_v4 }
 0xd3a   :  { %v2969_v57 = vpack.c.bf16 %v8700_v56, %v8698_v55 }
 0xd3c   :  { %7090 = vmatmul.mubr.msk.bf16.vlgmr.msra.gmra.mrb[52].mxu1 %vm154_vm4, %v2969_v57  ;;  %v7643_v57 = vld [vmem:[%s9571_s21 + $0x10] sm:$0xff] }
 0xe0f   :  { %v3024_v37 = vpop.f32.mrb[52].mxu1 }
 0xe10   :  { %v7091_v3 = vpop.f32.mrb[53].mxu1  ;;  %v3025_v10 = vadd.f32 %v6048_v36, %v3024_v37 }
 0xe11   :  { %v3027_v39 = vpop.f32.mrb[54].mxu1 }
 0xe12   :  { %v3028_v15 = vadd.f32 %v6048_v36, %v3027_v39  ;;  %v7092_v60 = vpop.f32.mrb[55].mxu1 }
 0xe14   :  { %v8708_v61 = vpack.i.bf16 %v3028_v15, %v3025_v10  ;;  %v7209_v41 = vpack.c.bf16 %v3028_v15, %v3025_v10  ;;  %v7644_v15 = vld [vmem:[%s9571_s21 + $0x28] sm:$0xff] }
 0xe16   :  { %7267 = vrot.lane.b32.xlu1 %v8708_v61, %s9601_s8  ;;  %7210 = vmatprep.subr.bf16.mxu0 %v7209_v41 }
 0xe17   :  { %7212 = vmatpush3.bf16.msra.mxu0 %v7209_v41 }
 0xe1a   :  { %7098 = vmatmul.mubr.msk.f32.vlgmr.msra.gmra.mrb[52].mxu0 %vm154_vm4, %v7624_v42 }
 0xe1b   :  { %7100 = vmatprep.mubr.msk.f32.mxu0 %vm154_vm4, %v7625_v5 }
 0xe1e   :  { %7101 = vmatmul.mubr.msk.f32.gmra.mrb[54].mxu0 %vm154_vm4, %v7626_v6  ;;  %v7645_v6 = vld [vmem:[%s9571_s21 + $0x20] sm:$0xff] }
 0xe1f   :  { %7103 = vmatprep.mubr.msk.f32.mxu0 %vm154_vm4, %v7627_v7 }
 0xe22   :  { %7104 = vmatmul.mubr.msk.f32.gmra.mrb[56].mxu0 %vm154_vm4, %v7628_v9 }
 0xe23   :  { %7106 = vmatprep.mubr.msk.f32.mxu0 %vm154_vm4, %v7629_v11  ;;  %v7646_v11 = vld [vmem:[%s9571_s21 + $0x30] sm:$0xff] }
 0xe26   :  { %7107 = vmatmul.mubr.msk.f32.gmra.mrb[58].mxu0 %vm154_vm4, %v7630_v12 }
 0xe88   :  { %v7268_v13 = vpop.permute.xlu1 %7267 }
 0xe89   :  { %v7270_v20 = vunpack.i.h.bf16 %v7268_v13  ;;  %v7269_v25 = vunpack.i.l.bf16 %v7268_v13 }
 0xe8b   :  { %v7213_v29 = vpack.c.bf16 %v7270_v20, %v7269_v25  ;;  %v7647_v20 = vld [vmem:[%s9571_s21 + $0x38] sm:$0xff]  ;;  %s9602_s21 = smov 96  }
 0xe8d   :  { %7215 = vmatprep.subr.msk.bf16.mxu1 %vm7883_vm5, %v7213_v29 }
 0xe8e   :  { %7218 = vmatpush3.bf16.xpose.msk.msra.mxu1 %vm7883_vm5, %v7213_v29 }
 0xeed   :  { %v7099_v23 = vpop.f32.mrb[52].mxu0 }
 0xeee   :  { %v3097_v26 = vpop.f32.mrb[53].mxu0  ;;  %v3137_v19 = vmul.f32 %v8753_v18, %v7099_v23 }
 0xeef   :  { %v3136_v14 = vmul.f32 %v8747_v30, %v3097_v26 }
 0xef1   :  { %v7102_v27 = vpop.f32.mrb[54].mxu0  ;;  %7113 = vmatprep.mubr.msk.f32.mxu1 %vm154_vm4, %v3136_v14 }
 0xef2   :  { %v3139_v28 = vmul.f32 %v8760_v1, %v7102_v27  ;;  %v3107_v34 = vpop.f32.mrb[55].mxu0  ;;  %7114 = vmatmul.mubr.msk.f32.vlgmr.msra.gmra.mrb[14].mxu1 %vm154_vm4, %v3137_v19 }
 0xef3   :  { %v3138_v40 = vmul.f32 %v8767_v35, %v3107_v34 }
 0xef5   :  { %7116 = vmatprep.mubr.msk.f32.mxu1 %vm154_vm4, %v3138_v40  ;;  %v7105_v8 = vpop.f32.mrb[56].mxu0 }
 0xef6   :  { %v3141_v21 = vmul.f32 %v8774_v16, %v7105_v8  ;;  %7117 = vmatmul.mubr.msk.f32.gmra.mrb[56].mxu1 %vm154_vm4, %v3139_v28  ;;  %v3117_v22 = vpop.f32.mrb[57].mxu0 }
 0xef7   :  { %v3140_v45 = vmul.f32 %v8781_v44, %v3117_v22 }
 0xef9   :  { %7119 = vmatprep.mubr.msk.f32.mxu1 %vm154_vm4, %v3140_v45  ;;  %v7108_v49 = vpop.f32.mrb[58].mxu0 }
 0xefa   :  { %7120 = vmatmul.mubr.msk.f32.gmra.mrb[58].mxu1 %vm154_vm4, %v3141_v21  ;;  %v3143_v46 = vmul.f32 %v8789_v51, %v7108_v49  ;;  %v3127_v50 = vpop.f32.mrb[59].mxu0 }
 0xefb   :  { %v3142_v54 = vmul.f32 %v8795_v53, %v3127_v50 }
 0xefd   :  { %7122 = vmatprep.mubr.msk.f32.mxu1 %vm154_vm4, %v3142_v54 }
 0xefe   :  { %7123 = vmatmul.mubr.msk.f32.gmra.mrb[60].mxu1 %vm154_vm4, %v3143_v46 }
 0xeff   :  { %7157 = vmatprep.mubr.msk.f32.mxu1 %vm793_vm6, %v7639_v58 }
 0xfc5   :  { %v7115_v62 = vpop.f32.mrb[14].mxu1 }
 0xfc6   :  { %v3250_v52 = vadd.f32 %v7640_v59, %v7115_v62  ;;  %v3244_v63 = vpop.f32.mrb[15].mxu1 }
 0xfc7   :  { %v3245_v17 = vadd.f32 %v7641_v2, %v3244_v63 }
 0xfc8   :  { %v3286_v24 = vsel %vm154_vm4, %v3250_v52, -inf }
 0xfc9   :  { %3287 = vmax.xlane.f32.xlu0 %v3286_v24  ;;  %v7118_v32 = vpop.f32.mrb[56].mxu1  ;;  %v3283_v3 = vsel %vm154_vm4, %v3245_v17, -inf }
 0xfca   :  { %v3260_v38 = vadd.f32 %v7642_v33, %v7118_v32  ;;  %v3254_v4 = vpop.f32.mrb[57].mxu1 }
 0xfcb   :  { %v3255_v36 = vadd.f32 %v7643_v57, %v3254_v4 }
 0xfcc   :  { %v3292_v37 = vsel %vm154_vm4, %v3260_v38, -inf }
 0xfcd   :  { %3293 = vmax.xlane.f32.xlu1 %v3292_v37  ;;  %3284 = vmax.xlane.f32.xlu0 %v3283_v3  ;;  %v7121_v39 = vpop.f32.mrb[58].mxu1  ;;  %v3289_v41 = vsel %vm154_vm4, %v3255_v36, -inf }
 0xfce   :  { %v3264_v10 = vpop.f32.mrb[59].mxu1  ;;  %v3270_v60 = vadd.f32 %v7644_v15, %v7121_v39 }
 0xfcf   :  { %v3265_v7 = vadd.f32 %v7645_v6, %v3264_v10 }
 0xfd0   :  { %v3298_v9 = vsel %vm154_vm4, %v3270_v60, -inf }
 0xfd1   :  { %3290 = vmax.xlane.f32.xlu0 %v3289_v41  ;;  %v7124_v42 = vpop.f32.mrb[60].mxu1  ;;  %v3295_v13 = vsel %vm154_vm4, %v3265_v7, -inf }
 0xfd2   :  { %v3274_v5 = vpop.f32.mrb[61].mxu1  ;;  %v3280_v25 = vadd.f32 %v7647_v20, %v7124_v42 }
 0xfd3   :  { %v3275_v12 = vadd.f32 %v7646_v11, %v3274_v5 }
 0xfd4   :  { %v3304_v23 = vsel %vm154_vm4, %v3280_v25, -inf }
 0xfd5   :  { %3299 = vmax.xlane.f32.xlu0 %v3298_v9  ;;  %v3301_v29 = vsel %vm154_vm4, %v3275_v12, -inf }
 0xfd9   :  { %3296 = vmax.xlane.f32.xlu0 %v3295_v13 }
 0xfdd   :  { %3302 = vmax.xlane.f32.xlu0 %v3301_v29 }
 0xfe1   :  { %3305 = vmax.xlane.f32.xlu0 %v3304_v23 }
0x1056   :  { %v3288_v26 = vpop.xlane.xlu0 %3287 }
0x1057   :  { %v3308_v14 = vsub.f32 %v3250_v52, %v3288_v26 }
0x1059   :  { %v3317_v19 = vmul.f32 1.442695, %v3308_v14 }
0x105a   :  { %v3294_v27 = vpop.xlane.xlu1 %3293  ;;  %v3285_v28 = vpop.xlane.xlu0 %3284 }
0x105b   :  { %7583 = vpow2.f32 %v3317_v19  ;;  %v3310_v34 = vsub.f32 %v3260_v38, %v3294_v27  ;;  %v3307_v40 = vsub.f32 %v3245_v17, %v3285_v28 }
0x105d   :  { %v3315_v8 = vmul.f32 1.442695, %v3307_v40  ;;  %v3321_v21 = vmul.f32 1.442695, %v3310_v34 }
0x105e   :  { %v3291_v22 = vpop.xlane.xlu0 %3290 }
0x105f   :  { %v3309_v45 = vsub.f32 %v3255_v36, %v3291_v22  ;;  %7585 = vpow2.f32 %v3315_v8 }
0x1060   :  { %7587 = vpow2.f32 %v3321_v21 }
0x1061   :  { %v3319_v49 = vmul.f32 1.442695, %v3309_v45 }
0x1062   :  { %v3300_v46 = vpop.xlane.xlu0 %3299 }
0x1063   :  { %v3312_v50 = vsub.f32 %v3270_v60, %v3300_v46  ;;  %7589 = vpow2.f32 %v3319_v49 }
0x1065   :  { %v8836_v54 = vpop.eup %7583  ;;  %v3325_v58 = vmul.f32 1.442695, %v3312_v50 }
0x1066   :  { %v3297_v62 = vpop.xlane.xlu0 %3296  ;;  %v3334_v59 = vsel %vm154_vm4, %v8836_v54, 0.0 }
0x1067   :  { %7591 = vpow2.f32 %v3325_v58  ;;  %v3311_v52 = vsub.f32 %v3265_v7, %v3297_v62  ;;  %3335 = vadd.xlane.f32.xlu0 %v3334_v59 }
0x1069   :  { %v3323_v63 = vmul.f32 1.442695, %v3311_v52  ;;  %v7586_v2 = vpop.eup %7585 }
0x106a   :  { %v3303_v17 = vpop.xlane.xlu0 %3302  ;;  %v3331_v32 = vsel %vm154_vm4, %v7586_v2, 0.0  ;;  %v7588_v33 = vpop.eup %7587 }
0x106b   :  { %7593 = vpow2.f32 %v3323_v63  ;;  %v3313_v24 = vsub.f32 %v3275_v12, %v3303_v17  ;;  %3332 = vadd.xlane.f32.xlu0 %v3331_v32  ;;  %v3340_v36 = vsel %vm154_vm4, %v7588_v33, 0.0 }
0x106d   :  { %v3327_v38 = vmul.f32 1.442695, %v3313_v24  ;;  %v7590_v37 = vpop.eup %7589 }
0x106e   :  { %v3306_v4 = vpop.xlane.xlu0 %3305  ;;  %v3337_v15 = vsel %vm154_vm4, %v7590_v37, 0.0 }
0x106f   :  { %7595 = vpow2.f32 %v3327_v38  ;;  %v3314_v57 = vsub.f32 %v3280_v25, %v3306_v4  ;;  %3341 = vadd.xlane.f32.xlu0 %v3340_v36 }
0x1071   :  { %v7592_v3 = vpop.eup %7591  ;;  %v3329_v39 = vmul.f32 1.442695, %v3314_v57 }
0x1072   :  { %v3346_v10 = vsel %vm154_vm4, %v7592_v3, 0.0 }
0x1073   :  { %7597 = vpow2.f32 %v3329_v39  ;;  %3347 = vadd.xlane.f32.xlu1 %v3346_v10  ;;  %3338 = vadd.xlane.f32.xlu0 %v3337_v15 }
0x1075   :  { %v7594_v60 = vpop.eup %7593 }
0x1076   :  { %v3343_v41 = vsel %vm154_vm4, %v7594_v60, 0.0 }
0x1077   :  { %3344 = vadd.xlane.f32.xlu0 %v3343_v41 }
0x1079   :  { %v7596_v42 = vpop.eup %7595 }
0x107a   :  { %v3349_v5 = vsel %vm154_vm4, %v7596_v42, 0.0 }
0x107b   :  { %3350 = vadd.xlane.f32.xlu0 %v3349_v5 }
0x107d   :  { %v7598_v6 = vpop.eup %7597 }
0x107e   :  { %v3352_v7 = vsel %vm154_vm4, %v7598_v6, 0.0 }
0x107f   :  { %3353 = vadd.xlane.f32.xlu1 %v3352_v7 }
0x1091   :  { %7272 = vrot.lane.b32.xlu0 %v8708_v61, %s9602_s21 }
0x10f4   :  { %v3336_v9 = vpop.xlane.xlu0 %3335 }
0x10f8   :  { %v3333_v11 = vpop.xlane.xlu0 %3332 }
0x10f9   :  { %7599 = vrcp.f32 %v3333_v11 }
0x10fa   :  { %7601 = vrcp.f32 %v3336_v9 }
0x10fc   :  { %v3342_v12 = vpop.xlane.xlu0 %3341 }
0x1100   :  { %v3339_v13 = vpop.xlane.xlu0 %3338  ;;  %v3348_v26 = vpop.xlane.xlu1 %3347 }
0x1101   :  { %7603 = vrcp.f32 %v3339_v13 }
0x1102   :  { %7605 = vrcp.f32 %v3342_v12 }
0x1103   :  { %v7600_v20 = vpop.eup %7599 }
0x1104   :  { %v3345_v25 = vpop.xlane.xlu0 %3344  ;;  %v3363_v29 = vmul.f32 %v7600_v20, %v7586_v2  ;;  %v7602_v34 = vpop.eup %7601 }
0x1105   :  { %7607 = vrcp.f32 %v3345_v25  ;;  %v3364_v8 = vmul.f32 %v7602_v34, %v8836_v54 }
0x1106   :  { %7129 = vmatprep.mubr.msk.f32.mxu0 %vm154_vm4, %v3363_v29  ;;  %7609 = vrcp.f32 %v3348_v26 }
0x1108   :  { %v3351_v23 = vpop.xlane.xlu0 %3350 }
0x1109   :  { %7611 = vrcp.f32 %v3351_v23 }
0x110b   :  { %v7604_v40 = vpop.eup %7603 }
0x110c   :  { %v7273_v14 = vpop.permute.xlu0 %7272  ;;  %v3354_v61 = vpop.xlane.xlu1 %3353  ;;  %v3365_v22 = vmul.f32 %v7604_v40, %v7590_v37 }
0x110d   :  { %v7275_v19 = vunpack.i.h.bf16 %v7273_v14  ;;  %v7274_v27 = vunpack.i.l.bf16 %v7273_v14  ;;  %7613 = vrcp.f32 %v3354_v61  ;;  %v7606_v21 = vpop.eup %7605 }
0x110e   :  { %v3366_v49 = vmul.f32 %v7606_v21, %v7588_v33  ;;  %v6090_v21 = vld [vmem:[%s9561_s11 + $0x108] sm:$0xff] }
0x110f   :  { %v7219_v28 = vpack.c.bf16 %v7275_v19, %v7274_v27  ;;  %v7608_v45 = vpop.eup %7607 }
0x1110   :  { %v7610_v46 = vpop.eup %7609  ;;  %v3367_v50 = vmul.f32 %v7608_v45, %v7594_v60  ;;  %v6098_v45 = vld [vmem:[%s9561_s11 + $0x148] sm:$0xff] }
0x1111   :  { %7220 = vmatprep.subr.bf16.mxu0 %v7219_v28  ;;  %v3368_v62 = vmul.f32 %v7610_v46, %v7592_v3  ;;  %v6123_v46 = vcombine.low %v6090_v21, %v6098_v45 }
0x1112   :  { %7222 = vmatpush3.bf16.msra.mxu0 %v7219_v28 }
0x1113   :  { %v7612_v58 = vpop.eup %7611 }
0x1114   :  { %v3369_v52 = vmul.f32 %v7612_v58, %v7596_v42  ;;  %v6082_v42 = vld [vmem:[%s9600_s28 + $0x1] ss:$0 sm:$0xff] }
0x1115   :  { %7130 = vmatmul.mubr.msk.f32.vlgmr.msra.gmra.mrb[60].mxu0 %vm154_vm4, %v3364_v8  ;;  %v6097_v8 = vld [vmem:[%s9561_s11 + $0x140] sm:$0xff] }
0x1116   :  { %7132 = vmatprep.mubr.msk.f32.mxu0 %vm154_vm4, %v3365_v22  ;;  %v6105_v58 = vld [vmem:[%s9561_s11 + $0x180] sm:$0xff] }
0x1117   :  { %v7614_v59 = vpop.eup %7613 }
0x1118   :  { %v3370_v54 = vmul.f32 %v7614_v59, %v7598_v6  ;;  %v6106_v59 = vld [vmem:[%s9561_s11 + $0x188] sm:$0xff] }
0x1119   :  { %7133 = vmatmul.mubr.msk.f32.gmra.mrb[62].mxu0 %vm154_vm4, %v3366_v49 }
0x111a   :  { %7135 = vmatprep.mubr.msk.f32.mxu0 %vm154_vm4, %v3367_v50  ;;  %v6124_v50 = vcombine.high %v6090_v21, %v6098_v45  ;;  %v6103_v45 = vld [vmem:[%s9561_s11 + $0x170] sm:$0xff] }
0x111d   :  { %7136 = vmatmul.mubr.msk.f32.gmra.mrb[64].mxu0 %vm154_vm4, %v3368_v62  ;;  %v6113_v62 = vld [vmem:[%s9561_s11 + $0x1c0] sm:$0xff] }
0x111e   :  { %7138 = vmatprep.mubr.msk.f32.mxu0 %vm154_vm4, %v3369_v52  ;;  %v6138_v52 = vcombine.high %v6105_v58, %v6113_v62 }
0x1121   :  { %7139 = vmatmul.mubr.msk.f32.gmra.mrb[66].mxu0 %vm154_vm4, %v3370_v54  ;;  %v6114_v54 = vld [vmem:[%s9561_s11 + $0x1c8] sm:$0xff] }
0x1122   :  { %3930 = vmatprep.mubr.bf16.mxu0 %v7679_v31 }
0x11e8   :  { %v7131_v63 = vpop.f32.mrb[60].mxu0 }
0x11e9   :  { %v3507_v2 = vmul.f32 %v8753_v18, %v7131_v63  ;;  %v3467_v17 = vpop.f32.mrb[61].mxu0  ;;  %v6137_v63 = vcombine.low %v6105_v58, %v6113_v62 }
0x11ea   :  { %v3506_v24 = vmul.f32 %v8747_v30, %v3467_v17  ;;  %v6140_v17 = vcombine.high %v6106_v59, %v6114_v54 }
0x11ec   :  { %v7223_v32 = vpack.c.bf16 %v3507_v2, %v3506_v24  ;;  %v7134_v33 = vpop.f32.mrb[62].mxu0  ;;  %v6139_v2 = vcombine.low %v6106_v59, %v6114_v54  ;;  %v6091_v24 = vld [vmem:[%s9561_s11 + $0x110] sm:$0xff] }
0x11ed   :  { %v3509_v38 = vmul.f32 %v8760_v1, %v7134_v33  ;;  %v3477_v4 = vpop.f32.mrb[63].mxu0  ;;  %v6092_v33 = vld [vmem:[%s9561_s11 + $0x118] sm:$0xff]  ;;  %v6119_v54 = vld [vmem:[%s9561_s11 + $0x1f0] sm:$0xff] }
0x11ee   :  { %v3508_v57 = vmul.f32 %v8767_v35, %v3477_v4  ;;  %7224 = vmatprep.subr.bf16.mxu1 %v7223_v32  ;;  %v6100_v4 = vld [vmem:[%s9561_s11 + $0x158] sm:$0xff] }
0x11ef   :  { %7226 = vmatpush3.bf16.msra.mxu1 %v7223_v32  ;;  %v6099_v32 = vld [vmem:[%s9561_s11 + $0x150] sm:$0xff] }
0x11f0   :  { %v7227_v36 = vpack.c.bf16 %v3509_v38, %v3508_v57  ;;  %v7137_v37 = vpop.f32.mrb[64].mxu0  ;;  %v6126_v38 = vcombine.high %v6091_v24, %v6099_v32  ;;  %v6125_v57 = vcombine.low %v6091_v24, %v6099_v32 }
0x11f1   :  { %v3511_v3 = vmul.f32 %v8774_v16, %v7137_v37  ;;  %v3487_v39 = vpop.f32.mrb[65].mxu0  ;;  %v7648_v16 = vld [vmem:[%s9569_s19 + $0x8] sm:$0xff]  ;;  %v6128_v37 = vcombine.high %v6092_v33, %v6100_v4 }
0x11f2   :  { %v3510_v10 = vmul.f32 %v8781_v44, %v3487_v39  ;;  %7228 = vmatprep.subr.bf16.mxu1 %v7227_v36  ;;  %v7409_v44 = vld [vmem:[%s9599_s5 + $0x8] sm:$0xff]  }
0x11f3   :  { %7230 = vmatpush3.bf16.msra.mxu1 %v7227_v36  ;;  %v6127_v36 = vcombine.low %v6092_v33, %v6100_v4 }
0x11f4   :  { %v7231_v18 = vpack.c.bf16 %v3511_v3, %v3510_v10  ;;  %v7140_v30 = vpop.f32.mrb[66].mxu0 }
0x11f5   :  { %v3513_v15 = vmul.f32 %v8789_v51, %v7140_v30  ;;  %v3497_v60 = vpop.f32.mrb[67].mxu0 }
0x11f6   :  { %v3512_v1 = vmul.f32 %v8795_v53, %v3497_v60  ;;  %7232 = vmatprep.subr.bf16.mxu1 %v7231_v18 }
0x11f7   :  { %7234 = vmatpush3.bf16.msra.mxu1 %v7231_v18 }
0x11f8   :  { %v7235_v35 = vpack.c.bf16 %v3513_v15, %v3512_v1  ;;  %v6087_v1 = vld [vmem:[%s9559_s9 + $0x1] ss:$0 sm:$0xff] }
0x11fa   :  { %7236 = vmatprep.subr.bf16.mxu1 %v7235_v35 }
0x11fb   :  { %7238 = vmatpush3.bf16.msra.mxu1 %v7235_v35 }
0x11fc   :  { %7160 = vmatprep.subr.bf16.mxu1 %v7673_v0 }
0x11fe   :  { %7158 = vmatmul.mubr.msk.f32.vlgmr.msra.gmra.mrb[62].mxu1 %vm793_vm6, %v7648_v16 }
0x11ff   :  { %7162 = vmatprep.mubr.msk.bf16.mxu1 %vm7675_vm2, %v7673_v0  ;;  %7161 = vmatpush3.bf16.msra.mxu1 %v7409_v44 }
0x1200   :  { %3941 = vmatprep.subr.bf16.mxu1 %v6124_v50 }
0x12d1   :  { %v7159_v51 = vpop.f32.mrb[62].mxu1 }
0x12d2   :  { %v3580_v53 = vpop.f32.mrb[63].mxu1 }
0x12d3   :  { %v3589_v41 = vpack.c.bf16 %v7159_v51, %v3580_v53  ;;  %v6088_v51 = vld [vmem:[%s9560_s10 + $0x1] ss:$0 sm:$0xff] }
0x12d5   :  { %7163 = vmatmul.mubr.msk.bf16.vlgmr.msra.gmra.mrb[64].mxu1 %vm154_vm4, %v3589_v41 }
0x12d6   :  { %3973 = vmatprep.mubr.bf16.mxu1 %v7679_v31  ;;  %3942 = vmatpush1.bf16.msra.mxu1 %v6123_v46  ;;  %v6104_v46 = vld [vmem:[%s9561_s11 + $0x178] sm:$0xff] }
0x12d7   :  { %3943 = vmatprep.subr.bf16.mxu1 %v6140_v17 }
0x12da   :  { %3944 = vmatpush1.bf16.msra.mxu1 %v6139_v2  ;;  %v6120_v2 = vld [vmem:[%s9561_s11 + $0x1f8] sm:$0xff] }
0x12db   :  { %4027 = vmatprep.subr.bf16.mxu1 %v6128_v37  ;;  %v7412_v37 = vld [vmem:[%s9562_s12 + $0x400] sm:$0xff]  }
0x13a8   :  { %v3644_v5 = vpop.f32.mrb[64].mxu1 }
0x13a9   :  { %v3645_v6 = vadd.f32 %v6082_v42, %v3644_v5  ;;  %v7164_v7 = vpop.f32.mrb[65].mxu1  ;;  %v6107_v5 = vld [vmem:[%s9561_s11 + $0x190] sm:$0xff] }
0x13aa   :  { %v3647_v9 = vpop.f32.mrb[66].mxu1  ;;  %v6115_v7 = vld [vmem:[%s9561_s11 + $0x1d0] sm:$0xff] }
0x13ab   :  { %v3648_v11 = vadd.f32 %v6082_v42, %v3647_v9  ;;  %v3651_v12 = vadd.f32 %v3645_v6, %v8698_v55  ;;  %v7165_v13 = vpop.f32.mrb[67].mxu1  ;;  %v6108_v9 = vld [vmem:[%s9561_s11 + $0x198] sm:$0xff] }
0x13ad   :  { %v3657_v20 = vsel %vm154_vm4, %v3651_v12, 0.0  ;;  %v3652_v25 = vadd.f32 %v3648_v11, %v8700_v56  ;;  %v6089_v56 = vld [vmem:[%s9561_s11 + $0x100] sm:$0xff]  ;;  %v6116_v11 = vld [vmem:[%s9561_s11 + $0x1d8] sm:$0xff] }
0x13ae   :  { %3658 = vadd.xlane.f32.xlu1 %v3657_v20  ;;  %v6122_v22 = vcombine.high %v6089_v56, %v6097_v8  ;;  %v6121_v49 = vcombine.low %v6089_v56, %v6097_v8 }
0x13af   :  { %v3660_v29 = vsel %vm154_vm4, %v3652_v25, 0.0 }
0x13b0   :  { %3898 = vmatprep.subr.bf16.mxu0 %v6122_v22  ;;  %v6095_v22 = vld [vmem:[%s9561_s11 + $0x130] sm:$0xff] }
0x13b1   :  { %3899 = vmatpush1.bf16.msra.mxu0 %v6121_v49  ;;  %v6096_v49 = vld [vmem:[%s9561_s11 + $0x138] sm:$0xff]  ;;  %v6134_v62 = vcombine.high %v6095_v22, %v6103_v45  ;;  %v6133_v17 = vcombine.low %v6095_v22, %v6103_v45 }
0x13b2   :  { %3661 = vadd.xlane.f32.xlu1 %v3660_v29  ;;  %3900 = vmatprep.subr.bf16.mxu0 %v6138_v52  ;;  %v6144_v29 = vcombine.high %v6108_v9, %v6116_v11  ;;  %v6136_v59 = vcombine.high %v6096_v49, %v6104_v46  ;;  %v6111_v52 = vld [vmem:[%s9561_s11 + $0x1b0] sm:$0xff]  ;;  %v6135_v24 = vcombine.low %v6096_v49, %v6104_v46 }
0x13b3   :  { %v6150_v32 = vcombine.high %v6111_v52, %v6119_v54 }
0x13b5   :  { %3901 = vmatpush1.bf16.msra.mxu0 %v6137_v63  ;;  %v6112_v63 = vld [vmem:[%s9561_s11 + $0x1b8] sm:$0xff] }
0x13b6   :  { %3984 = vmatprep.subr.bf16.mxu0 %v6126_v38  ;;  %v6152_v33 = vcombine.high %v6112_v63, %v6120_v2  ;;  %v6149_v38 = vcombine.low %v6111_v52, %v6119_v54  ;;  %v6151_v4 = vcombine.low %v6112_v63, %v6120_v2  ;;  %v7446_v63 = vld [vmem:[%s9562_s12 + $0x548] sm:$0xff]  }
0x13b7   :  { %v7447_v2 = vld [vmem:[%s9562_s12 + $0x5c8] sm:$0xff]  }
0x143b   :  { %v3659_v23 = vpop.xlane.xlu1 %3658 }
0x143c   :  { %v3663_v26 = vmul.f32 0.0625, %v3659_v23  ;;  %v6093_v23 = vld [vmem:[%s9561_s11 + $0x120] sm:$0xff] }
0x143e   :  { %v3665_v14 = vsub.f32 %v3651_v12, %v3663_v26  ;;  %v6101_v26 = vld [vmem:[%s9561_s11 + $0x160] sm:$0xff] }
0x143f   :  { %v3662_v19 = vpop.xlane.xlu1 %3661 }
0x1440   :  { %v3664_v27 = vmul.f32 0.0625, %v3662_v19  ;;  %v3667_v61 = vmul.f32 %v3665_v14, %v3665_v14  ;;  %v6130_v19 = vcombine.high %v6093_v23, %v6101_v26 }
0x1442   :  { %v3666_v28 = vsub.f32 %v3652_v25, %v3664_v27  ;;  %v3669_v34 = vsel %vm154_vm4, %v3667_v61, 0.0  ;;  %v6142_v25 = vcombine.high %v6107_v5, %v6115_v7  ;;  %v6109_v61 = vld [vmem:[%s9561_s11 + $0x1a0] sm:$0xff] }
0x1443   :  { %3670 = vadd.xlane.f32.xlu1 %v3669_v34  ;;  %v6110_v34 = vld [vmem:[%s9561_s11 + $0x1a8] sm:$0xff] }
0x1444   :  { %v3668_v55 = vmul.f32 %v3666_v28, %v3666_v28 }
0x1446   :  { %v3672_v40 = vsel %vm154_vm4, %v3668_v55, 0.0  ;;  %v6118_v55 = vld [vmem:[%s9561_s11 + $0x1e8] sm:$0xff] }
0x1447   :  { %3673 = vadd.xlane.f32.xlu1 %v3672_v40  ;;  %v6129_v40 = vcombine.low %v6093_v23, %v6101_v26  ;;  %v6148_v21 = vcombine.high %v6110_v34, %v6118_v55  ;;  %v6147_v58 = vcombine.low %v6110_v34, %v6118_v55  ;;  %v7436_v23 = vld [vmem:[%s9562_s12 + $0x430] sm:$0xff]  }
0x1448   :  { %v7437_v26 = vld [vmem:[%s9562_s12 + $0x4b0] sm:$0xff]  }
0x14d0   :  { %v3671_v3 = vpop.xlane.xlu1 %3670 }
0x14d1   :  { %v3675_v39 = vmul.f32 0.0625, %v3671_v3  ;;  %v7413_v3 = vld [vmem:[%s9562_s12 + $0x480] sm:$0xff]  }
0x14d3   :  { %v3677_v10 = vadd.f32 1e-05, %v3675_v39  ;;  %v7414_v39 = vld [vmem:[%s9562_s12 + $0x448] sm:$0xff]  }
0x14d4   :  { %v3674_v18 = vpop.xlane.xlu1 %3673 }
0x14d5   :  { %7615 = vrsqrt.f32 %v3677_v10  ;;  %v3676_v30 = vmul.f32 0.0625, %v3674_v18  ;;  %v7415_v10 = vld [vmem:[%s9562_s12 + $0x4c8] sm:$0xff]  }
0x14d6   :  { %v7416_v18 = vld [vmem:[%s9562_s12 + $0x408] sm:$0xff]  }
0x14d7   :  { %v3678_v15 = vadd.f32 1e-05, %v3676_v30  ;;  %v7417_v30 = vld [vmem:[%s9562_s12 + $0x488] sm:$0xff]  }
0x14d9   :  { %7617 = vrsqrt.f32 %v3678_v15  ;;  %v7418_v15 = vld [vmem:[%s9562_s12 + $0x450] sm:$0xff]  }
0x14df   :  { %v7616_v60 = vpop.eup %7615 }
0x14e0   :  { %v3681_v35 = vmul.f32 %v7616_v60, %v3665_v14  ;;  %v6143_v14 = vcombine.low %v6108_v9, %v6116_v11  ;;  %v7419_v60 = vld [vmem:[%s9562_s12 + $0x4d0] sm:$0xff]   ;;  %v7429_v9 = vld [vmem:[%s9562_s12 + $0x4a0] sm:$0xff]   ;;  %v7430_v11 = vld [vmem:[%s9562_s12 + $0x468] sm:$0xff]  }
0x14e2   :  { %v3689_v16 = vmul.f32 %v6087_v1, %v3681_v35  ;;  %v7421_v35 = vld [vmem:[%s9562_s12 + $0x490] sm:$0xff]  }
0x14e3   :  { %v7618_v44 = vpop.eup %7617 }
0x14e4   :  { %v3682_v53 = vmul.f32 %v7618_v44, %v3666_v28  ;;  %v8930_v41 = vadd.f32 %v6088_v51, %v3689_v16  ;;  %v6117_v28 = vld [vmem:[%s9561_s11 + $0x1e0] sm:$0xff]  ;;  %v7422_v16 = vld [vmem:[%s9562_s12 + $0x458] sm:$0xff]  }
0x14e5   :  { %v6146_v8 = vcombine.high %v6109_v61, %v6117_v28  ;;  %v6145_v50 = vcombine.low %v6109_v61, %v6117_v28  ;;  %v7423_v44 = vld [vmem:[%s9562_s12 + $0x4d8] sm:$0xff]  }
0x14e6   :  { %v3690_v42 = vmul.f32 %v6087_v1, %v3682_v53  ;;  %v3699_v12 = vsel %vm154_vm4, %v8930_v41, %v7264_v48  ;;  %v6094_v48 = vld [vmem:[%s9561_s11 + $0x128] sm:$0xff]  ;;  %v7420_v1 = vld [vmem:[%s9562_s12 + $0x410] sm:$0xff]   ;;  %v7425_v53 = vld [vmem:[%s9562_s12 + $0x498] sm:$0xff]  }
0x14e7   :  { %v6132_v27 = vcombine.high %v6094_v48, %v6102_v43  ;;  %v6131_v56 = vcombine.low %v6094_v48, %v6102_v43  ;;  %v7438_v48 = vld [vmem:[%s9562_s12 + $0x478] sm:$0xff]  }
0x14e8   :  { %v8935_v6 = vadd.f32 %v6088_v51, %v3690_v42  ;;  %v7424_v51 = vld [vmem:[%s9562_s12 + $0x418] sm:$0xff]   ;;  %v7426_v42 = vld [vmem:[%s9562_s12 + $0x460] sm:$0xff]  }
0x14e9   :  { %v7439_v43 = vld [vmem:[%s9562_s12 + $0x4f8] sm:$0xff]  }
0x14ea   :  { %v3700_v13 = vsel %vm154_vm4, %v8935_v6, %v7265_v47  ;;  %v6141_v47 = vcombine.low %v6107_v5, %v6115_v7  ;;  %v7427_v5 = vld [vmem:[%s9562_s12 + $0x4e0] sm:$0xff]  }
0x14eb   :  { %v8954_v20 = vpack.c.bf16 %v3700_v13, %v3699_v12  ;;  %v7428_v7 = vld [vmem:[%s9562_s12 + $0x420] sm:$0xff]   ;;  %v7431_v12 = vld [vmem:[%s9562_s12 + $0x4e8] sm:$0xff]  }
0x14ec   :  { %v7432_v13 = vld [vmem:[%s9562_s12 + $0x428] sm:$0xff]  }
0x14ed   :  { %6153 = vmatmul.mubr.msk.bf16.vlgmr.msra.gmra.mrb[68].mxu0 %vm1184_vm7, %v8954_v20  ;;  %6154 = vmatmul.mubr.msk.bf16.vlgmr.msra.gmra.mrb[68].mxu1 %vm1184_vm7, %v8954_v20 }
0x14ee   :  { %3985 = vmatpush1.bf16.msra.mxu0 %v6125_v57  ;;  %4028 = vmatpush1.bf16.msra.mxu1 %v6127_v36  ;;  %v7410_v57 = vld [vmem:[%s9562_s12 + $0x440] sm:$0xff]  }
0x14ef   :  { %3986 = vmatprep.subr.bf16.mxu0 %v6142_v25  ;;  %4029 = vmatprep.subr.bf16.mxu1 %v6144_v29  ;;  %v7411_v36 = vld [vmem:[%s9562_s12 + $0x4c0] sm:$0xff]   ;;  %v7434_v25 = vld [vmem:[%s9562_s12 + $0x470] sm:$0xff]  }
0x14f0   :  { %4016 = vmatprep.mubr.bf16.mxu0 %v7679_v31  ;;  %4059 = vmatprep.mubr.bf16.mxu1 %v7679_v31  ;;  %v7435_v29 = vld [vmem:[%s9562_s12 + $0x4f0] sm:$0xff]  }
0x14f2   :  { %3987 = vmatpush1.bf16.msra.mxu0 %v6141_v47  ;;  %4030 = vmatpush1.bf16.msra.mxu1 %v6143_v14  ;;  %v7440_v47 = vld [vmem:[%s9562_s12 + $0x438] sm:$0xff]  }
0x14f3   :  { %4070 = vmatprep.subr.bf16.mxu0 %v6130_v19  ;;  %4113 = vmatprep.subr.bf16.mxu1 %v6132_v27  ;;  %v7441_v14 = vld [vmem:[%s9562_s12 + $0x4b8] sm:$0xff]   ;;  %v7442_v19 = vld [vmem:[%s9562_s12 + $0x540] sm:$0xff]  }
0x14f4   :  { %v7443_v27 = vld [vmem:[%s9562_s12 + $0x5c0] sm:$0xff]  }
0x14f5   :  { %6155 = vmatmul.mubr.msk.bf16.vlgmr.msra.gmra.mrb[72].mxu0 %vm1184_vm7, %v8954_v20  ;;  %6156 = vmatmul.mubr.msk.bf16.vlgmr.msra.gmra.mrb[72].mxu1 %vm1184_vm7, %v8954_v20 }
0x14f6   :  { %4071 = vmatpush1.bf16.msra.mxu0 %v6129_v40  ;;  %4114 = vmatpush1.bf16.msra.mxu1 %v6131_v56 }
0x14f7   :  { %4072 = vmatprep.subr.bf16.mxu0 %v6146_v8  ;;  %4115 = vmatprep.subr.bf16.mxu1 %v6148_v21 }
0x14f8   :  { %4102 = vmatprep.mubr.bf16.mxu0 %v7679_v31  ;;  %4145 = vmatprep.mubr.bf16.mxu1 %v7679_v31 }
0x14fa   :  { %4073 = vmatpush1.bf16.msra.mxu0 %v6145_v50  ;;  %4116 = vmatpush1.bf16.msra.mxu1 %v6147_v58 }
0x14fb   :  { %4156 = vmatprep.subr.bf16.mxu0 %v6134_v62  ;;  %4199 = vmatprep.subr.bf16.mxu1 %v6136_v59  ;;  %v7444_v62 = vld [vmem:[%s9562_s12 + $0x500] sm:$0xff]  }
0x14fc   :  { %v7445_v59 = vld [vmem:[%s9562_s12 + $0x580] sm:$0xff]  }
0x14fd   :  { %6157 = vmatmul.mubr.msk.bf16.vlgmr.msra.gmra.mrb[76].mxu0 %vm1184_vm7, %v8954_v20  ;;  %6158 = vmatmul.mubr.msk.bf16.vlgmr.msra.gmra.mrb[76].mxu1 %vm1184_vm7, %v8954_v20 }
0x14fe   :  { %4157 = vmatpush1.bf16.msra.mxu0 %v6133_v17  ;;  %4200 = vmatpush1.bf16.msra.mxu1 %v6135_v24 }
0x14ff   :  { %4158 = vmatprep.subr.bf16.mxu0 %v6150_v32  ;;  %4201 = vmatprep.subr.bf16.mxu1 %v6152_v33 }
0x1500   :  { %4188 = vmatprep.mubr.bf16.mxu0 %v7679_v31  ;;  %4231 = vmatprep.mubr.bf16.mxu1 %v7679_v31 }
0x1502   :  { %4159 = vmatpush1.bf16.msra.mxu0 %v6149_v38  ;;  %4202 = vmatpush1.bf16.msra.mxu1 %v6151_v4 }
0x1503   :  { %6821 = vmatprep.subr.bf16.mxu0 %v7410_v57  ;;  %6843 = vmatprep.subr.bf16.mxu1 %v7411_v36  ;;  %v7448_v57 = vld [vmem:[%s9562_s12 + $0x508] sm:$0xff]  }
0x1504   :  { %v7449_v36 = vld [vmem:[%s9562_s12 + $0x588] sm:$0xff]  }
0x1505   :  { %6159 = vmatmul.mubr.msk.bf16.vlgmr.msra.gmra.mrb[80].mxu0 %vm1184_vm7, %v8954_v20  ;;  %6160 = vmatmul.mubr.msk.bf16.vlgmr.msra.gmra.mrb[80].mxu1 %vm1184_vm7, %v8954_v20  ;;  %v7433_v20 = vld [vmem:[%s9562_s12 + $0x4a8] sm:$0xff]  }
0x1506   :  { %6822 = vmatpush3.bf16.msra.mxu0 %v7412_v37  ;;  %6844 = vmatpush3.bf16.msra.mxu1 %v7413_v3 }
0x1507   :  { %6823 = vmatprep.subr.bf16.mxu0 %v7414_v39  ;;  %6845 = vmatprep.subr.bf16.mxu1 %v7415_v10 }
0x150a   :  { %6824 = vmatpush3.bf16.msra.mxu0 %v7416_v18  ;;  %6846 = vmatpush3.bf16.msra.mxu1 %v7417_v30  ;;  %v7450_v18 = vld [vmem:[%s9562_s12 + $0x550] sm:$0xff]  }
0x150b   :  { %6825 = vmatprep.subr.bf16.mxu0 %v7418_v15  ;;  %6847 = vmatprep.subr.bf16.mxu1 %v7419_v60  ;;  %v7451_v30 = vld [vmem:[%s9562_s12 + $0x5d0] sm:$0xff]  }
0x150e   :  { %6826 = vmatpush3.bf16.msra.mxu0 %v7420_v1  ;;  %6848 = vmatpush3.bf16.msra.mxu1 %v7421_v35 }
0x150f   :  { %6827 = vmatprep.subr.bf16.mxu0 %v7422_v16  ;;  %6849 = vmatprep.subr.bf16.mxu1 %v7423_v44  ;;  %v7452_v16 = vld [vmem:[%s9562_s12 + $0x510] sm:$0xff]  }
0x1510   :  { %v7453_v44 = vld [vmem:[%s9562_s12 + $0x590] sm:$0xff]  }
0x1512   :  { %6828 = vmatpush3.bf16.msra.mxu0 %v7424_v51  ;;  %6850 = vmatpush3.bf16.msra.mxu1 %v7425_v53  ;;  %v7454_v51 = vld [vmem:[%s9562_s12 + $0x558] sm:$0xff]  }
0x1513   :  { %6829 = vmatprep.subr.bf16.mxu0 %v7426_v42  ;;  %6851 = vmatprep.subr.bf16.mxu1 %v7427_v5  ;;  %v7455_v53 = vld [vmem:[%s9562_s12 + $0x5d8] sm:$0xff]  }
0x1516   :  { %6830 = vmatpush3.bf16.msra.mxu0 %v7428_v7  ;;  %6852 = vmatpush3.bf16.msra.mxu1 %v7429_v9 }
0x1517   :  { %6831 = vmatprep.subr.bf16.mxu0 %v7430_v11  ;;  %6853 = vmatprep.subr.bf16.mxu1 %v7431_v12 }
0x151a   :  { %6832 = vmatpush3.bf16.msra.mxu0 %v7432_v13  ;;  %6854 = vmatpush3.bf16.msra.mxu1 %v7433_v20  ;;  %v7456_v13 = vld [vmem:[%s9562_s12 + $0x518] sm:$0xff]  }
0x151b   :  { %6833 = vmatprep.subr.bf16.mxu0 %v7434_v25  ;;  %6855 = vmatprep.subr.bf16.mxu1 %v7435_v29  ;;  %v7457_v20 = vld [vmem:[%s9562_s12 + $0x598] sm:$0xff]  }
0x151e   :  { %6834 = vmatpush3.bf16.msra.mxu0 %v7436_v23  ;;  %6856 = vmatpush3.bf16.msra.mxu1 %v7437_v26 }
0x151f   :  { %6835 = vmatprep.subr.bf16.mxu0 %v7438_v48  ;;  %6857 = vmatprep.subr.bf16.mxu1 %v7439_v43  ;;  %v7458_v48 = vld [vmem:[%s9562_s12 + $0x560] sm:$0xff]  }
0x1520   :  { %v7459_v43 = vld [vmem:[%s9562_s12 + $0x5e0] sm:$0xff]  }
0x1522   :  { %6836 = vmatpush3.bf16.msra.mxu0 %v7440_v47  ;;  %6858 = vmatpush3.bf16.msra.mxu1 %v7441_v14 }
0x1523   :  { %6865 = vmatprep.subr.bf16.mxu0 %v7442_v19  ;;  %6887 = vmatprep.subr.bf16.mxu1 %v7443_v27  ;;  %v7460_v19 = vld [vmem:[%s9562_s12 + $0x520] sm:$0xff]  }
0x1524   :  { %v7461_v27 = vld [vmem:[%s9562_s12 + $0x5a0] sm:$0xff]  }
0x15c0   :  { %v3932_v61 = vpop.f32.mrb[68].mxu0  ;;  %v3975_v28 = vpop.f32.mrb[68].mxu1 }
0x15c1   :  { %v3934_v34 = vpop.f32.mrb[69].mxu0  ;;  %v3977_v55 = vpop.f32.mrb[69].mxu1 }
0x15c2   :  { %v3936_v40 = vpop.f32.mrb[70].mxu0  ;;  %v3979_v56 = vpop.f32.mrb[70].mxu1 }
0x15c3   :  { %v4242_v8 = vpack.c.bf16 %v3936_v40, %v3932_v61  ;;  %v4244_v21 = vpack.c.bf16 %v3979_v56, %v3975_v28  ;;  %v3938_v22 = vpop.f32.mrb[71].mxu0  ;;  %v3981_v45 = vpop.f32.mrb[71].mxu1  ;;  %v7462_v61 = vld [vmem:[%s9562_s12 + $0x568] sm:$0xff]  }
0x15c4   :  { %v4243_v49 = vpack.c.bf16 %v3938_v22, %v3934_v34  ;;  %v4245_v46 = vpack.c.bf16 %v3981_v45, %v3977_v55  ;;  %v7463_v28 = vld [vmem:[%s9562_s12 + $0x5e8] sm:$0xff]  }
0x15c5   :  { %v4258_v52 = vmax.bf16 %v7679_v31, %v4242_v8  ;;  %v4260_v54 = vmax.bf16 %v7679_v31, %v4244_v21  ;;  %v7464_v22 = vld [vmem:[%s9562_s12 + $0x528] sm:$0xff]  }
0x15c6   :  { %v4259_v50 = vmax.bf16 %v7679_v31, %v4243_v49  ;;  %v4261_v58 = vmax.bf16 %v7679_v31, %v4245_v46  ;;  %v7465_v45 = vld [vmem:[%s9562_s12 + $0x5a8] sm:$0xff]  }
0x15c8   :  { %v9144_v17 = vpop.f32.mrb[72].mxu0  ;;  %v9146_v24 = vpop.f32.mrb[72].mxu1  ;;  %5339 = vmatprep.mubr.bf16.mxu0 %v4259_v50  ;;  %5380 = vmatprep.mubr.bf16.mxu1 %v4261_v58 }
0x15c9   :  { %v4020_v32 = vpop.f32.mrb[73].mxu0  ;;  %v4063_v33 = vpop.f32.mrb[73].mxu1  ;;  %5340 = vmatmul.mubr.bf16.vlgmr.msra.gmra.mrb[84].mxu0 %v4258_v52  ;;  %5381 = vmatmul.mubr.bf16.vlgmr.msra.gmra.mrb[84].mxu1 %v4260_v54 }
0x15ca   :  { %6866 = vmatpush3.bf16.msra.mxu0 %v7444_v62  ;;  %6888 = vmatpush3.bf16.msra.mxu1 %v7445_v59  ;;  %v9148_v38 = vpop.f32.mrb[74].mxu0  ;;  %v9150_v4 = vpop.f32.mrb[74].mxu1  ;;  %v7466_v62 = vld [vmem:[%s9562_s12 + $0x570] sm:$0xff]  }
0x15cb   :  { %v4246_v37 = vpack.c.bf16 %v9148_v38, %v9144_v17  ;;  %v4248_v3 = vpack.c.bf16 %v9150_v4, %v9146_v24  ;;  %v4024_v39 = vpop.f32.mrb[75].mxu0  ;;  %v4067_v10 = vpop.f32.mrb[75].mxu1  ;;  %6867 = vmatprep.subr.bf16.mxu0 %v7446_v63  ;;  %6889 = vmatprep.subr.bf16.mxu1 %v7447_v2  ;;  %v7467_v59 = vld [vmem:[%s9562_s12 + $0x5f0] sm:$0xff]   ;;  %v7479_v17 = vld [vmem:[%s9562_s12 + $0x6c8] sm:$0xff]  }
0x15cc   :  { %v4247_v15 = vpack.c.bf16 %v4024_v39, %v4020_v32  ;;  %v4249_v60 = vpack.c.bf16 %v4067_v10, %v4063_v33  ;;  %v7468_v63 = vld [vmem:[%s9562_s12 + $0x530] sm:$0xff]   ;;  %v7470_v32 = vld [vmem:[%s9562_s12 + $0x578] sm:$0xff]   ;;  %v7474_v39 = vld [vmem:[%s9562_s12 + $0x640] sm:$0xff]  }
0x15cd   :  { %v7469_v2 = vld [vmem:[%s9562_s12 + $0x5b0] sm:$0xff]   ;;  %v7471_v33 = vld [vmem:[%s9562_s12 + $0x5f8] sm:$0xff]   ;;  %v7475_v10 = vld [vmem:[%s9562_s12 + $0x6c0] sm:$0xff]  }
0x15ce   :  { %v4263_v1 = vmax.bf16 %v7679_v31, %v4247_v15  ;;  %v4265_v35 = vmax.bf16 %v7679_v31, %v4249_v60  ;;  %6868 = vmatpush3.bf16.msra.mxu0 %v7448_v57  ;;  %6890 = vmatpush3.bf16.msra.mxu1 %v7449_v36  ;;  %v7472_v57 = vld [vmem:[%s9562_s12 + $0x538] sm:$0xff]   ;;  %v4264_v15 = vmax.bf16 %v7679_v31, %v4248_v3  ;;  %v7477_v60 = vld [vmem:[%s9562_s12 + $0x680] sm:$0xff]   ;;  %v7480_v38 = vld [vmem:[%s9562_s12 + $0x608] sm:$0xff]  }
0x15cf   :  { %6869 = vmatprep.subr.bf16.mxu0 %v7450_v18  ;;  %6891 = vmatprep.subr.bf16.mxu1 %v7451_v30  ;;  %v7473_v36 = vld [vmem:[%s9562_s12 + $0x5b8] sm:$0xff]   ;;  %v7476_v18 = vld [vmem:[%s9562_s12 + $0x600] sm:$0xff]   ;;  %v4262_v30 = vmax.bf16 %v7679_v31, %v4246_v37  ;;  %v7481_v4 = vld [vmem:[%s9562_s12 + $0x688] sm:$0xff]  }
0x15d0   :  { %v9182_v42 = vpop.f32.mrb[76].mxu0  ;;  %v9184_v5 = vpop.f32.mrb[76].mxu1  ;;  %5421 = vmatprep.mubr.bf16.mxu0 %v4263_v1  ;;  %5462 = vmatprep.mubr.bf16.mxu1 %v4265_v35  ;;  %v7478_v35 = vld [vmem:[%s9562_s12 + $0x648] sm:$0xff]   ;;  %v7482_v37 = vld [vmem:[%s9562_s12 + $0x650] sm:$0xff]  }
0x15d1   :  { %v9186_v7 = vpop.f32.mrb[77].mxu0  ;;  %v9188_v9 = vpop.f32.mrb[77].mxu1  ;;  %v7483_v3 = vld [vmem:[%s9562_s12 + $0x6d0] sm:$0xff]  }
0x15d2   :  { %6870 = vmatpush3.bf16.msra.mxu0 %v7452_v16  ;;  %6892 = vmatpush3.bf16.msra.mxu1 %v7453_v44  ;;  %v9190_v11 = vpop.f32.mrb[78].mxu0  ;;  %v9192_v12 = vpop.f32.mrb[78].mxu1  ;;  %v7484_v16 = vld [vmem:[%s9562_s12 + $0x610] sm:$0xff]  }
0x15d3   :  { %v4250_v25 = vpack.c.bf16 %v9190_v11, %v9182_v42  ;;  %v4252_v29 = vpack.c.bf16 %v9192_v12, %v9184_v5  ;;  %v4110_v23 = vpop.f32.mrb[79].mxu0  ;;  %v9204_v26 = vpop.f32.mrb[79].mxu1  ;;  %6871 = vmatprep.subr.bf16.mxu0 %v7454_v51  ;;  %6893 = vmatprep.subr.bf16.mxu1 %v7455_v53  ;;  %v7485_v44 = vld [vmem:[%s9562_s12 + $0x690] sm:$0xff]   ;;  %v7486_v51 = vld [vmem:[%s9562_s12 + $0x658] sm:$0xff]   ;;  %v7511_v11 = vld [vmem:[%s9562_s12 + $0x7c8] sm:$0xff]  }
0x15d4   :  { %v4251_v47 = vpack.c.bf16 %v4110_v23, %v9186_v7  ;;  %v4253_v14 = vpack.c.bf16 %v9204_v26, %v9188_v9  ;;  %v7487_v53 = vld [vmem:[%s9562_s12 + $0x6d8] sm:$0xff]   ;;  %v7492_v23 = vld [vmem:[%s9562_s12 + $0x620] sm:$0xff]   ;;  %v7512_v12 = vld [vmem:[%s9562_s12 + $0x708] sm:$0xff]  }
0x15d5   :  { %v7488_v7 = vld [vmem:[%s9562_s12 + $0x618] sm:$0xff]   ;;  %v7493_v26 = vld [vmem:[%s9562_s12 + $0x6a0] sm:$0xff]  }
0x15d6   :  { %6872 = vmatpush3.bf16.msra.mxu0 %v7456_v13  ;;  %6894 = vmatpush3.bf16.msra.mxu1 %v7457_v20  ;;  %v4267_v1 = vmax.bf16 %v7679_v31, %v4251_v47  ;;  %v4269_v24 = vmax.bf16 %v7679_v31, %v4253_v14  ;;  %v7489_v9 = vld [vmem:[%s9562_s12 + $0x698] sm:$0xff]   ;;  %v7490_v13 = vld [vmem:[%s9562_s12 + $0x660] sm:$0xff]   ;;  %v7496_v47 = vld [vmem:[%s9562_s12 + $0x628] sm:$0xff]  }
0x15d7   :  { %6873 = vmatprep.subr.bf16.mxu0 %v7458_v48  ;;  %6895 = vmatprep.subr.bf16.mxu1 %v7459_v43  ;;  %v7491_v20 = vld [vmem:[%s9562_s12 + $0x6e0] sm:$0xff]   ;;  %v7494_v48 = vld [vmem:[%s9562_s12 + $0x668] sm:$0xff]  }
0x15d8   :  { %v9227_v34 = vpop.f32.mrb[80].mxu0  ;;  %v9229_v55 = vpop.f32.mrb[80].mxu1  ;;  %v7495_v43 = vld [vmem:[%s9562_s12 + $0x6e8] sm:$0xff]  }
0x15d9   :  { %v9231_v40 = vpop.f32.mrb[81].mxu0  ;;  %v9233_v56 = vpop.f32.mrb[81].mxu1  ;;  %v7497_v14 = vld [vmem:[%s9562_s12 + $0x6a8] sm:$0xff]  }
0x15da   :  { %6874 = vmatpush3.bf16.msra.mxu0 %v7460_v19  ;;  %6896 = vmatpush3.bf16.msra.mxu1 %v7461_v27  ;;  %v9235_v8 = vpop.f32.mrb[82].mxu0  ;;  %v9237_v21 = vpop.f32.mrb[82].mxu1  ;;  %v7498_v19 = vld [vmem:[%s9562_s12 + $0x670] sm:$0xff]  }
0x15db   :  { %v4254_v49 = vpack.c.bf16 %v9235_v8, %v9227_v34  ;;  %v4256_v46 = vpack.c.bf16 %v9237_v21, %v9229_v55  ;;  %v9249_v50 = vpop.f32.mrb[83].mxu0  ;;  %v9251_v58 = vpop.f32.mrb[83].mxu1  ;;  %6875 = vmatprep.subr.bf16.mxu0 %v7462_v61  ;;  %6897 = vmatprep.subr.bf16.mxu1 %v7463_v28  ;;  %v7499_v27 = vld [vmem:[%s9562_s12 + $0x6f0] sm:$0xff]   ;;  %v6418_v8 = vld [vmem:[%s9563_s13 + $0x1] ss:$0 sm:$0xff] }
0x15dc   :  { %v4255_v52 = vpack.c.bf16 %v9249_v50, %v9231_v40  ;;  %v4257_v54 = vpack.c.bf16 %v9251_v58, %v9233_v56  ;;  %v7500_v61 = vld [vmem:[%s9562_s12 + $0x630] sm:$0xff]   ;;  %v7518_v58 = vld [vmem:[%s9562_s12 + $0x758] sm:$0xff]  }
0x15dd   :  { %v7501_v28 = vld [vmem:[%s9562_s12 + $0x6b0] sm:$0xff]  }
0x15de   :  { %6876 = vmatpush3.bf16.msra.mxu0 %v7464_v22  ;;  %6898 = vmatpush3.bf16.msra.mxu1 %v7465_v45  ;;  %v7502_v22 = vld [vmem:[%s9562_s12 + $0x678] sm:$0xff]   ;;  %v4271_v42 = vmax.bf16 %v7679_v31, %v4255_v52  ;;  %v4273_v5 = vmax.bf16 %v7679_v31, %v4257_v54  ;;  %v7515_v40 = vld [vmem:[%s9562_s12 + $0x7d0] sm:$0xff]  }
0x15df   :  { %6877 = vmatprep.subr.bf16.mxu0 %v7466_v62  ;;  %6899 = vmatprep.subr.bf16.mxu1 %v7467_v59  ;;  %v7503_v45 = vld [vmem:[%s9562_s12 + $0x6f8] sm:$0xff]   ;;  %v7516_v56 = vld [vmem:[%s9562_s12 + $0x710] sm:$0xff]  }
0x15e0   :  { %v7504_v62 = vld [vmem:[%s9562_s12 + $0x638] sm:$0xff]   ;;  %v7517_v50 = vld [vmem:[%s9562_s12 + $0x790] sm:$0xff]  }
0x15e1   :  { %v7505_v59 = vld [vmem:[%s9562_s12 + $0x6b8] sm:$0xff]  }
0x15e2   :  { %6878 = vmatpush3.bf16.msra.mxu0 %v7468_v63  ;;  %6900 = vmatpush3.bf16.msra.mxu1 %v7469_v2  ;;  %v7506_v63 = vld [vmem:[%s9562_s12 + $0x740] sm:$0xff]   ;;  %v7519_v52 = vld [vmem:[%s9562_s12 + $0x7d8] sm:$0xff]  }
0x15e3   :  { %6879 = vmatprep.subr.bf16.mxu0 %v7470_v32  ;;  %6901 = vmatprep.subr.bf16.mxu1 %v7471_v33  ;;  %v7507_v2 = vld [vmem:[%s9562_s12 + $0x7c0] sm:$0xff]   ;;  %v4266_v33 = vmax.bf16 %v7679_v31, %v4250_v25  ;;  %v7513_v25 = vld [vmem:[%s9562_s12 + $0x788] sm:$0xff]   ;;  %v7520_v54 = vld [vmem:[%s9562_s12 + $0x718] sm:$0xff]  }
0x15e4   :  { %v7508_v32 = vld [vmem:[%s9562_s12 + $0x700] sm:$0xff]  }
0x15e6   :  { %6880 = vmatpush3.bf16.msra.mxu0 %v7472_v57  ;;  %6902 = vmatpush3.bf16.msra.mxu1 %v7473_v36  ;;  %v7509_v57 = vld [vmem:[%s9562_s12 + $0x780] sm:$0xff]   ;;  %v4268_v36 = vmax.bf16 %v7679_v31, %v4252_v29  ;;  %v7514_v29 = vld [vmem:[%s9562_s12 + $0x750] sm:$0xff]  }
0x15e7   :  { %6909 = vmatprep.subr.bf16.mxu0 %v7474_v39  ;;  %6931 = vmatprep.subr.bf16.mxu1 %v7475_v10  ;;  %v7510_v39 = vld [vmem:[%s9562_s12 + $0x748] sm:$0xff]   ;;  %v7521_v10 = vld [vmem:[%s9562_s12 + $0x798] sm:$0xff]  }
0x15e9   :  { %5422 = vmatmul.mubr.bf16.vlgmr.msra.gmra.mrb[88].mxu0 %v4262_v30  ;;  %5463 = vmatmul.mubr.bf16.vlgmr.msra.gmra.mrb[88].mxu1 %v4264_v15  ;;  %v7523_v30 = vld [vmem:[%s9562_s12 + $0x7e0] sm:$0xff]  }
0x15ea   :  { %6910 = vmatpush3.bf16.msra.mxu0 %v7476_v18  ;;  %5503 = vmatprep.mubr.bf16.mxu0 %v4267_v1  ;;  %v7522_v18 = vld [vmem:[%s9562_s12 + $0x760] sm:$0xff]   ;;  %v7526_v1 = vld [vmem:[%s9562_s12 + $0x768] sm:$0xff]  }
0x15eb   :  { %6932 = vmatpush3.bf16.msra.mxu1 %v7477_v60  ;;  %5544 = vmatprep.mubr.bf16.mxu1 %v4269_v24  ;;  %v7524_v15 = vld [vmem:[%s9562_s12 + $0x720] sm:$0xff]   ;;  %v7529_v24 = vld [vmem:[%s9562_s12 + $0x7a8] sm:$0xff]  }
0x15ec   :  { %6911 = vmatprep.subr.bf16.mxu0 %v7478_v35  ;;  %6933 = vmatprep.subr.bf16.mxu1 %v7479_v17  ;;  %v7525_v60 = vld [vmem:[%s9562_s12 + $0x7a0] sm:$0xff]   ;;  %v7527_v35 = vld [vmem:[%s9562_s12 + $0x7e8] sm:$0xff]  }
0x15ed   :  { %v7528_v17 = vld [vmem:[%s9562_s12 + $0x728] sm:$0xff]  }
0x15ee   :  { %6912 = vmatpush3.bf16.msra.mxu0 %v7480_v38  ;;  %v7530_v38 = vld [vmem:[%s9562_s12 + $0x770] sm:$0xff]  }
0x15ef   :  { %6934 = vmatpush3.bf16.msra.mxu1 %v7481_v4  ;;  %6913 = vmatprep.subr.bf16.mxu0 %v7482_v37  ;;  %v7531_v4 = vld [vmem:[%s9562_s12 + $0x7f0] sm:$0xff]  }
0x15f0   :  { %6935 = vmatprep.subr.bf16.mxu1 %v7483_v3  ;;  %v7532_v37 = vld [vmem:[%s9562_s12 + $0x730] sm:$0xff]  }
0x15f1   :  { %v7533_v3 = vld [vmem:[%s9562_s12 + $0x7b0] sm:$0xff]  }
0x15f2   :  { %6914 = vmatpush3.bf16.msra.mxu0 %v7484_v16  ;;  %v7534_v16 = vld [vmem:[%s9562_s12 + $0x778] sm:$0xff]  }
0x15f3   :  { %6936 = vmatpush3.bf16.msra.mxu1 %v7485_v44  ;;  %6915 = vmatprep.subr.bf16.mxu0 %v7486_v51  ;;  %v7535_v44 = vld [vmem:[%s9562_s12 + $0x7f8] sm:$0xff]  }
0x15f4   :  { %6937 = vmatprep.subr.bf16.mxu1 %v7487_v53  ;;  %v7536_v51 = vld [vmem:[%s9562_s12 + $0x738] sm:$0xff]  }
0x15f5   :  { %v7537_v53 = vld [vmem:[%s9562_s12 + $0x7b8] sm:$0xff]  }
0x15f6   :  { %6916 = vmatpush3.bf16.msra.mxu0 %v7488_v7  ;;  %v4270_v7 = vmax.bf16 %v7679_v31, %v4254_v49 }
0x15f7   :  { %6938 = vmatpush3.bf16.msra.mxu1 %v7489_v9  ;;  %6917 = vmatprep.subr.bf16.mxu0 %v7490_v13  ;;  %v4272_v9 = vmax.bf16 %v7679_v31, %v4256_v46 }
0x15f8   :  { %6939 = vmatprep.subr.bf16.mxu1 %v7491_v20 }
0x15fa   :  { %6918 = vmatpush3.bf16.msra.mxu0 %v7492_v23 }
0x15fb   :  { %6940 = vmatpush3.bf16.msra.mxu1 %v7493_v26  ;;  %6919 = vmatprep.subr.bf16.mxu0 %v7494_v48 }
0x15fc   :  { %6941 = vmatprep.subr.bf16.mxu1 %v7495_v43 }
0x15fe   :  { %6920 = vmatpush3.bf16.msra.mxu0 %v7496_v47 }
0x15ff   :  { %6942 = vmatpush3.bf16.msra.mxu1 %v7497_v14  ;;  %6921 = vmatprep.subr.bf16.mxu0 %v7498_v19 }
0x1600   :  { %6943 = vmatprep.subr.bf16.mxu1 %v7499_v27 }
0x1602   :  { %6922 = vmatpush3.bf16.msra.mxu0 %v7500_v61 }
0x1603   :  { %6944 = vmatpush3.bf16.msra.mxu1 %v7501_v28  ;;  %6923 = vmatprep.subr.bf16.mxu0 %v7502_v22 }
0x1604   :  { %6945 = vmatprep.subr.bf16.mxu1 %v7503_v45 }
0x1606   :  { %6924 = vmatpush3.bf16.msra.mxu0 %v7504_v62 }
0x1607   :  { %6946 = vmatpush3.bf16.msra.mxu1 %v7505_v59  ;;  %6953 = vmatprep.subr.bf16.mxu0 %v7506_v63 }
0x1608   :  { %6975 = vmatprep.subr.bf16.mxu1 %v7507_v2 }
0x1609   :  { %5504 = vmatmul.mubr.bf16.vlgmr.msra.gmra.mrb[92].mxu0 %v4266_v33 }
0x160a   :  { %5545 = vmatmul.mubr.bf16.vlgmr.msra.gmra.mrb[92].mxu1 %v4268_v36  ;;  %6954 = vmatpush3.bf16.msra.mxu0 %v7508_v32 }
0x160b   :  { %5585 = vmatprep.mubr.bf16.mxu0 %v4271_v42  ;;  %6976 = vmatpush3.bf16.msra.mxu1 %v7509_v57 }
0x160c   :  { %5626 = vmatprep.mubr.bf16.mxu1 %v4273_v5  ;;  %6955 = vmatprep.subr.bf16.mxu0 %v7510_v39 }
0x160d   :  { %6977 = vmatprep.subr.bf16.mxu1 %v7511_v11 }
0x160e   :  { %6956 = vmatpush3.bf16.msra.mxu0 %v7512_v12 }
0x160f   :  { %6978 = vmatpush3.bf16.msra.mxu1 %v7513_v25  ;;  %6957 = vmatprep.subr.bf16.mxu0 %v7514_v29 }
0x1610   :  { %6979 = vmatprep.subr.bf16.mxu1 %v7515_v40 }
0x1612   :  { %6958 = vmatpush3.bf16.msra.mxu0 %v7516_v56 }
0x1613   :  { %6980 = vmatpush3.bf16.msra.mxu1 %v7517_v50  ;;  %6959 = vmatprep.subr.bf16.mxu0 %v7518_v58 }
0x1614   :  { %6981 = vmatprep.subr.bf16.mxu1 %v7519_v52 }
0x1616   :  { %6960 = vmatpush3.bf16.msra.mxu0 %v7520_v54 }
0x1617   :  { %6982 = vmatpush3.bf16.msra.mxu1 %v7521_v10  ;;  %6961 = vmatprep.subr.bf16.mxu0 %v7522_v18 }
0x1618   :  { %6983 = vmatprep.subr.bf16.mxu1 %v7523_v30 }
0x161a   :  { %6962 = vmatpush3.bf16.msra.mxu0 %v7524_v15 }
0x161b   :  { %6984 = vmatpush3.bf16.msra.mxu1 %v7525_v60  ;;  %6963 = vmatprep.subr.bf16.mxu0 %v7526_v1 }
0x161c   :  { %6985 = vmatprep.subr.bf16.mxu1 %v7527_v35 }
0x161e   :  { %6964 = vmatpush3.bf16.msra.mxu0 %v7528_v17 }
0x161f   :  { %6986 = vmatpush3.bf16.msra.mxu1 %v7529_v24  ;;  %6965 = vmatprep.subr.bf16.mxu0 %v7530_v38 }
0x1620   :  { %6987 = vmatprep.subr.bf16.mxu1 %v7531_v4 }
0x1622   :  { %6966 = vmatpush3.bf16.msra.mxu0 %v7532_v37 }
0x1623   :  { %6988 = vmatpush3.bf16.msra.mxu1 %v7533_v3  ;;  %6967 = vmatprep.subr.bf16.mxu0 %v7534_v16 }
0x1624   :  { %6989 = vmatprep.subr.bf16.mxu1 %v7535_v44 }
0x1626   :  { %6968 = vmatpush3.bf16.msra.mxu0 %v7536_v51 }
0x1627   :  { %6990 = vmatpush3.bf16.msra.mxu1 %v7537_v53 }
0x1628   :  { %7173 = vmatprep.subr.bf16.mxu1 %v7673_v0 }
0x1629   :  { %5586 = vmatmul.mubr.bf16.vlgmr.msra.gmra.mrb[96].mxu0 %v4270_v7 }
0x162a   :  { %5627 = vmatmul.mubr.bf16.vlgmr.msra.gmra.mrb[96].mxu1 %v4272_v9  ;;  %7170 = vmatprep.mubr.msk.f32.mxu0 %vm7675_vm2, %v7673_v0 }
0x162b   :  { %7175 = vmatprep.mubr.msk.bf16.mxu1 %vm7675_vm2, %v7673_v0 }
0x169c   :  { %v6837_v13 = vpop.f32.mrb[84].mxu0  ;;  %v6859_v34 = vpop.f32.mrb[84].mxu1 }
0x169d   :  { %v6838_v49 = vpop.f32.mrb[85].mxu0  ;;  %v6860_v55 = vpop.f32.mrb[85].mxu1 }
0x169e   :  { %v6839_v21 = vadd.f32 %v6838_v49, %v6837_v13  ;;  %v6861_v31 = vadd.f32 %v6860_v55, %v6859_v34  ;;  %v6840_v46 = vpop.f32.mrb[86].mxu0  ;;  %v6862_v20 = vpop.f32.mrb[86].mxu1 }
0x169f   :  { %v6841_v23 = vpop.f32.mrb[87].mxu0  ;;  %v6863_v26 = vpop.f32.mrb[87].mxu1 }
0x16a0   :  { %v5342_v48 = vadd.f32 %v6839_v21, %v6418_v8  ;;  %v6842_v43 = vadd.f32 %v6841_v23, %v6840_v46  ;;  %v6864_v47 = vadd.f32 %v6863_v26, %v6862_v20 }
0x16a2   :  { %v5383_v14 = vadd.f32 %v6861_v31, %v5342_v48  ;;  %v5345_v19 = vadd.f32 %v6842_v43, %v6418_v8 }
0x16a4   :  { %v5386_v0 = vadd.f32 %v6864_v47, %v5345_v19 }
0x16bc   :  { %v6881_v27 = vpop.f32.mrb[88].mxu0  ;;  %v6903_v61 = vpop.f32.mrb[88].mxu1 }
0x16bd   :  { %v6882_v28 = vpop.f32.mrb[89].mxu0  ;;  %v6904_v22 = vpop.f32.mrb[89].mxu1 }
0x16be   :  { %v6883_v45 = vadd.f32 %v6882_v28, %v6881_v27  ;;  %v6905_v62 = vadd.f32 %v6904_v22, %v6903_v61  ;;  %v6884_v59 = vpop.f32.mrb[90].mxu0  ;;  %v6906_v63 = vpop.f32.mrb[90].mxu1 }
0x16bf   :  { %v6885_v2 = vpop.f32.mrb[91].mxu0  ;;  %v6907_v32 = vpop.f32.mrb[91].mxu1 }
0x16c0   :  { %v5424_v33 = vadd.f32 %v6883_v45, %v5383_v14  ;;  %v6886_v57 = vadd.f32 %v6885_v2, %v6884_v59  ;;  %v6908_v36 = vadd.f32 %v6907_v32, %v6906_v63  ;;  %v6549_v2 = vld [vmem:[%s9564_s14 + $0x1] ss:$0 sm:$0xff] }
0x16c2   :  { %v5465_v39 = vadd.f32 %v6905_v62, %v5424_v33  ;;  %v5427_v42 = vadd.f32 %v6886_v57, %v5386_v0  ;;  %v7680_v0 = vmov 0.0|0.0  }
0x16c3   :  { %7239 = vmatprep.subr.bf16.mxu0 %v7680_v0 }
0x16c4   :  { %v5468_v11 = vadd.f32 %v6908_v36, %v5427_v42  ;;  %v6550_v36 = vld [vmem:[%s9565_s15 + $0x1] ss:$0 sm:$0xff]  ;;  %s7681_s15 = smov [#allocation2]  }
0x16c5   :  { %s5824_s21 = sshll.u32 %s7681_s15, 4  ;;  %s5825_s21 = int_to_ptr.vmem [resolvable:$true] %s5824_s21 }
0x16c6   :  { %p7654_p1 = scmp.lt.s32.totalorder %s5825_s21, %s5825_s21 }
0x16dc   :  { %v6925_v5 = vpop.f32.mrb[92].mxu0 }
0x16dd   :  { %v6947_v12 = vpop.f32.mrb[92].mxu1  ;;  %v6926_v25 = vpop.f32.mrb[93].mxu0 }
0x16de   :  { %v6927_v29 = vadd.f32 %v6926_v25, %v6925_v5  ;;  %v6948_v40 = vpop.f32.mrb[93].mxu1  ;;  %v6928_v56 = vpop.f32.mrb[94].mxu0 }
0x16df   :  { %v6949_v50 = vadd.f32 %v6948_v40, %v6947_v12  ;;  %v6950_v58 = vpop.f32.mrb[94].mxu1  ;;  %v6929_v52 = vpop.f32.mrb[95].mxu0  ;;  %v5683_v12 = vld [vmem:[%s9572_s22] sm:$0x3]  ;;  %s7649_s22 = scalar_lea.vmem %s5825_s21, 32 }
0x16e0   :  { %v5506_v54 = vadd.f32 %v6927_v29, %v5465_v39  ;;  %v6930_v10 = vadd.f32 %v6929_v52, %v6928_v56  ;;  %v6951_v18 = vpop.f32.mrb[95].mxu1  ;;  %v6552_v56 = vld [vmem:[%s9567_s17] ss:$0 sm:$0xff]  ;;  %p7650_p0 = scmp.ne.s32.totalorder %s5825_s21, %s7649_s22  ;;  %p7655_p2 = scmp.lt.s32.totalorder %s7649_s22, %s7649_s22 }
0x16e1   :  { %v6952_v30 = vadd.f32 %v6951_v18, %v6950_v58 }
0x16e2   :  { %v5547_v15 = vadd.f32 %v6949_v50, %v5506_v54  ;;  %v5509_v60 = vadd.f32 %v6930_v10, %v5468_v11  ;;  %p7656_p3 = por %p7655_p2, %p7654_p1 }
0x16e4   :  { %v5550_v1 = vadd.f32 %v6952_v30, %v5509_v60  ;;  %p7657_p4 = pnand %p7656_p3, %p7650_p0 }
0x16fc   :  { %v6969_v35 = vpop.f32.mrb[96].mxu0 }
0x16fd   :  { %v6991_v17 = vpop.f32.mrb[96].mxu1  ;;  %v6970_v24 = vpop.f32.mrb[97].mxu0 }
0x16fe   :  { %v6971_v38 = vadd.f32 %v6970_v24, %v6969_v35  ;;  %v6992_v4 = vpop.f32.mrb[97].mxu1  ;;  %v6972_v37 = vpop.f32.mrb[98].mxu0 }
0x16ff   :  { %v6993_v3 = vadd.f32 %v6992_v4, %v6991_v17  ;;  %v6994_v16 = vpop.f32.mrb[98].mxu1  ;;  %v6973_v44 = vpop.f32.mrb[99].mxu0 }
0x1700   :  { %v5588_v51 = vadd.f32 %v6971_v38, %v5547_v15  ;;  %v6974_v53 = vadd.f32 %v6973_v44, %v6972_v37  ;;  %v6995_v7 = vpop.f32.mrb[99].mxu1 }
0x1701   :  { %v6996_v9 = vadd.f32 %v6995_v7, %v6994_v16 }
0x1702   :  { %v5629_v13 = vadd.f32 %v6993_v3, %v5588_v51  ;;  %v5591_v34 = vadd.f32 %v6974_v53, %v5550_v1 }
0x1704   :  { %v5632_v8 = vadd.f32 %v6996_v9, %v5591_v34  ;;  %v5635_v49 = vadd.f32 %v5629_v13, %v8930_v41 }
0x1706   :  { %v5641_v55 = vsel %vm154_vm4, %v5635_v49, 0.0  ;;  %v5636_v21 = vadd.f32 %v5632_v8, %v8935_v6  ;;  %v7538_v6 = vld [vmem:[%s9566_s16] sm:$0xff]  }
0x1707   :  { %5642 = vadd.xlane.f32.xlu1 %v5641_v55  ;;  %7174 = vmatpush3.bf16.msra.mxu1 %v7538_v6 }
0x1708   :  { %v5644_v31 = vsel %vm154_vm4, %v5636_v21, 0.0 }
0x170b   :  { %5645 = vadd.xlane.f32.xlu1 %v5644_v31 }
0x1794   :  { %v5643_v46 = vpop.xlane.xlu1 %5642 }
0x1795   :  { %v5647_v20 = vmul.f32 0.0625, %v5643_v46 }
0x1797   :  { %v5649_v23 = vsub.f32 %v5635_v49, %v5647_v20 }
0x1798   :  { %v5646_v26 = vpop.xlane.xlu1 %5645 }
0x1799   :  { %v5648_v48 = vmul.f32 0.0625, %v5646_v26  ;;  %v5651_v43 = vmul.f32 %v5649_v23, %v5649_v23 }
0x179b   :  { %v5650_v47 = vsub.f32 %v5636_v21, %v5648_v48  ;;  %v5653_v14 = vsel %vm154_vm4, %v5651_v43, 0.0 }
0x179c   :  { %5654 = vadd.xlane.f32.xlu0 %v5653_v14 }
0x179d   :  { %v5652_v19 = vmul.f32 %v5650_v47, %v5650_v47 }
0x179f   :  { %v5656_v41 = vsel %vm154_vm4, %v5652_v19, 0.0 }
0x17a0   :  { %5657 = vadd.xlane.f32.xlu1 %v5656_v41 }
0x1829   :  { %v5655_v27 = vpop.xlane.xlu0 %5654 }
0x182a   :  { %v5659_v61 = vmul.f32 0.0625, %v5655_v27 }
0x182c   :  { %v5661_v28 = vadd.f32 1e-05, %v5659_v61 }
0x182d   :  { %v5658_v22 = vpop.xlane.xlu1 %5657 }
0x182e   :  { %7619 = vrsqrt.f32 %v5661_v28  ;;  %v5660_v45 = vmul.f32 0.0625, %v5658_v22 }
0x1830   :  { %v5662_v62 = vadd.f32 1e-05, %v5660_v45 }
0x1832   :  { %7621 = vrsqrt.f32 %v5662_v62 }
0x1838   :  { %v7620_v59 = vpop.eup %7619 }
0x1839   :  { %v5665_v63 = vmul.f32 %v7620_v59, %v5649_v23 }
0x183b   :  { %v5673_v57 = vmul.f32 %v6549_v2, %v5665_v63 }
0x183c   :  { %v7622_v32 = vpop.eup %7621 }
0x183d   :  { %v5666_v33 = vmul.f32 %v7622_v32, %v5650_v47  ;;  %v5681_v42 = vadd.f32 %v6550_v36, %v5673_v57 }
0x183f   :  { %v5674_v39 = vmul.f32 %v6549_v2, %v5666_v33 }
0x1841   :  { %v5682_v11 = vadd.f32 %v6550_v36, %v5674_v39 }
0x1843   :  { %v7240_v5 = vpack.c.bf16 %v5682_v11, %v5681_v42 }
0x1845   :  { %7241 = vmatpush3.bf16.msra.mxu0 %v7240_v5 }
0x1848   :  { %7171 = vmatmul.mubr.msk.f32.vlgmr.msra.gmra.mrb[100].mxu0 %vm154_vm4, %v5683_v12 }
0x191b   :  { %v5753_v25 = vpop.f32.mrb[100].mxu0 }
0x191c   :  { %v5757_v29 = vpack.c.bf16 %v5753_v25, %v5753_v25  ;;  %v7172_v40 = vpop.f32.mrb[101].mxu0 }
0x191e   :  { %7176 = vmatmul.mubr.msk.bf16.vlgmr.msra.gmra.mrb[100].mxu1 %vm154_vm4, %v5757_v29 }
0x19f1   :  { %v5810_v50 = vpop.f32.mrb[100].mxu1 }
0x19f2   :  { %v5811_v58 = vadd.f32 %v6552_v56, %v5810_v50  ;;  %v7177_v52 = vpop.f32.mrb[101].mxu1 }
0x19f3   :  { %v5813_v54 = vpop.f32.mrb[102].mxu1 }
0x19f4   :  { %v7178_v10 = vpop.f32.mrb[103].mxu1  ;;  %5817 = vst.msk [vmem:[#allocation2] sm:$0x3] %vm5816_vm8, %v5811_v58 }
0x19f5   :  { %7660 = shalt.err (!%p7657_p4)
}
0x19f6   :  { %s7661_s17 = scalar_lea.hbm %s9574_s24, 32 }
0x19f7   :  { %p7662_p5 = scmp.ne.s32.totalorder %s9574_s24, %s7661_s17  ;;  %p7665_p6 = scmp.lt.u32.totalorder %s7661_s17, %s9574_s24 }
0x19f9   :  { %p7667_p7 = pnand %p7665_p6, %p7662_p5 }
0x19fb   :  { %7670 = shalt.err (!%p7667_p7)
}
0x19fc   :  { %5827 = dma.vmem_to_hbm [thread:$0]  %s5825_s21, 32, %s9574_s24, [#allocation3]  }
0x19fd   :  { %7671 = dma.done.wait [#allocation3], 32  }
0x19fe   :  { %7672 = vsyncadd [#allocation3], 4294967264 }
0x19ff   :  { %5831 = vsyncpa [#allocation3], 1 }

</bundles_post_ra>
